<compile_context>
chip_gen: v7x
topology: tpu7x:2x2x1
jax: 0.10.0
libtpu: 0.0.40
codegen_flags: <defaults>
</compile_context>

<pallas_src>
import functools

import jax
import jax.numpy as jnp
from jax import lax
from jax.experimental import pallas as pl
from jax.experimental.pallas import tpu as pltpu

EPS = 1e-5                      # nn.BatchNorm2d default
_LANE = 128
_VMEM_LIMIT = 48 * 1024 * 1024


# ---------------------------------------------------------------------------
# Small static helpers (trace-time Python only)
# ---------------------------------------------------------------------------
def _round_up(x, m):
    return (x + m - 1) // m * m


def _pick_row_block(m_rows, wo, target_y_rows):
    """Largest divisor t of m_rows with t*wo a multiple of 8 and t*wo <= target."""
    target = max(1, min(m_rows, target_y_rows // max(wo, 1)))
    for t in range(target, 0, -1):
        if m_rows % t == 0 and (t * wo) % 8 == 0:
            return t
    return m_rows


def _pick_div(m, target, mult=8):
    for t in range(min(target, m), 0, -1):
        if m % t == 0 and (t % mult == 0 or t == m):
            return t
    return m


def _const_map(*blk):
    return lambda i: blk


def _row_map(ch_block):
    return lambda i: (i, ch_block)


# ---------------------------------------------------------------------------
# Pallas kernel 1: tap-decomposed 3x3 conv (9 accumulated MXU matmuls, bf16 in,
# f32 accumulate) + per-tile BN partial statistics (sum, sum of squares).
# ---------------------------------------------------------------------------
def _make_conv_kernel(n_views, stride, wo, tm, cin, cpad):
    # tap (ky, kx) -> (flat tap index, view index, column offset in that view)
    taps = [(ky * 3 + kx, ky * stride + (kx % stride), kx // stride)
            for ky in range(3) for kx in range(3)]

    def kernel(w_ref, *refs):
        x_refs = refs[:n_views]
        y_ref = refs[n_views]
        st_ref = refs[n_views + 1]

        acc = jnp.zeros((tm * wo, cpad), jnp.float32)
        for v in range(n_views):
            xv = x_refs[v][...]                       # (tm, wp, cin): one load/view
            for t, view, off in taps:
                if view != v:
                    continue
                xs = xv[:, off:off + wo, :].reshape(tm * wo, cin)
                acc = acc + jnp.dot(xs, w_ref[t],
                                    preferred_element_type=jnp.float32)
        y_ref[...] = acc
        # Per-tile BN partials (reduced outside the kernel -> grid stays parallel).
        ssum = jnp.sum(acc, axis=0, keepdims=True)
        ssq = jnp.sum(acc * acc, axis=0, keepdims=True)
        st_ref[...] = jnp.concatenate([ssum, ssq], axis=0)[None]

    return kernel


def _conv_pass(views, w_taps, stride, wo, target_y_rows):
    """views: list of (N*Ho, Wpp, Cin) bf16 arrays; w_taps: (9, Cin, Cpad) bf16."""
    m_rows, _, cin = views[0].shape
    cpad = w_taps.shape[2]
    tm = _pick_row_block(m_rows, wo, target_y_rows)
    n_blocks = m_rows // tm
    m_total = m_rows * wo

    in_specs = [pl.BlockSpec(w_taps.shape, _const_map(0, 0, 0))]   # resident weights
    in_specs += [pl.BlockSpec((tm, v.shape[1], cin), lambda i: (i, 0, 0))
                 for v in views]
    out_specs = (
        pl.BlockSpec((tm * wo, cpad), lambda i: (i, 0)),           # lane-dense y
        pl.BlockSpec((1, 2, cpad), lambda i: (i, 0, 0)),           # partial stats
    )
    out_shape = (
        jax.ShapeDtypeStruct((m_total, cpad), jnp.float32),
        jax.ShapeDtypeStruct((n_blocks, 2, cpad), jnp.float32),
    )
    return pl.pallas_call(
        _make_conv_kernel(len(views), stride, wo, tm, cin, cpad),
        grid=(n_blocks,),
        in_specs=in_specs,
        out_specs=out_specs,
        out_shape=out_shape,
        compiler_params=pltpu.CompilerParams(
            dimension_semantics=("parallel",),
            vmem_limit_bytes=_VMEM_LIMIT),
    )(w_taps, *views)


# ---------------------------------------------------------------------------
# Pallas kernel 2: BN apply (affine) [+ residual with its own folded BN] [+ ReLU]
# ---------------------------------------------------------------------------
def _make_apply_kernel(has_res, relu):
    def kernel(y_ref, sc_ref, bi_ref, *rest):
        if has_res:
            r_ref, rs_ref, rb_ref, o_ref = rest
        else:
            (o_ref,) = rest
        out = y_ref[...].astype(jnp.float32) * sc_ref[...] + bi_ref[...]
        if has_res:
            out = out + r_ref[...].astype(jnp.float32) * rs_ref[...] + rb_ref[...]
        if relu:
            out = jnp.maximum(out, 0.0)
        o_ref[...] = out.astype(o_ref.dtype)

    return kernel


def _apply_pass(y, ch_block, scale, bias, *, relu, out_dtype,
                residual=None, target_rows=4096):
    m_total = y.shape[0]
    cpad = scale.shape[1]
    tr = _pick_div(m_total, target_rows)
    n_blocks = m_total // tr

    inputs = [y, scale, bias]
    in_specs = [pl.BlockSpec((tr, cpad), _row_map(ch_block)),
                pl.BlockSpec((1, cpad), _const_map(0, 0)),
                pl.BlockSpec((1, cpad), _const_map(0, 0))]
    has_res = residual is not None
    if has_res:
        r_arr, r_cb, r_scale, r_bias = residual
        inputs += [r_arr, r_scale, r_bias]
        in_specs += [pl.BlockSpec((tr, cpad), _row_map(r_cb)),
                     pl.BlockSpec((1, cpad), _const_map(0, 0)),
                     pl.BlockSpec((1, cpad), _const_map(0, 0))]

    return pl.pallas_call(
        _make_apply_kernel(has_res, relu),
        grid=(n_blocks,),
        in_specs=in_specs,
        out_specs=pl.BlockSpec((tr, cpad), _row_map(0)),
        out_shape=jax.ShapeDtypeStruct((m_total, cpad), out_dtype),
        compiler_params=pltpu.CompilerParams(
            dimension_semantics=("parallel",),
            vmem_limit_bytes=_VMEM_LIMIT),
    )(*inputs)


# ---------------------------------------------------------------------------
# Plain-JAX glue: weight taps, shifted activation views, BN scale/bias folding
# ---------------------------------------------------------------------------
def _tap_weights(w_oihw):
    """(Cout, Cin, 3, 3) -> (9, Cin, Cout), tap index = ky*3 + kx."""
    cout, cin = w_oihw.shape[0], w_oihw.shape[1]
    return jnp.transpose(w_oihw, (2, 3, 1, 0)).reshape(9, cin, cout)


def _build_views(x_nhwc, stride):
    """Row/phase-shifted bf16 views for a tap-decomposed 3x3 conv with pad=1.

    Returns (views, Ho, Wo); tap (ky,kx) uses views[ky*stride + kx%stride]
    columns [kx//stride : kx//stride + Wo].
    """
    xp = jnp.pad(x_nhwc, ((0, 0), (1, 1), (1, 1), (0, 0)))
    n, hp, wp, c = xp.shape
    ho = (hp - 3) // stride + 1
    wo = (wp - 3) // stride + 1
    views = []
    for ky in range(3):
        rows = xp[:, ky:ky + stride * (ho - 1) + 1:stride, :, :]   # (N, Ho, Wp, C)
        for p in range(stride):
            v = rows[:, :, p::stride, :]
            views.append(v.reshape(n * ho, v.shape[2], c).astype(jnp.bfloat16))
    return views, ho, wo


def _bn_scale_bias(stats, count, gamma, beta, ch_start, cpad):
    """Reduce per-tile partials -> folded BN scale/bias, padded to cpad lanes."""
    ssum = jnp.sum(stats[:, 0, :], axis=0)
    ssq = jnp.sum(stats[:, 1, :], axis=0)
    mean = ssum / count
    var = jnp.maximum(ssq / count - mean * mean, 0.0)
    c = gamma.shape[0]
    m = mean[ch_start:ch_start + c]
    v = var[ch_start:ch_start + c]
    scale = gamma * lax.rsqrt(v + EPS)
    bias = beta - m * scale
    scale = jnp.pad(scale, (0, cpad - c)).reshape(1, cpad)
    bias = jnp.pad(bias, (0, cpad - c)).reshape(1, cpad)
    return scale, bias


# ---------------------------------------------------------------------------
# BasicBlock forward (NCHW in / NCHW out, matching the PyTorch module)
# ---------------------------------------------------------------------------
@functools.partial(jax.jit, static_argnames=("stride", "conv_rows", "apply_rows"))
def basic_block_forward(x_nchw, params, stride, conv_rows=2048, apply_rows=4096):
    x = jnp.transpose(x_nchw, (0, 2, 3, 1)).astype(jnp.float32)   # NHWC
    n, hgt, wid, cin = x.shape
    planes = params["w1"].shape[0]
    c1p = _round_up(planes, _LANE)
    has_proj = "ws" in params

    # -- pass 1: conv1 (+ fused projection-shortcut conv) + BN partial stats --
    w1t = jnp.pad(_tap_weights(params["w1"]),
                  ((0, 0), (0, 0), (0, c1p - planes)))
    if has_proj:
        wst = jnp.pad(_tap_weights(params["ws"]),
                      ((0, 0), (0, 0), (0, c1p - planes)))
        w_comb = jnp.concatenate([w1t, wst], axis=-1)      # (9, Cin, 2*C1p)
    else:
        w_comb = w1t                                       # (9, Cin, C1p)
    views1, ho, wo = _build_views(x, stride)
    y1, st1 = _conv_pass(views1, w_comb.astype(jnp.bfloat16), stride, wo, conv_rows)
    m_tot = n * ho * wo

    # BN1 apply + ReLU -> h (bf16, already the dtype the next matmul wants)
    sc1, b1 = _bn_scale_bias(st1, m_tot, params["g1"], params["b1"], 0, c1p)
    h_act = _apply_pass(y1, 0, sc1, b1, relu=True, out_dtype=jnp.bfloat16,
                        target_rows=apply_rows)            # (m_tot, C1p)

    # -- pass 2: conv2 on h + BN partial stats --
    w2t = jnp.pad(_tap_weights(params["w2"]),
                  ((0, 0), (0, c1p - planes), (0, c1p - planes)))
    views2, _, _ = _build_views(h_act.reshape(n, ho, wo, c1p), 1)
    y2, st2 = _conv_pass(views2, w2t.astype(jnp.bfloat16), 1, wo, conv_rows)
    sc2, b2 = _bn_scale_bias(st2, m_tot, params["g2"], params["b2"], 0, c1p)

    # -- residual path: the shortcut BN is folded into the final apply pass --
    if has_proj:
        scs, bs = _bn_scale_bias(st1, m_tot, params["gs"], params["bs"], c1p, c1p)
        residual = (y1, 1, scs, bs)                        # channel block 1 of y1
    else:
        x_res = jnp.pad(x.reshape(m_tot, cin), ((0, 0), (0, c1p - cin)))
        r_sc = jnp.pad(jnp.ones((planes,), jnp.float32),
                       (0, c1p - planes)).reshape(1, c1p)
        r_b = jnp.zeros((1, c1p), jnp.float32)
        residual = (x_res, 0, r_sc, r_b)

    out2d = _apply_pass(y2, 0, sc2, b2, relu=True, out_dtype=jnp.float32,
                        residual=residual, target_rows=apply_rows)
    out = out2d[:, :planes].reshape(n, ho, wo, planes)
    return jnp.transpose(out, (0, 3, 1, 2))                # back to NCHW


# ---------------------------------------------------------------------------
# Pure-JAX f32 reference (correctness check)
# ---------------------------------------------------------------------------
def _ref_conv_bn(x, w, gamma, beta, stride, relu, residual=None):
    y = lax.conv_general_dilated(
        x, jnp.transpose(w, (2, 3, 1, 0)),  # HWIO
        window_strides=(stride, stride), padding=((1, 1), (1, 1)),
        dimension_numbers=("NHWC", "HWIO", "NHWC"))
    mean = jnp.mean(y, axis=(0, 1, 2), keepdims=True)
    var = jnp.mean(jnp.square(y - mean), axis=(0, 1, 2), keepdims=True)
    out = gamma * (y - mean) * lax.rsqrt(var + EPS) + beta
    if residual is not None:
        out = out + residual
    if relu:
        out = jnp.maximum(out, 0.0)
    return out


def _ref_basic_block(x_nchw, params, stride):
    x = jnp.transpose(x_nchw, (0, 2, 3, 1)).astype(jnp.float32)
    h = _ref_conv_bn(x, params["w1"], params["g1"], params["b1"], stride, True)
    if "ws" in params:
        s = _ref_conv_bn(x, params["ws"], params["gs"], params["bs"], stride, False)
    else:
        s = x
    out = _ref_conv_bn(h, params["w2"], params["g2"], params["b2"], 1, True,
                       residual=s)
    return jnp.transpose(out, (0, 3, 1, 2))


# ---------------------------------------------------------------------------
def make_params(key, in_planes, planes, stride):
    ks = jax.random.split(key, 8)
    params = {
        "w1": 0.1 * jax.random.normal(ks[0], (planes, in_planes, 3, 3), jnp.float32),
        "g1": 1.0 + 0.05 * jax.random.normal(ks[1], (planes,), jnp.float32),
        "b1": 0.05 * jax.random.normal(ks[2], (planes,), jnp.float32),
        "w2": 0.1 * jax.random.normal(ks[3], (planes, planes, 3, 3), jnp.float32),
        "g2": 1.0 + 0.05 * jax.random.normal(ks[4], (planes,), jnp.float32),
        "b2": 0.05 * jax.random.normal(ks[5], (planes,), jnp.float32),
    }
    if stride != 1 or in_planes != planes:
        params["ws"] = 0.1 * jax.random.normal(ks[6], (planes, in_planes, 3, 3),
                                               jnp.float32)
        params["gs"] = jnp.ones((planes,), jnp.float32)
        params["bs"] = 0.05 * jax.random.normal(ks[7], (planes,), jnp.float32)
    return params


if __name__ == "__main__":
    key = jax.random.PRNGKey(0)
    k_x1, k_p1, k_x2, k_p2 = jax.random.split(key, 4)

    # Tolerances are loose because the matmul operands are bf16 with f32
    # accumulation; structural bugs would show up as O(0.1-1).
    ATOL = RTOL = 5e-2

    # Case 1: downsampling block with projection shortcut (stride 2).
    batch, in_planes, planes, spatial, stride = 2, 4, 8, 16, 2
    x1 = jax.random.normal(k_x1, (batch, in_planes, spatial, spatial), jnp.float32)
    p1 = make_params(k_p1, in_planes, planes, stride)
    out1 = jax.block_until_ready(basic_block_forward(x1, p1, stride))
    ref1 = _ref_basic_block(x1, p1, stride)
    assert out1.shape == (batch, planes, spatial // stride, spatial // stride)
    assert jnp.allclose(out1, ref1, atol=ATOL, rtol=RTOL), (
        "projection-block mismatch", float(jnp.max(jnp.abs(out1 - ref1))))

    # Case 2: identity-shortcut block (stride 1), with small tiles to exercise
    # the multi-block grid and the cross-tile BN-statistics accumulation path.
    x2 = jax.random.normal(k_x2, (batch, planes, spatial, spatial), jnp.float32)
    p2 = make_params(k_p2, planes, planes, 1)
    out2 = jax.block_until_ready(
        basic_block_forward(x2, p2, 1, conv_rows=128, apply_rows=128))
    ref2 = _ref_basic_block(x2, p2, 1)
    assert out2.shape == (batch, planes, spatial, spatial)
    assert jnp.allclose(out2, ref2, atol=ATOL, rtol=RTOL), (
        "identity-block mismatch", float(jnp.max(jnp.abs(out2 - ref2))))

    print("KERNEL_OK")
</pallas_src>

<mosaic_0001>
module attributes {stable_mosaic.version = 11 : i64} {
  func.func @kernel(%arg0: i32, %arg1: memref<9x4x256xbf16, #tpu.memory_space<vmem>>, %arg2: memref<16x9x4xbf16, #tpu.memory_space<vmem>>, %arg3: memref<16x9x4xbf16, #tpu.memory_space<vmem>>, %arg4: memref<16x9x4xbf16, #tpu.memory_space<vmem>>, %arg5: memref<16x9x4xbf16, #tpu.memory_space<vmem>>, %arg6: memref<16x9x4xbf16, #tpu.memory_space<vmem>>, %arg7: memref<16x9x4xbf16, #tpu.memory_space<vmem>>, %arg8: memref<128x256xf32, #tpu.memory_space<vmem>>, %arg9: memref<1x2x256xf32, #tpu.memory_space<vmem>>) attributes {dimension_semantics = [#tpu.dimension_semantics<parallel>], iteration_bounds = array<i64: 1>, scalar_prefetch = 0 : i64, scratch_operands = 0 : i64, tpu.core_type = #tpu.core_type<tc>, window_params = [{pipeline_mode = #tpu.pipeline_mode<synchronous>, transform_indices = @transform_0, window_bounds = array<i64: 9, 4, 256>}, {transform_indices = @transform_1, window_bounds = array<i64: 16, 9, 4>}, {transform_indices = @transform_2, window_bounds = array<i64: 16, 9, 4>}, {transform_indices = @transform_3, window_bounds = array<i64: 16, 9, 4>}, {transform_indices = @transform_4, window_bounds = array<i64: 16, 9, 4>}, {transform_indices = @transform_5, window_bounds = array<i64: 16, 9, 4>}, {transform_indices = @transform_6, window_bounds = array<i64: 16, 9, 4>}, {transform_indices = @transform_7, window_bounds = array<i64: 128, 256>}, {transform_indices = @transform_8, window_bounds = array<i64: 1, 2, 256>}]} {
    %cst = arith.constant 0.000000e+00 : f32
    %0 = vector.broadcast %cst : f32 to vector<128x256xf32>
    %c0 = arith.constant 0 : index
    %c0_0 = arith.constant 0 : index
    %c0_1 = arith.constant 0 : index
    %1 = vector.load %arg2[%c0, %c0_0, %c0_1] : memref<16x9x4xbf16, #tpu.memory_space<vmem>>, vector<16x9x4xbf16>
    %2 = vector.extract_strided_slice %1 {offsets = [0, 0, 0], sizes = [16, 8, 4], strides = [1, 1, 1]} : vector<16x9x4xbf16> to vector<16x8x4xbf16>
    %3 = vector.shape_cast %2 : vector<16x8x4xbf16> to vector<128x4xbf16>
    %c0_2 = arith.constant 0 : index
    %c0_3 = arith.constant 0 : index
    %c0_4 = arith.constant 0 : index
    %4 = vector.load %arg1[%c0_2, %c0_3, %c0_4] : memref<9x4x256xbf16, #tpu.memory_space<vmem>>, vector<1x4x256xbf16>
    %5 = vector.shape_cast %4 : vector<1x4x256xbf16> to vector<4x256xbf16>
    %cst_5 = arith.constant dense<0.000000e+00> : vector<128x256xf32>
    %6 = tpu.matmul %3, %5, %cst_5 {dimension_numbers = #tpu.dot_dimension_numbers<[1], [0], [0], [1], [0, 0, 1, 1], [], []>} : vector<128x4xbf16>, vector<4x256xbf16>, vector<128x256xf32> -> vector<128x256xf32>
    %7 = arith.addf %0, %6 : vector<128x256xf32>
    %8 = vector.extract_strided_slice %1 {offsets = [0, 1, 0], sizes = [16, 8, 4], strides = [1, 1, 1]} : vector<16x9x4xbf16> to vector<16x8x4xbf16>
    %9 = vector.shape_cast %8 : vector<16x8x4xbf16> to vector<128x4xbf16>
    %c2 = arith.constant 2 : index
    %c0_6 = arith.constant 0 : index
    %c0_7 = arith.constant 0 : index
    %10 = vector.load %arg1[%c2, %c0_6, %c0_7] : memref<9x4x256xbf16, #tpu.memory_space<vmem>>, vector<1x4x256xbf16>
    %11 = vector.shape_cast %10 : vector<1x4x256xbf16> to vector<4x256xbf16>
    %cst_8 = arith.constant dense<0.000000e+00> : vector<128x256xf32>
    %12 = tpu.matmul %9, %11, %cst_8 {dimension_numbers = #tpu.dot_dimension_numbers<[1], [0], [0], [1], [0, 0, 1, 1], [], []>} : vector<128x4xbf16>, vector<4x256xbf16>, vector<128x256xf32> -> vector<128x256xf32>
    %13 = arith.addf %7, %12 : vector<128x256xf32>
    %c0_9 = arith.constant 0 : index
    %c0_10 = arith.constant 0 : index
    %c0_11 = arith.constant 0 : index
    %14 = vector.load %arg3[%c0_9, %c0_10, %c0_11] : memref<16x9x4xbf16, #tpu.memory_space<vmem>>, vector<16x9x4xbf16>
    %15 = vector.extract_strided_slice %14 {offsets = [0, 0, 0], sizes = [16, 8, 4], strides = [1, 1, 1]} : vector<16x9x4xbf16> to vector<16x8x4xbf16>
    %16 = vector.shape_cast %15 : vector<16x8x4xbf16> to vector<128x4xbf16>
    %c1 = arith.constant 1 : index
    %c0_12 = arith.constant 0 : index
    %c0_13 = arith.constant 0 : index
    %17 = vector.load %arg1[%c1, %c0_12, %c0_13] : memref<9x4x256xbf16, #tpu.memory_space<vmem>>, vector<1x4x256xbf16>
    %18 = vector.shape_cast %17 : vector<1x4x256xbf16> to vector<4x256xbf16>
    %cst_14 = arith.constant dense<0.000000e+00> : vector<128x256xf32>
    %19 = tpu.matmul %16, %18, %cst_14 {dimension_numbers = #tpu.dot_dimension_numbers<[1], [0], [0], [1], [0, 0, 1, 1], [], []>} : vector<128x4xbf16>, vector<4x256xbf16>, vector<128x256xf32> -> vector<128x256xf32>
    %20 = arith.addf %13, %19 : vector<128x256xf32>
    %c0_15 = arith.constant 0 : index
    %c0_16 = arith.constant 0 : index
    %c0_17 = arith.constant 0 : index
    %21 = vector.load %arg4[%c0_15, %c0_16, %c0_17] : memref<16x9x4xbf16, #tpu.memory_space<vmem>>, vector<16x9x4xbf16>
    %22 = vector.extract_strided_slice %21 {offsets = [0, 0, 0], sizes = [16, 8, 4], strides = [1, 1, 1]} : vector<16x9x4xbf16> to vector<16x8x4xbf16>
    %23 = vector.shape_cast %22 : vector<16x8x4xbf16> to vector<128x4xbf16>
    %c3 = arith.constant 3 : index
    %c0_18 = arith.constant 0 : index
    %c0_19 = arith.constant 0 : index
    %24 = vector.load %arg1[%c3, %c0_18, %c0_19] : memref<9x4x256xbf16, #tpu.memory_space<vmem>>, vector<1x4x256xbf16>
    %25 = vector.shape_cast %24 : vector<1x4x256xbf16> to vector<4x256xbf16>
    %cst_20 = arith.constant dense<0.000000e+00> : vector<128x256xf32>
    %26 = tpu.matmul %23, %25, %cst_20 {dimension_numbers = #tpu.dot_dimension_numbers<[1], [0], [0], [1], [0, 0, 1, 1], [], []>} : vector<128x4xbf16>, vector<4x256xbf16>, vector<128x256xf32> -> vector<128x256xf32>
    %27 = arith.addf %20, %26 : vector<128x256xf32>
    %28 = vector.extract_strided_slice %21 {offsets = [0, 1, 0], sizes = [16, 8, 4], strides = [1, 1, 1]} : vector<16x9x4xbf16> to vector<16x8x4xbf16>
    %29 = vector.shape_cast %28 : vector<16x8x4xbf16> to vector<128x4xbf16>
    %c5 = arith.constant 5 : index
    %c0_21 = arith.constant 0 : index
    %c0_22 = arith.constant 0 : index
    %30 = vector.load %arg1[%c5, %c0_21, %c0_22] : memref<9x4x256xbf16, #tpu.memory_space<vmem>>, vector<1x4x256xbf16>
    %31 = vector.shape_cast %30 : vector<1x4x256xbf16> to vector<4x256xbf16>
    %cst_23 = arith.constant dense<0.000000e+00> : vector<128x256xf32>
    %32 = tpu.matmul %29, %31, %cst_23 {dimension_numbers = #tpu.dot_dimension_numbers<[1], [0], [0], [1], [0, 0, 1, 1], [], []>} : vector<128x4xbf16>, vector<4x256xbf16>, vector<128x256xf32> -> vector<128x256xf32>
    %33 = arith.addf %27, %32 : vector<128x256xf32>
    %c0_24 = arith.constant 0 : index
    %c0_25 = arith.constant 0 : index
    %c0_26 = arith.constant 0 : index
    %34 = vector.load %arg5[%c0_24, %c0_25, %c0_26] : memref<16x9x4xbf16, #tpu.memory_space<vmem>>, vector<16x9x4xbf16>
    %35 = vector.extract_strided_slice %34 {offsets = [0, 0, 0], sizes = [16, 8, 4], strides = [1, 1, 1]} : vector<16x9x4xbf16> to vector<16x8x4xbf16>
    %36 = vector.shape_cast %35 : vector<16x8x4xbf16> to vector<128x4xbf16>
    %c4 = arith.constant 4 : index
    %c0_27 = arith.constant 0 : index
    %c0_28 = arith.constant 0 : index
    %37 = vector.load %arg1[%c4, %c0_27, %c0_28] : memref<9x4x256xbf16, #tpu.memory_space<vmem>>, vector<1x4x256xbf16>
    %38 = vector.shape_cast %37 : vector<1x4x256xbf16> to vector<4x256xbf16>
    %cst_29 = arith.constant dense<0.000000e+00> : vector<128x256xf32>
    %39 = tpu.matmul %36, %38, %cst_29 {dimension_numbers = #tpu.dot_dimension_numbers<[1], [0], [0], [1], [0, 0, 1, 1], [], []>} : vector<128x4xbf16>, vector<4x256xbf16>, vector<128x256xf32> -> vector<128x256xf32>
    %40 = arith.addf %33, %39 : vector<128x256xf32>
    %c0_30 = arith.constant 0 : index
    %c0_31 = arith.constant 0 : index
    %c0_32 = arith.constant 0 : index
    %41 = vector.load %arg6[%c0_30, %c0_31, %c0_32] : memref<16x9x4xbf16, #tpu.memory_space<vmem>>, vector<16x9x4xbf16>
    %42 = vector.extract_strided_slice %41 {offsets = [0, 0, 0], sizes = [16, 8, 4], strides = [1, 1, 1]} : vector<16x9x4xbf16> to vector<16x8x4xbf16>
    %43 = vector.shape_cast %42 : vector<16x8x4xbf16> to vector<128x4xbf16>
    %c6 = arith.constant 6 : index
    %c0_33 = arith.constant 0 : index
    %c0_34 = arith.constant 0 : index
    %44 = vector.load %arg1[%c6, %c0_33, %c0_34] : memref<9x4x256xbf16, #tpu.memory_space<vmem>>, vector<1x4x256xbf16>
    %45 = vector.shape_cast %44 : vector<1x4x256xbf16> to vector<4x256xbf16>
    %cst_35 = arith.constant dense<0.000000e+00> : vector<128x256xf32>
    %46 = tpu.matmul %43, %45, %cst_35 {dimension_numbers = #tpu.dot_dimension_numbers<[1], [0], [0], [1], [0, 0, 1, 1], [], []>} : vector<128x4xbf16>, vector<4x256xbf16>, vector<128x256xf32> -> vector<128x256xf32>
    %47 = arith.addf %40, %46 : vector<128x256xf32>
    %48 = vector.extract_strided_slice %41 {offsets = [0, 1, 0], sizes = [16, 8, 4], strides = [1, 1, 1]} : vector<16x9x4xbf16> to vector<16x8x4xbf16>
    %49 = vector.shape_cast %48 : vector<16x8x4xbf16> to vector<128x4xbf16>
    %c8 = arith.constant 8 : index
    %c0_36 = arith.constant 0 : index
    %c0_37 = arith.constant 0 : index
    %50 = vector.load %arg1[%c8, %c0_36, %c0_37] : memref<9x4x256xbf16, #tpu.memory_space<vmem>>, vector<1x4x256xbf16>
    %51 = vector.shape_cast %50 : vector<1x4x256xbf16> to vector<4x256xbf16>
    %cst_38 = arith.constant dense<0.000000e+00> : vector<128x256xf32>
    %52 = tpu.matmul %49, %51, %cst_38 {dimension_numbers = #tpu.dot_dimension_numbers<[1], [0], [0], [1], [0, 0, 1, 1], [], []>} : vector<128x4xbf16>, vector<4x256xbf16>, vector<128x256xf32> -> vector<128x256xf32>
    %53 = arith.addf %47, %52 : vector<128x256xf32>
    %c0_39 = arith.constant 0 : index
    %c0_40 = arith.constant 0 : index
    %c0_41 = arith.constant 0 : index
    %54 = vector.load %arg7[%c0_39, %c0_40, %c0_41] : memref<16x9x4xbf16, #tpu.memory_space<vmem>>, vector<16x9x4xbf16>
    %55 = vector.extract_strided_slice %54 {offsets = [0, 0, 0], sizes = [16, 8, 4], strides = [1, 1, 1]} : vector<16x9x4xbf16> to vector<16x8x4xbf16>
    %56 = vector.shape_cast %55 : vector<16x8x4xbf16> to vector<128x4xbf16>
    %c7 = arith.constant 7 : index
    %c0_42 = arith.constant 0 : index
    %c0_43 = arith.constant 0 : index
    %57 = vector.load %arg1[%c7, %c0_42, %c0_43] : memref<9x4x256xbf16, #tpu.memory_space<vmem>>, vector<1x4x256xbf16>
    %58 = vector.shape_cast %57 : vector<1x4x256xbf16> to vector<4x256xbf16>
    %cst_44 = arith.constant dense<0.000000e+00> : vector<128x256xf32>
    %59 = tpu.matmul %56, %58, %cst_44 {dimension_numbers = #tpu.dot_dimension_numbers<[1], [0], [0], [1], [0, 0, 1, 1], [], []>} : vector<128x4xbf16>, vector<4x256xbf16>, vector<128x256xf32> -> vector<128x256xf32>
    %60 = arith.addf %53, %59 : vector<128x256xf32>
    %c0_45 = arith.constant 0 : index
    %c0_46 = arith.constant 0 : index
    %61 = vector.load %arg8[%c0_45, %c0_46] : memref<128x256xf32, #tpu.memory_space<vmem>>, vector<128x256xf32>
    tpu.vector_store %arg8[%c0_45, %c0_46], %60 {strides = array<i32>} : memref<128x256xf32, #tpu.memory_space<vmem>>, vector<128x256xf32>,
    %cst_47 = arith.constant dense<0.000000e+00> : vector<256xf32>
    %62 = vector.multi_reduction <add>, %60, %cst_47 [0] : vector<128x256xf32> to vector<256xf32>
    %63 = vector.shape_cast %62 : vector<256xf32> to vector<1x256xf32>
    %64 = arith.mulf %60, %60 : vector<128x256xf32>
    %cst_48 = arith.constant dense<0.000000e+00> : vector<256xf32>
    %65 = vector.multi_reduction <add>, %64, %cst_48 [0] : vector<128x256xf32> to vector<256xf32>
    %66 = vector.shape_cast %65 : vector<256xf32> to vector<1x256xf32>
    %67 = tpu.concatenate %63, %66 in 0 : vector<1x256xf32>, vector<1x256xf32> -> vector<2x256xf32>
    %68 = vector.shape_cast %67 : vector<2x256xf32> to vector<1x2x256xf32>
    %c0_49 = arith.constant 0 : index
    %c0_50 = arith.constant 0 : index
    %c0_51 = arith.constant 0 : index
    %69 = vector.load %arg9[%c0_49, %c0_50, %c0_51] : memref<1x2x256xf32, #tpu.memory_space<vmem>>, vector<1x2x256xf32>
    tpu.vector_store %arg9[%c0_49, %c0_50, %c0_51], %68 {strides = array<i32>} : memref<1x2x256xf32, #tpu.memory_space<vmem>>, vector<1x2x256xf32>,
    return
  }
  func.func @transform_0(%arg0: i32) -> (i32, i32, i32) {
    %c0_i32 = arith.constant 0 : i32
    %c0_i32_0 = arith.constant 0 : i32
    %c0_i32_1 = arith.constant 0 : i32
    %c0_i32_2 = arith.constant 0 : i32
    return %c0_i32, %c0_i32_0, %c0_i32_1 : i32, i32, i32
  }
  func.func @transform_1(%arg0: i32) -> (i32, i32, i32) {
    %c0_i32 = arith.constant 0 : i32
    %c0_i32_0 = arith.constant 0 : i32
    %c0_i32_1 = arith.constant 0 : i32
    return %arg0, %c0_i32, %c0_i32_0 : i32, i32, i32
  }
  func.func @transform_2(%arg0: i32) -> (i32, i32, i32) {
    %c0_i32 = arith.constant 0 : i32
    %c0_i32_0 = arith.constant 0 : i32
    %c0_i32_1 = arith.constant 0 : i32
    return %arg0, %c0_i32, %c0_i32_0 : i32, i32, i32
  }
  func.func @transform_3(%arg0: i32) -> (i32, i32, i32) {
    %c0_i32 = arith.constant 0 : i32
    %c0_i32_0 = arith.constant 0 : i32
    %c0_i32_1 = arith.constant 0 : i32
    return %arg0, %c0_i32, %c0_i32_0 : i32, i32, i32
  }
  func.func @transform_4(%arg0: i32) -> (i32, i32, i32) {
    %c0_i32 = arith.constant 0 : i32
    %c0_i32_0 = arith.constant 0 : i32
    %c0_i32_1 = arith.constant 0 : i32
    return %arg0, %c0_i32, %c0_i32_0 : i32, i32, i32
  }
  func.func @transform_5(%arg0: i32) -> (i32, i32, i32) {
    %c0_i32 = arith.constant 0 : i32
    %c0_i32_0 = arith.constant 0 : i32
    %c0_i32_1 = arith.constant 0 : i32
    return %arg0, %c0_i32, %c0_i32_0 : i32, i32, i32
  }
  func.func @transform_6(%arg0: i32) -> (i32, i32, i32) {
    %c0_i32 = arith.constant 0 : i32
    %c0_i32_0 = arith.constant 0 : i32
    %c0_i32_1 = arith.constant 0 : i32
    return %arg0, %c0_i32, %c0_i32_0 : i32, i32, i32
  }
  func.func @transform_7(%arg0: i32) -> (i32, i32) {
    %c0_i32 = arith.constant 0 : i32
    %c0_i32_0 = arith.constant 0 : i32
    return %arg0, %c0_i32 : i32, i32
  }
  func.func @transform_8(%arg0: i32) -> (i32, i32, i32) {
    %c0_i32 = arith.constant 0 : i32
    %c0_i32_0 = arith.constant 0 : i32
    %c0_i32_1 = arith.constant 0 : i32
    return %arg0, %c0_i32, %c0_i32_0 : i32, i32, i32
  }
}

module attributes {stable_mosaic.version = 11 : i64} {
  func.func @kernel(%arg0: i32, %arg1: memref<128x128xf32, #tpu.memory_space<vmem>>, %arg2: memref<1x128xf32, #tpu.memory_space<vmem>>, %arg3: memref<1x128xf32, #tpu.memory_space<vmem>>, %arg4: memref<128x128xbf16, #tpu.memory_space<vmem>>) attributes {dimension_semantics = [#tpu.dimension_semantics<parallel>], iteration_bounds = array<i64: 1>, scalar_prefetch = 0 : i64, scratch_operands = 0 : i64, tpu.core_type = #tpu.core_type<tc>, window_params = [{transform_indices = @transform_0, window_bounds = array<i64: 128, 128>}, {pipeline_mode = #tpu.pipeline_mode<synchronous>, transform_indices = @transform_1, window_bounds = array<i64: 1, 128>}, {pipeline_mode = #tpu.pipeline_mode<synchronous>, transform_indices = @transform_2, window_bounds = array<i64: 1, 128>}, {transform_indices = @transform_3, window_bounds = array<i64: 128, 128>}]} {
    %c0 = arith.constant 0 : index
    %c0_0 = arith.constant 0 : index
    %0 = vector.load %arg1[%c0, %c0_0] : memref<128x128xf32, #tpu.memory_space<vmem>>, vector<128x128xf32>
    %c0_1 = arith.constant 0 : index
    %c0_2 = arith.constant 0 : index
    %1 = vector.load %arg2[%c0_1, %c0_2] : memref<1x128xf32, #tpu.memory_space<vmem>>, vector<1x128xf32>
    %2 = vector.broadcast %1 : vector<1x128xf32> to vector<128x128xf32>
    %3 = arith.mulf %0, %2 : vector<128x128xf32>
    %c0_3 = arith.constant 0 : index
    %c0_4 = arith.constant 0 : index
    %4 = vector.load %arg3[%c0_3, %c0_4] : memref<1x128xf32, #tpu.memory_space<vmem>>, vector<1x128xf32>
    %5 = vector.broadcast %4 : vector<1x128xf32> to vector<128x128xf32>
    %6 = arith.addf %3, %5 : vector<128x128xf32>
    %cst = arith.constant 0.000000e+00 : f32
    %7 = vector.broadcast %cst : f32 to vector<128x128xf32>
    %8 = arith.maximumf %6, %7 : vector<128x128xf32>
    %9 = arith.truncf %8 : vector<128x128xf32> to vector<128x128xbf16>
    %c0_5 = arith.constant 0 : index
    %c0_6 = arith.constant 0 : index
    %10 = vector.load %arg4[%c0_5, %c0_6] : memref<128x128xbf16, #tpu.memory_space<vmem>>, vector<128x128xbf16>
    tpu.vector_store %arg4[%c0_5, %c0_6], %9 {strides = array<i32>} : memref<128x128xbf16, #tpu.memory_space<vmem>>, vector<128x128xbf16>,
    return
  }
  func.func @transform_0(%arg0: i32) -> (i32, i32) {
    %c0_i32 = arith.constant 0 : i32
    %c0_i32_0 = arith.constant 0 : i32
    return %arg0, %c0_i32 : i32, i32
  }
  func.func @transform_1(%arg0: i32) -> (i32, i32) {
    %c0_i32 = arith.constant 0 : i32
    %c0_i32_0 = arith.constant 0 : i32
    %c0_i32_1 = arith.constant 0 : i32
    return %c0_i32, %c0_i32_0 : i32, i32
  }
  func.func @transform_2(%arg0: i32) -> (i32, i32) {
    %c0_i32 = arith.constant 0 : i32
    %c0_i32_0 = arith.constant 0 : i32
    %c0_i32_1 = arith.constant 0 : i32
    return %c0_i32, %c0_i32_0 : i32, i32
  }
  func.func @transform_3(%arg0: i32) -> (i32, i32) {
    %c0_i32 = arith.constant 0 : i32
    %c0_i32_0 = arith.constant 0 : i32
    return %arg0, %c0_i32 : i32, i32
  }
}

module attributes {stable_mosaic.version = 11 : i64} {
  func.func @kernel(%arg0: i32, %arg1: memref<9x128x128xbf16, #tpu.memory_space<vmem>>, %arg2: memref<16x10x128xbf16, #tpu.memory_space<vmem>>, %arg3: memref<16x10x128xbf16, #tpu.memory_space<vmem>>, %arg4: memref<16x10x128xbf16, #tpu.memory_space<vmem>>, %arg5: memref<128x128xf32, #tpu.memory_space<vmem>>, %arg6: memref<1x2x128xf32, #tpu.memory_space<vmem>>) attributes {dimension_semantics = [#tpu.dimension_semantics<parallel>], iteration_bounds = array<i64: 1>, scalar_prefetch = 0 : i64, scratch_operands = 0 : i64, tpu.core_type = #tpu.core_type<tc>, window_params = [{pipeline_mode = #tpu.pipeline_mode<synchronous>, transform_indices = @transform_0, window_bounds = array<i64: 9, 128, 128>}, {transform_indices = @transform_1, window_bounds = array<i64: 16, 10, 128>}, {transform_indices = @transform_2, window_bounds = array<i64: 16, 10, 128>}, {transform_indices = @transform_3, window_bounds = array<i64: 16, 10, 128>}, {transform_indices = @transform_4, window_bounds = array<i64: 128, 128>}, {transform_indices = @transform_5, window_bounds = array<i64: 1, 2, 128>}]} {
    %cst = arith.constant 0.000000e+00 : f32
    %0 = vector.broadcast %cst : f32 to vector<128x128xf32>
    %c0 = arith.constant 0 : index
    %c0_0 = arith.constant 0 : index
    %c0_1 = arith.constant 0 : index
    %1 = vector.load %arg2[%c0, %c0_0, %c0_1] : memref<16x10x128xbf16, #tpu.memory_space<vmem>>, vector<16x10x128xbf16>
    %2 = vector.extract_strided_slice %1 {offsets = [0, 0, 0], sizes = [16, 8, 128], strides = [1, 1, 1]} : vector<16x10x128xbf16> to vector<16x8x128xbf16>
    %3 = vector.shape_cast %2 : vector<16x8x128xbf16> to vector<128x128xbf16>
    %c0_2 = arith.constant 0 : index
    %c0_3 = arith.constant 0 : index
    %c0_4 = arith.constant 0 : index
    %4 = vector.load %arg1[%c0_2, %c0_3, %c0_4] : memref<9x128x128xbf16, #tpu.memory_space<vmem>>, vector<1x128x128xbf16>
    %5 = vector.shape_cast %4 : vector<1x128x128xbf16> to vector<128x128xbf16>
    %cst_5 = arith.constant dense<0.000000e+00> : vector<128x128xf32>
    %6 = tpu.matmul %3, %5, %cst_5 {dimension_numbers = #tpu.dot_dimension_numbers<[1], [0], [0], [1], [0, 0, 1, 1], [], []>} : vector<128x128xbf16>, vector<128x128xbf16>, vector<128x128xf32> -> vector<128x128xf32>
    %7 = arith.addf %0, %6 : vector<128x128xf32>
    %8 = vector.extract_strided_slice %1 {offsets = [0, 1, 0], sizes = [16, 8, 128], strides = [1, 1, 1]} : vector<16x10x128xbf16> to vector<16x8x128xbf16>
    %9 = vector.shape_cast %8 : vector<16x8x128xbf16> to vector<128x128xbf16>
    %c1 = arith.constant 1 : index
    %c0_6 = arith.constant 0 : index
    %c0_7 = arith.constant 0 : index
    %10 = vector.load %arg1[%c1, %c0_6, %c0_7] : memref<9x128x128xbf16, #tpu.memory_space<vmem>>, vector<1x128x128xbf16>
    %11 = vector.shape_cast %10 : vector<1x128x128xbf16> to vector<128x128xbf16>
    %cst_8 = arith.constant dense<0.000000e+00> : vector<128x128xf32>
    %12 = tpu.matmul %9, %11, %cst_8 {dimension_numbers = #tpu.dot_dimension_numbers<[1], [0], [0], [1], [0, 0, 1, 1], [], []>} : vector<128x128xbf16>, vector<128x128xbf16>, vector<128x128xf32> -> vector<128x128xf32>
    %13 = arith.addf %7, %12 : vector<128x128xf32>
    %14 = vector.extract_strided_slice %1 {offsets = [0, 2, 0], sizes = [16, 8, 128], strides = [1, 1, 1]} : vector<16x10x128xbf16> to vector<16x8x128xbf16>
    %15 = vector.shape_cast %14 : vector<16x8x128xbf16> to vector<128x128xbf16>
    %c2 = arith.constant 2 : index
    %c0_9 = arith.constant 0 : index
    %c0_10 = arith.constant 0 : index
    %16 = vector.load %arg1[%c2, %c0_9, %c0_10] : memref<9x128x128xbf16, #tpu.memory_space<vmem>>, vector<1x128x128xbf16>
    %17 = vector.shape_cast %16 : vector<1x128x128xbf16> to vector<128x128xbf16>
    %cst_11 = arith.constant dense<0.000000e+00> : vector<128x128xf32>
    %18 = tpu.matmul %15, %17, %cst_11 {dimension_numbers = #tpu.dot_dimension_numbers<[1], [0], [0], [1], [0, 0, 1, 1], [], []>} : vector<128x128xbf16>, vector<128x128xbf16>, vector<128x128xf32> -> vector<128x128xf32>
    %19 = arith.addf %13, %18 : vector<128x128xf32>
    %c0_12 = arith.constant 0 : index
    %c0_13 = arith.constant 0 : index
    %c0_14 = arith.constant 0 : index
    %20 = vector.load %arg3[%c0_12, %c0_13, %c0_14] : memref<16x10x128xbf16, #tpu.memory_space<vmem>>, vector<16x10x128xbf16>
    %21 = vector.extract_strided_slice %20 {offsets = [0, 0, 0], sizes = [16, 8, 128], strides = [1, 1, 1]} : vector<16x10x128xbf16> to vector<16x8x128xbf16>
    %22 = vector.shape_cast %21 : vector<16x8x128xbf16> to vector<128x128xbf16>
    %c3 = arith.constant 3 : index
    %c0_15 = arith.constant 0 : index
    %c0_16 = arith.constant 0 : index
    %23 = vector.load %arg1[%c3, %c0_15, %c0_16] : memref<9x128x128xbf16, #tpu.memory_space<vmem>>, vector<1x128x128xbf16>
    %24 = vector.shape_cast %23 : vector<1x128x128xbf16> to vector<128x128xbf16>
    %cst_17 = arith.constant dense<0.000000e+00> : vector<128x128xf32>
    %25 = tpu.matmul %22, %24, %cst_17 {dimension_numbers = #tpu.dot_dimension_numbers<[1], [0], [0], [1], [0, 0, 1, 1], [], []>} : vector<128x128xbf16>, vector<128x128xbf16>, vector<128x128xf32> -> vector<128x128xf32>
    %26 = arith.addf %19, %25 : vector<128x128xf32>
    %27 = vector.extract_strided_slice %20 {offsets = [0, 1, 0], sizes = [16, 8, 128], strides = [1, 1, 1]} : vector<16x10x128xbf16> to vector<16x8x128xbf16>
    %28 = vector.shape_cast %27 : vector<16x8x128xbf16> to vector<128x128xbf16>
    %c4 = arith.constant 4 : index
    %c0_18 = arith.constant 0 : index
    %c0_19 = arith.constant 0 : index
    %29 = vector.load %arg1[%c4, %c0_18, %c0_19] : memref<9x128x128xbf16, #tpu.memory_space<vmem>>, vector<1x128x128xbf16>
    %30 = vector.shape_cast %29 : vector<1x128x128xbf16> to vector<128x128xbf16>
    %cst_20 = arith.constant dense<0.000000e+00> : vector<128x128xf32>
    %31 = tpu.matmul %28, %30, %cst_20 {dimension_numbers = #tpu.dot_dimension_numbers<[1], [0], [0], [1], [0, 0, 1, 1], [], []>} : vector<128x128xbf16>, vector<128x128xbf16>, vector<128x128xf32> -> vector<128x128xf32>
    %32 = arith.addf %26, %31 : vector<128x128xf32>
    %33 = vector.extract_strided_slice %20 {offsets = [0, 2, 0], sizes = [16, 8, 128], strides = [1, 1, 1]} : vector<16x10x128xbf16> to vector<16x8x128xbf16>
    %34 = vector.shape_cast %33 : vector<16x8x128xbf16> to vector<128x128xbf16>
    %c5 = arith.constant 5 : index
    %c0_21 = arith.constant 0 : index
    %c0_22 = arith.constant 0 : index
    %35 = vector.load %arg1[%c5, %c0_21, %c0_22] : memref<9x128x128xbf16, #tpu.memory_space<vmem>>, vector<1x128x128xbf16>
    %36 = vector.shape_cast %35 : vector<1x128x128xbf16> to vector<128x128xbf16>
    %cst_23 = arith.constant dense<0.000000e+00> : vector<128x128xf32>
    %37 = tpu.matmul %34, %36, %cst_23 {dimension_numbers = #tpu.dot_dimension_numbers<[1], [0], [0], [1], [0, 0, 1, 1], [], []>} : vector<128x128xbf16>, vector<128x128xbf16>, vector<128x128xf32> -> vector<128x128xf32>
    %38 = arith.addf %32, %37 : vector<128x128xf32>
    %c0_24 = arith.constant 0 : index
    %c0_25 = arith.constant 0 : index
    %c0_26 = arith.constant 0 : index
    %39 = vector.load %arg4[%c0_24, %c0_25, %c0_26] : memref<16x10x128xbf16, #tpu.memory_space<vmem>>, vector<16x10x128xbf16>
    %40 = vector.extract_strided_slice %39 {offsets = [0, 0, 0], sizes = [16, 8, 128], strides = [1, 1, 1]} : vector<16x10x128xbf16> to vector<16x8x128xbf16>
    %41 = vector.shape_cast %40 : vector<16x8x128xbf16> to vector<128x128xbf16>
    %c6 = arith.constant 6 : index
    %c0_27 = arith.constant 0 : index
    %c0_28 = arith.constant 0 : index
    %42 = vector.load %arg1[%c6, %c0_27, %c0_28] : memref<9x128x128xbf16, #tpu.memory_space<vmem>>, vector<1x128x128xbf16>
    %43 = vector.shape_cast %42 : vector<1x128x128xbf16> to vector<128x128xbf16>
    %cst_29 = arith.constant dense<0.000000e+00> : vector<128x128xf32>
    %44 = tpu.matmul %41, %43, %cst_29 {dimension_numbers = #tpu.dot_dimension_numbers<[1], [0], [0], [1], [0, 0, 1, 1], [], []>} : vector<128x128xbf16>, vector<128x128xbf16>, vector<128x128xf32> -> vector<128x128xf32>
    %45 = arith.addf %38, %44 : vector<128x128xf32>
    %46 = vector.extract_strided_slice %39 {offsets = [0, 1, 0], sizes = [16, 8, 128], strides = [1, 1, 1]} : vector<16x10x128xbf16> to vector<16x8x128xbf16>
    %47 = vector.shape_cast %46 : vector<16x8x128xbf16> to vector<128x128xbf16>
    %c7 = arith.constant 7 : index
    %c0_30 = arith.constant 0 : index
    %c0_31 = arith.constant 0 : index
    %48 = vector.load %arg1[%c7, %c0_30, %c0_31] : memref<9x128x128xbf16, #tpu.memory_space<vmem>>, vector<1x128x128xbf16>
    %49 = vector.shape_cast %48 : vector<1x128x128xbf16> to vector<128x128xbf16>
    %cst_32 = arith.constant dense<0.000000e+00> : vector<128x128xf32>
    %50 = tpu.matmul %47, %49, %cst_32 {dimension_numbers = #tpu.dot_dimension_numbers<[1], [0], [0], [1], [0, 0, 1, 1], [], []>} : vector<128x128xbf16>, vector<128x128xbf16>, vector<128x128xf32> -> vector<128x128xf32>
    %51 = arith.addf %45, %50 : vector<128x128xf32>
    %52 = vector.extract_strided_slice %39 {offsets = [0, 2, 0], sizes = [16, 8, 128], strides = [1, 1, 1]} : vector<16x10x128xbf16> to vector<16x8x128xbf16>
    %53 = vector.shape_cast %52 : vector<16x8x128xbf16> to vector<128x128xbf16>
    %c8 = arith.constant 8 : index
    %c0_33 = arith.constant 0 : index
    %c0_34 = arith.constant 0 : index
    %54 = vector.load %arg1[%c8, %c0_33, %c0_34] : memref<9x128x128xbf16, #tpu.memory_space<vmem>>, vector<1x128x128xbf16>
    %55 = vector.shape_cast %54 : vector<1x128x128xbf16> to vector<128x128xbf16>
    %cst_35 = arith.constant dense<0.000000e+00> : vector<128x128xf32>
    %56 = tpu.matmul %53, %55, %cst_35 {dimension_numbers = #tpu.dot_dimension_numbers<[1], [0], [0], [1], [0, 0, 1, 1], [], []>} : vector<128x128xbf16>, vector<128x128xbf16>, vector<128x128xf32> -> vector<128x128xf32>
    %57 = arith.addf %51, %56 : vector<128x128xf32>
    %c0_36 = arith.constant 0 : index
    %c0_37 = arith.constant 0 : index
    %58 = vector.load %arg5[%c0_36, %c0_37] : memref<128x128xf32, #tpu.memory_space<vmem>>, vector<128x128xf32>
    tpu.vector_store %arg5[%c0_36, %c0_37], %57 {strides = array<i32>} : memref<128x128xf32, #tpu.memory_space<vmem>>, vector<128x128xf32>,
    %cst_38 = arith.constant dense<0.000000e+00> : vector<128xf32>
    %59 = vector.multi_reduction <add>, %57, %cst_38 [0] : vector<128x128xf32> to vector<128xf32>
    %60 = vector.shape_cast %59 : vector<128xf32> to vector<1x128xf32>
    %61 = arith.mulf %57, %57 : vector<128x128xf32>
    %cst_39 = arith.constant dense<0.000000e+00> : vector<128xf32>
    %62 = vector.multi_reduction <add>, %61, %cst_39 [0] : vector<128x128xf32> to vector<128xf32>
    %63 = vector.shape_cast %62 : vector<128xf32> to vector<1x128xf32>
    %64 = tpu.concatenate %60, %63 in 0 : vector<1x128xf32>, vector<1x128xf32> -> vector<2x128xf32>
    %65 = vector.shape_cast %64 : vector<2x128xf32> to vector<1x2x128xf32>
    %c0_40 = arith.constant 0 : index
    %c0_41 = arith.constant 0 : index
    %c0_42 = arith.constant 0 : index
    %66 = vector.load %arg6[%c0_40, %c0_41, %c0_42] : memref<1x2x128xf32, #tpu.memory_space<vmem>>, vector<1x2x128xf32>
    tpu.vector_store %arg6[%c0_40, %c0_41, %c0_42], %65 {strides = array<i32>} : memref<1x2x128xf32, #tpu.memory_space<vmem>>, vector<1x2x128xf32>,
    return
  }
  func.func @transform_0(%arg0: i32) -> (i32, i32, i32) {
    %c0_i32 = arith.constant 0 : i32
    %c0_i32_0 = arith.constant 0 : i32
    %c0_i32_1 = arith.constant 0 : i32
    %c0_i32_2 = arith.constant 0 : i32
    return %c0_i32, %c0_i32_0, %c0_i32_1 : i32, i32, i32
  }
  func.func @transform_1(%arg0: i32) -> (i32, i32, i32) {
    %c0_i32 = arith.constant 0 : i32
    %c0_i32_0 = arith.constant 0 : i32
    %c0_i32_1 = arith.constant 0 : i32
    return %arg0, %c0_i32, %c0_i32_0 : i32, i32, i32
  }
  func.func @transform_2(%arg0: i32) -> (i32, i32, i32) {
    %c0_i32 = arith.constant 0 : i32
    %c0_i32_0 = arith.constant 0 : i32
    %c0_i32_1 = arith.constant 0 : i32
    return %arg0, %c0_i32, %c0_i32_0 : i32, i32, i32
  }
  func.func @transform_3(%arg0: i32) -> (i32, i32, i32) {
    %c0_i32 = arith.constant 0 : i32
    %c0_i32_0 = arith.constant 0 : i32
    %c0_i32_1 = arith.constant 0 : i32
    return %arg0, %c0_i32, %c0_i32_0 : i32, i32, i32
  }
  func.func @transform_4(%arg0: i32) -> (i32, i32) {
    %c0_i32 = arith.constant 0 : i32
    %c0_i32_0 = arith.constant 0 : i32
    return %arg0, %c0_i32 : i32, i32
  }
  func.func @transform_5(%arg0: i32) -> (i32, i32, i32) {
    %c0_i32 = arith.constant 0 : i32
    %c0_i32_0 = arith.constant 0 : i32
    %c0_i32_1 = arith.constant 0 : i32
    return %arg0, %c0_i32, %c0_i32_0 : i32, i32, i32
  }
}

module attributes {stable_mosaic.version = 11 : i64} {
  func.func @kernel(%arg0: i32, %arg1: memref<128x128xf32, #tpu.memory_space<vmem>>, %arg2: memref<1x128xf32, #tpu.memory_space<vmem>>, %arg3: memref<1x128xf32, #tpu.memory_space<vmem>>, %arg4: memref<128x128xf32, #tpu.memory_space<vmem>>, %arg5: memref<1x128xf32, #tpu.memory_space<vmem>>, %arg6: memref<1x128xf32, #tpu.memory_space<vmem>>, %arg7: memref<128x128xf32, #tpu.memory_space<vmem>>) attributes {dimension_semantics = [#tpu.dimension_semantics<parallel>], iteration_bounds = array<i64: 1>, scalar_prefetch = 0 : i64, scratch_operands = 0 : i64, tpu.core_type = #tpu.core_type<tc>, window_params = [{transform_indices = @transform_0, window_bounds = array<i64: 128, 128>}, {pipeline_mode = #tpu.pipeline_mode<synchronous>, transform_indices = @transform_1, window_bounds = array<i64: 1, 128>}, {pipeline_mode = #tpu.pipeline_mode<synchronous>, transform_indices = @transform_2, window_bounds = array<i64: 1, 128>}, {transform_indices = @transform_3, window_bounds = array<i64: 128, 128>}, {pipeline_mode = #tpu.pipeline_mode<synchronous>, transform_indices = @transform_4, window_bounds = array<i64: 1, 128>}, {pipeline_mode = #tpu.pipeline_mode<synchronous>, transform_indices = @transform_5, window_bounds = array<i64: 1, 128>}, {transform_indices = @transform_6, window_bounds = array<i64: 128, 128>}]} {
    %c0 = arith.constant 0 : index
    %c0_0 = arith.constant 0 : index
    %0 = vector.load %arg1[%c0, %c0_0] : memref<128x128xf32, #tpu.memory_space<vmem>>, vector<128x128xf32>
    %c0_1 = arith.constant 0 : index
    %c0_2 = arith.constant 0 : index
    %1 = vector.load %arg2[%c0_1, %c0_2] : memref<1x128xf32, #tpu.memory_space<vmem>>, vector<1x128xf32>
    %2 = vector.broadcast %1 : vector<1x128xf32> to vector<128x128xf32>
    %3 = arith.mulf %0, %2 : vector<128x128xf32>
    %c0_3 = arith.constant 0 : index
    %c0_4 = arith.constant 0 : index
    %4 = vector.load %arg3[%c0_3, %c0_4] : memref<1x128xf32, #tpu.memory_space<vmem>>, vector<1x128xf32>
    %5 = vector.broadcast %4 : vector<1x128xf32> to vector<128x128xf32>
    %6 = arith.addf %3, %5 : vector<128x128xf32>
    %c0_5 = arith.constant 0 : index
    %c0_6 = arith.constant 0 : index
    %7 = vector.load %arg4[%c0_5, %c0_6] : memref<128x128xf32, #tpu.memory_space<vmem>>, vector<128x128xf32>
    %c0_7 = arith.constant 0 : index
    %c0_8 = arith.constant 0 : index
    %8 = vector.load %arg5[%c0_7, %c0_8] : memref<1x128xf32, #tpu.memory_space<vmem>>, vector<1x128xf32>
    %9 = vector.broadcast %8 : vector<1x128xf32> to vector<128x128xf32>
    %10 = arith.mulf %7, %9 : vector<128x128xf32>
    %11 = arith.addf %6, %10 : vector<128x128xf32>
    %c0_9 = arith.constant 0 : index
    %c0_10 = arith.constant 0 : index
    %12 = vector.load %arg6[%c0_9, %c0_10] : memref<1x128xf32, #tpu.memory_space<vmem>>, vector<1x128xf32>
    %13 = vector.broadcast %12 : vector<1x128xf32> to vector<128x128xf32>
    %14 = arith.addf %11, %13 : vector<128x128xf32>
    %cst = arith.constant 0.000000e+00 : f32
    %15 = vector.broadcast %cst : f32 to vector<128x128xf32>
    %16 = arith.maximumf %14, %15 : vector<128x128xf32>
    %c0_11 = arith.constant 0 : index
    %c0_12 = arith.constant 0 : index
    %17 = vector.load %arg7[%c0_11, %c0_12] : memref<128x128xf32, #tpu.memory_space<vmem>>, vector<128x128xf32>
    tpu.vector_store %arg7[%c0_11, %c0_12], %16 {strides = array<i32>} : memref<128x128xf32, #tpu.memory_space<vmem>>, vector<128x128xf32>,
    return
  }
  func.func @transform_0(%arg0: i32) -> (i32, i32) {
    %c0_i32 = arith.constant 0 : i32
    %c0_i32_0 = arith.constant 0 : i32
    return %arg0, %c0_i32 : i32, i32
  }
  func.func @transform_1(%arg0: i32) -> (i32, i32) {
    %c0_i32 = arith.constant 0 : i32
    %c0_i32_0 = arith.constant 0 : i32
    %c0_i32_1 = arith.constant 0 : i32
    return %c0_i32, %c0_i32_0 : i32, i32
  }
  func.func @transform_2(%arg0: i32) -> (i32, i32) {
    %c0_i32 = arith.constant 0 : i32
    %c0_i32_0 = arith.constant 0 : i32
    %c0_i32_1 = arith.constant 0 : i32
    return %c0_i32, %c0_i32_0 : i32, i32
  }
  func.func @transform_3(%arg0: i32) -> (i32, i32) {
    %c1_i32 = arith.constant 1 : i32
    %c0_i32 = arith.constant 0 : i32
    return %arg0, %c1_i32 : i32, i32
  }
  func.func @transform_4(%arg0: i32) -> (i32, i32) {
    %c0_i32 = arith.constant 0 : i32
    %c0_i32_0 = arith.constant 0 : i32
    %c0_i32_1 = arith.constant 0 : i32
    return %c0_i32, %c0_i32_0 : i32, i32
  }
  func.func @transform_5(%arg0: i32) -> (i32, i32) {
    %c0_i32 = arith.constant 0 : i32
    %c0_i32_0 = arith.constant 0 : i32
    %c0_i32_1 = arith.constant 0 : i32
    return %c0_i32, %c0_i32_0 : i32, i32
  }
  func.func @transform_6(%arg0: i32) -> (i32, i32) {
    %c0_i32 = arith.constant 0 : i32
    %c0_i32_0 = arith.constant 0 : i32
    return %arg0, %c0_i32 : i32, i32
  }
}

</mosaic_0001>

<bundles_post_ra>
// kernel: basic_block_forward.5
= control target key start
LH: loop header
LB: loop body
LE: loop exit
PB: predicated region body
PF: predicated region fallthrough
CT: control target
= control target key end

     0   :  { %s489_s0 = inlined_call_operand.vmem [shape: f32[128,256], index: 0, kind: input, shape index: {}]   ;;  %s490_s1 = inlined_call_operand.vmem [shape: f32[1,128], index: 1, kind: input, shape index: {}]   ;;  %s491_s2 = inlined_call_operand.vmem [shape: f32[1,128], index: 2, kind: input, shape index: {}]   ;;  %s492_s3 = inlined_call_operand.vmem [shape: bf16[128,128], index: 3, kind: output, shape index: {}]  }
   0x1   :  { %v67_v0 = vld [vmem:[%s489_s0] sm:$0xff]  ;;  %v69_v1 = vld [vmem:[%s489_s0 + $0x10] sm:$0xff] }
   0x2   :  { %v384_v2 = vld [vmem:[%s490_s1] ss:$0 sm:$0xff]  ;;  %v73_v7 = vld [vmem:[%s489_s0 + $0x30] sm:$0xff] }
   0x3   :  { %v131_v3 = vmul.f32 %v384_v2, %v67_v0  ;;  %v132_v4 = vmul.f32 %v384_v2, %v69_v1  ;;  %v391_v5 = vld [vmem:[%s491_s2] ss:$0 sm:$0xff]  ;;  %v134_v9 = vmul.f32 %v384_v2, %v73_v7  ;;  %v77_v11 = vld [vmem:[%s489_s0 + $0x50] sm:$0xff] }
   0x4   :  { %v71_v6 = vld [vmem:[%s489_s0 + $0x20] sm:$0xff]  ;;  %v136_v16 = vmul.f32 %v384_v2, %v77_v11  ;;  %v81_v17 = vld [vmem:[%s489_s0 + $0x70] sm:$0xff] }
   0x5   :  { %v133_v8 = vmul.f32 %v384_v2, %v71_v6  ;;  %v75_v10 = vld [vmem:[%s489_s0 + $0x40] sm:$0xff]  ;;  %v154_v13 = vadd.f32 %v391_v5, %v131_v3  ;;  %v155_v14 = vadd.f32 %v391_v5, %v132_v4  ;;  %v157_v19 = vadd.f32 %v391_v5, %v134_v9  ;;  %v85_v27 = vld [vmem:[%s489_s0 + $0x90] sm:$0xff] }
   0x6   :  { %v79_v12 = vld [vmem:[%s489_s0 + $0x60] sm:$0xff]  ;;  %v135_v15 = vmul.f32 %v384_v2, %v75_v10  ;;  %v138_v21 = vmul.f32 %v384_v2, %v81_v17  ;;  %v159_v26 = vadd.f32 %v391_v5, %v136_v16  ;;  %v89_v33 = vld [vmem:[%s489_s0 + $0xb0] sm:$0xff]  ;;  %v140_v43 = vmul.f32 %v384_v2, %v85_v27 }
   0x7   :  { %v156_v18 = vadd.f32 %v391_v5, %v133_v8  ;;  %v137_v20 = vmul.f32 %v384_v2, %v79_v12  ;;  %v83_v22 = vld [vmem:[%s489_s0 + $0x80] sm:$0xff]  ;;  %v170_v23 = vmax.f32 %v154_v13, 0.0  ;;  %v171_v24 = vmax.f32 %v155_v14, 0.0  ;;  %v93_v39 = vld [vmem:[%s489_s0 + $0xd0] sm:$0xff] }
   0x8   :  { %v158_v25 = vadd.f32 %v391_v5, %v135_v15  ;;  %v173_v29 = vmax.f32 %v157_v19, 0.0  ;;  %v161_v31 = vadd.f32 %v391_v5, %v138_v21  ;;  %v87_v32 = vld [vmem:[%s489_s0 + $0xa0] sm:$0xff]  ;;  %v175_v36 = vmax.f32 %v159_v26, 0.0  ;;  %v97_v49 = vld [vmem:[%s489_s0 + $0xf0] sm:$0xff] }
   0x9   :  { %v172_v28 = vmax.f32 %v156_v18, 0.0  ;;  %v160_v30 = vadd.f32 %v391_v5, %v137_v20  ;;  %v311_v34 = vpack.c.bf16 %v171_v24, %v170_v23  ;;  %v139_v37 = vmul.f32 %v384_v2, %v83_v22  ;;  %v91_v38 = vld [vmem:[%s489_s0 + $0xc0] sm:$0xff] }
   0xa   :  { %v174_v35 = vmax.f32 %v158_v25, 0.0  ;;  %v177_v42 = vmax.f32 %v161_v31, 0.0  ;;  %v95_v44 = vld [vmem:[%s489_s0 + $0xe0] sm:$0xff]  ;;  %v141_v47 = vmul.f32 %v384_v2, %v87_v32  ;;  %v142_v48 = vmul.f32 %v384_v2, %v89_v33 }
   0xb   :  { %v316_v40 = vpack.c.bf16 %v173_v29, %v172_v28  ;;  %v176_v41 = vmax.f32 %v160_v30, 0.0  ;;  %312 = vst [vmem:[%s492_s3] sm:$0xff] %v311_v34   ;;  %v162_v46 = vadd.f32 %v391_v5, %v139_v37  ;;  %v163_v51 = vadd.f32 %v391_v5, %v140_v43 }
   0xc   :  { %v321_v45 = vpack.c.bf16 %v175_v36, %v174_v35  ;;  %v143_v52 = vmul.f32 %v384_v2, %v91_v38  ;;  %v144_v53 = vmul.f32 %v384_v2, %v93_v39  ;;  %v164_v55 = vadd.f32 %v391_v5, %v141_v47 }
   0xd   :  { %348 = vst [vmem:[%s492_s3 + $0x8] sm:$0xff] %v316_v40   ;;  %v326_v50 = vpack.c.bf16 %v177_v42, %v176_v41  ;;  %v178_v54 = vmax.f32 %v162_v46, 0.0  ;;  %v165_v56 = vadd.f32 %v391_v5, %v142_v48  ;;  %v145_v57 = vmul.f32 %v384_v2, %v95_v44 }
   0xe   :  { %349 = vst [vmem:[%s492_s3 + $0x10] sm:$0xff] %v321_v45   ;;  %v179_v58 = vmax.f32 %v163_v51, 0.0  ;;  %v166_v59 = vadd.f32 %v391_v5, %v143_v52  ;;  %v167_v60 = vadd.f32 %v391_v5, %v144_v53  ;;  %v146_v61 = vmul.f32 %v384_v2, %v97_v49 }
   0xf   :  { %350 = vst [vmem:[%s492_s3 + $0x18] sm:$0xff] %v326_v50   ;;  %v180_v62 = vmax.f32 %v164_v55, 0.0  ;;  %v181_v63 = vmax.f32 %v165_v56, 0.0  ;;  %v168_v0 = vadd.f32 %v391_v5, %v145_v57 }
  0x10   :  { %v331_v1 = vpack.c.bf16 %v179_v58, %v178_v54  ;;  %v182_v3 = vmax.f32 %v166_v59, 0.0  ;;  %v183_v4 = vmax.f32 %v167_v60, 0.0  ;;  %v169_v6 = vadd.f32 %v391_v5, %v146_v61 }
  0x11   :  { %v336_v7 = vpack.c.bf16 %v181_v63, %v180_v62  ;;  %v184_v8 = vmax.f32 %v168_v0, 0.0 }
  0x12   :  { %351 = vst [vmem:[%s492_s3 + $0x20] sm:$0xff] %v331_v1   ;;  %v341_v9 = vpack.c.bf16 %v183_v4, %v182_v3  ;;  %v185_v10 = vmax.f32 %v169_v6, 0.0 }
  0x13   :  { %352 = vst [vmem:[%s492_s3 + $0x28] sm:$0xff] %v336_v7  }
  0x14   :  { %353 = vst [vmem:[%s492_s3 + $0x30] sm:$0xff] %v341_v9   ;;  %v346_v2 = vpack.c.bf16 %v185_v10, %v184_v8 }
  0x16   :  { %354 = vst [vmem:[%s492_s3 + $0x38] sm:$0xff] %v346_v2  }

// kernel: basic_block_forward.7
= control target key start
LH: loop header
LB: loop body
LE: loop exit
PB: predicated region body
PF: predicated region fallthrough
CT: control target
= control target key end

     0   :  { %s581_s0 = inlined_call_operand.vmem [shape: f32[128,128], index: 0, kind: input, shape index: {}]   ;;  %s582_s1 = inlined_call_operand.vmem [shape: f32[1,128], index: 1, kind: input, shape index: {}]   ;;  %s583_s2 = inlined_call_operand.vmem [shape: f32[1,128], index: 2, kind: input, shape index: {}]   ;;  %s584_s3 = inlined_call_operand.vmem [shape: f32[128,256], index: 3, kind: input, shape index: {}]   ;;  %s585_s4 = inlined_call_operand.vmem [shape: f32[1,128], index: 4, kind: input, shape index: {}]   ;;  %s586_s5 = inlined_call_operand.vmem [shape: f32[1,128], index: 5, kind: input, shape index: {}]   ;;  %s587_s6 = inlined_call_operand.vmem [shape: f32[128,128], index: 6, kind: output, shape index: {}]  }
   0x1   :  { %v298_v0 = vld [vmem:[%s584_s3 + $0x8] sm:$0xff]  ;;  %v118_v1 = vld [vmem:[%s581_s0] sm:$0xff]  ;;  %v299_v8 = vld [vmem:[%s584_s3 + $0x18] sm:$0xff] }
   0x2   :  { %v362_v2 = vld [vmem:[%s582_s1] ss:$0 sm:$0xff]  ;;  %v119_v9 = vld [vmem:[%s581_s0 + $0x8] sm:$0xff]  ;;  %v120_v14 = vld [vmem:[%s581_s0 + $0x10] sm:$0xff] }
   0x3   :  { %v141_v3 = vmul.f32 %v362_v2, %v118_v1  ;;  %v368_v4 = vld [vmem:[%s583_s2] ss:$0 sm:$0xff]  ;;  %v300_v10 = vld [vmem:[%s584_s3 + $0x28] sm:$0xff]  ;;  %v142_v12 = vmul.f32 %v362_v2, %v119_v9  ;;  %v301_v15 = vld [vmem:[%s584_s3 + $0x38] sm:$0xff]  ;;  %v143_v17 = vmul.f32 %v362_v2, %v120_v14 }
   0x4   :  { %v373_v5 = vld [vmem:[%s585_s4] ss:$0 sm:$0xff]  ;;  %v121_v16 = vld [vmem:[%s581_s0 + $0x18] sm:$0xff]  ;;  %v302_v21 = vld [vmem:[%s584_s3 + $0x48] sm:$0xff] }
   0x5   :  { %v203_v6 = vmul.f32 %v373_v5, %v298_v0  ;;  %v379_v7 = vld [vmem:[%s586_s5] ss:$0 sm:$0xff]  ;;  %v164_v11 = vadd.f32 %v368_v4, %v141_v3  ;;  %v204_v13 = vmul.f32 %v373_v5, %v299_v8  ;;  %v205_v18 = vmul.f32 %v373_v5, %v300_v10  ;;  %v303_v23 = vld [vmem:[%s584_s3 + $0x58] sm:$0xff]  ;;  %v123_v28 = vld [vmem:[%s581_s0 + $0x28] sm:$0xff] }
   0x6   :  { %v144_v19 = vmul.f32 %v362_v2, %v121_v16  ;;  %v206_v20 = vmul.f32 %v373_v5, %v301_v15  ;;  %v122_v22 = vld [vmem:[%s581_s0 + $0x20] sm:$0xff]  ;;  %v165_v25 = vadd.f32 %v368_v4, %v142_v12  ;;  %v207_v27 = vmul.f32 %v373_v5, %v302_v21  ;;  %v304_v29 = vld [vmem:[%s584_s3 + $0x68] sm:$0xff]  ;;  %v124_v30 = vld [vmem:[%s581_s0 + $0x30] sm:$0xff] }
   0x7   :  { %v219_v24 = vadd.f32 %v203_v6, %v164_v11  ;;  %v145_v26 = vmul.f32 %v362_v2, %v122_v22  ;;  %v166_v31 = vadd.f32 %v368_v4, %v143_v17  ;;  %v146_v33 = vmul.f32 %v362_v2, %v123_v28  ;;  %v125_v39 = vld [vmem:[%s581_s0 + $0x38] sm:$0xff]  ;;  %v306_v53 = vld [vmem:[%s584_s3 + $0x88] sm:$0xff]  ;;  %v126_v54 = vld [vmem:[%s581_s0 + $0x40] sm:$0xff] }
   0x8   :  { %v167_v32 = vadd.f32 %v368_v4, %v144_v19  ;;  %v208_v34 = vmul.f32 %v373_v5, %v303_v23  ;;  %v220_v36 = vadd.f32 %v204_v13, %v165_v25  ;;  %v147_v38 = vmul.f32 %v362_v2, %v124_v30  ;;  %v305_v44 = vld [vmem:[%s584_s3 + $0x78] sm:$0xff]  ;;  %v127_v60 = vld [vmem:[%s581_s0 + $0x48] sm:$0xff]  ;;  %v128_v3 = vld [vmem:[%s581_s0 + $0x50] sm:$0xff] }
   0x9   :  { %v242_v35 = vadd.f32 %v379_v7, %v219_v24  ;;  %v168_v37 = vadd.f32 %v368_v4, %v145_v26  ;;  %v221_v40 = vadd.f32 %v205_v18, %v166_v31  ;;  %v169_v42 = vadd.f32 %v368_v4, %v146_v33  ;;  %v307_v59 = vld [vmem:[%s584_s3 + $0x98] sm:$0xff]  ;;  %v308_v1 = vld [vmem:[%s584_s3 + $0xa8] sm:$0xff]  ;;  %v130_v18 = vld [vmem:[%s581_s0 + $0x60] sm:$0xff] }
   0xa   :  { %v222_v41 = vadd.f32 %v206_v20, %v167_v32  ;;  %v209_v43 = vmul.f32 %v373_v5, %v304_v29  ;;  %v243_v46 = vadd.f32 %v379_v7, %v220_v36  ;;  %v170_v48 = vadd.f32 %v368_v4, %v147_v38  ;;  %v309_v11 = vld [vmem:[%s584_s3 + $0xb8] sm:$0xff]  ;;  %v310_v17 = vld [vmem:[%s584_s3 + $0xc8] sm:$0xff]  ;;  %v132_v33 = vld [vmem:[%s581_s0 + $0x70] sm:$0xff] }
   0xb   :  { %v258_v45 = vmax.f32 %v242_v35, 0.0  ;;  %v223_v47 = vadd.f32 %v207_v27, %v168_v37  ;;  %v244_v49 = vadd.f32 %v379_v7, %v221_v40  ;;  %v224_v51 = vadd.f32 %v208_v34, %v169_v42  ;;  %v129_v12 = vld [vmem:[%s581_s0 + $0x58] sm:$0xff]  ;;  %v131_v23 = vld [vmem:[%s581_s0 + $0x68] sm:$0xff] }
   0xc   :  { %v245_v50 = vadd.f32 %v379_v7, %v222_v41  ;;  %v148_v52 = vmul.f32 %v362_v2, %v125_v39  ;;  %v259_v55 = vmax.f32 %v243_v46, 0.0  ;;  %v225_v57 = vadd.f32 %v209_v43, %v170_v48  ;;  %v311_v28 = vld [vmem:[%s584_s3 + $0xd8] sm:$0xff]  ;;  %v312_v38 = vld [vmem:[%s584_s3 + $0xe8] sm:$0xff] }
   0xd   :  { %274 = vst [vmem:[%s587_s6] sm:$0xff] %v258_v45  ;;  %v246_v56 = vadd.f32 %v379_v7, %v223_v47  ;;  %v210_v58 = vmul.f32 %v373_v5, %v305_v44  ;;  %v260_v61 = vmax.f32 %v244_v49, 0.0  ;;  %v247_v63 = vadd.f32 %v379_v7, %v224_v51  ;;  %v313_v47 = vld [vmem:[%s584_s3 + $0xf8] sm:$0xff] }
   0xe   :  { %v261_v62 = vmax.f32 %v245_v50, 0.0  ;;  %v171_v0 = vadd.f32 %v368_v4, %v148_v52  ;;  %275 = vst [vmem:[%s587_s6 + $0x8] sm:$0xff] %v259_v55  ;;  %v248_v8 = vadd.f32 %v379_v7, %v225_v57  ;;  %v149_v9 = vmul.f32 %v362_v2, %v126_v54  ;;  %v133_v48 = vld [vmem:[%s581_s0 + $0x78] sm:$0xff] }
   0xf   :  { %v262_v6 = vmax.f32 %v246_v56, 0.0  ;;  %v211_v10 = vmul.f32 %v373_v5, %v306_v53  ;;  %276 = vst [vmem:[%s587_s6 + $0x10] sm:$0xff] %v260_v61  ;;  %v263_v13 = vmax.f32 %v247_v63, 0.0  ;;  %v150_v15 = vmul.f32 %v362_v2, %v127_v60 }
  0x10   :  { %277 = vst [vmem:[%s587_s6 + $0x18] sm:$0xff] %v261_v62  ;;  %v226_v14 = vadd.f32 %v210_v58, %v171_v0  ;;  %v212_v16 = vmul.f32 %v373_v5, %v307_v59  ;;  %v264_v19 = vmax.f32 %v248_v8, 0.0  ;;  %v172_v20 = vadd.f32 %v368_v4, %v149_v9 }
  0x11   :  { %278 = vst [vmem:[%s587_s6 + $0x20] sm:$0xff] %v262_v6  ;;  %v151_v21 = vmul.f32 %v362_v2, %v128_v3  ;;  %v213_v22 = vmul.f32 %v373_v5, %v308_v1  ;;  %279 = vst [vmem:[%s587_s6 + $0x28] sm:$0xff] %v263_v13  ;;  %v173_v25 = vadd.f32 %v368_v4, %v150_v15 }
  0x12   :  { %v249_v24 = vadd.f32 %v379_v7, %v226_v14  ;;  %v152_v26 = vmul.f32 %v362_v2, %v129_v12  ;;  %v214_v27 = vmul.f32 %v373_v5, %v309_v11  ;;  %280 = vst [vmem:[%s587_s6 + $0x30] sm:$0xff] %v264_v19  ;;  %v227_v29 = vadd.f32 %v211_v10, %v172_v20 }
  0x13   :  { %v174_v30 = vadd.f32 %v368_v4, %v151_v21  ;;  %v153_v31 = vmul.f32 %v362_v2, %v130_v18  ;;  %v215_v32 = vmul.f32 %v373_v5, %v310_v17  ;;  %v228_v35 = vadd.f32 %v212_v16, %v173_v25 }
  0x14   :  { %v265_v34 = vmax.f32 %v249_v24, 0.0  ;;  %v175_v36 = vadd.f32 %v368_v4, %v152_v26  ;;  %v154_v37 = vmul.f32 %v362_v2, %v131_v23  ;;  %v250_v39 = vadd.f32 %v379_v7, %v227_v29 }
  0x15   :  { %v229_v40 = vadd.f32 %v213_v22, %v174_v30  ;;  %v176_v41 = vadd.f32 %v368_v4, %v153_v31  ;;  %v216_v42 = vmul.f32 %v373_v5, %v311_v28  ;;  %v251_v43 = vadd.f32 %v379_v7, %v228_v35 }
  0x16   :  { %281 = vst [vmem:[%s587_s6 + $0x38] sm:$0xff] %v265_v34  ;;  %v230_v44 = vadd.f32 %v214_v27, %v175_v36  ;;  %v177_v45 = vadd.f32 %v368_v4, %v154_v37  ;;  %v155_v46 = vmul.f32 %v362_v2, %v132_v33  ;;  %v266_v49 = vmax.f32 %v250_v39, 0.0 }
  0x17   :  { %v252_v50 = vadd.f32 %v379_v7, %v229_v40  ;;  %v231_v51 = vadd.f32 %v215_v32, %v176_v41  ;;  %v217_v52 = vmul.f32 %v373_v5, %v312_v38  ;;  %v267_v53 = vmax.f32 %v251_v43, 0.0 }
  0x18   :  { %v253_v54 = vadd.f32 %v379_v7, %v230_v44  ;;  %v232_v55 = vadd.f32 %v216_v42, %v177_v45  ;;  %v178_v56 = vadd.f32 %v368_v4, %v155_v46  ;;  %282 = vst [vmem:[%s587_s6 + $0x40] sm:$0xff] %v266_v49  ;;  %v156_v59 = vmul.f32 %v362_v2, %v133_v48 }
  0x19   :  { %v268_v57 = vmax.f32 %v252_v50, 0.0  ;;  %v254_v58 = vadd.f32 %v379_v7, %v231_v51  ;;  %v218_v60 = vmul.f32 %v373_v5, %v313_v47  ;;  %283 = vst [vmem:[%s587_s6 + $0x48] sm:$0xff] %v267_v53 }
  0x1a   :  { %v269_v61 = vmax.f32 %v253_v54, 0.0  ;;  %v255_v62 = vadd.f32 %v379_v7, %v232_v55  ;;  %v233_v63 = vadd.f32 %v217_v52, %v178_v56  ;;  %v179_v1 = vadd.f32 %v368_v4, %v156_v59 }
  0x1b   :  { %284 = vst [vmem:[%s587_s6 + $0x50] sm:$0xff] %v268_v57  ;;  %v270_v0 = vmax.f32 %v254_v58, 0.0 }
  0x1c   :  { %285 = vst [vmem:[%s587_s6 + $0x58] sm:$0xff] %v269_v61  ;;  %v271_v2 = vmax.f32 %v255_v62, 0.0  ;;  %v256_v5 = vadd.f32 %v379_v7, %v233_v63  ;;  %v234_v3 = vadd.f32 %v218_v60, %v179_v1 }
  0x1d   :  { %286 = vst [vmem:[%s587_s6 + $0x60] sm:$0xff] %v270_v0 }
  0x1e   :  { %287 = vst [vmem:[%s587_s6 + $0x68] sm:$0xff] %v271_v2  ;;  %v272_v6 = vmax.f32 %v256_v5, 0.0  ;;  %v257_v8 = vadd.f32 %v379_v7, %v234_v3 }
  0x20   :  { %288 = vst [vmem:[%s587_s6 + $0x70] sm:$0xff] %v272_v6  ;;  %v273_v4 = vmax.f32 %v257_v8, 0.0 }
  0x22   :  { %289 = vst [vmem:[%s587_s6 + $0x78] sm:$0xff] %v273_v4 }

// kernel: basic_block_forward.4
= control target key start
LH: loop header
LB: loop body
LE: loop exit
PB: predicated region body
PF: predicated region fallthrough
CT: control target
= control target key end

     0   :  { %vm349_vm0 = vcmask 1041408   ;;  %vm62_vm1 = vsmask.f32 3328  ;;  %vm63_vm2 = vsmask.f32 7440  ;;  %v3428_v1 = vmov 0   ;;  %s4472_s0 = inlined_call_operand.vmem [shape: bf16[9,4,256], index: 0, kind: input, shape index: {}]   ;;  %s4473_s1 = inlined_call_operand.vmem [shape: bf16[16,9,4], index: 1, kind: input, shape index: {}]   ;;  %s4474_s3 = inlined_call_operand.vmem [shape: bf16[16,9,4], index: 3, kind: input, shape index: {}]   ;;  %s4475_s4 = inlined_call_operand.vmem [shape: bf16[16,9,4], index: 4, kind: input, shape index: {}]   ;;  %s4476_s2 = inlined_call_operand.vmem [shape: bf16[16,9,4], index: 2, kind: input, shape index: {}]   ;;  %s4477_s5 = inlined_call_operand.vmem [shape: bf16[16,9,4], index: 5, kind: input, shape index: {}]   ;;  %s4478_s6 = inlined_call_operand.vmem [shape: bf16[16,9,4], index: 6, kind: input, shape index: {}]   ;;  %s4479_s7 = inlined_call_operand.vmem [shape: f32[128,256], index: 7, kind: output, shape index: {0}]   ;;  %s4480_s8 = inlined_call_operand.vmem [shape: f32[1,2,256], index: 8, kind: output, shape index: {1}]  }
   0x1   :  { %v2951_v0 = vld.sshfl [vmem:[%s4472_s0 + $0x8] sm:$0x33 pattern:$0x76325410]  ;;  %388 = vmatprep.mubr.bf16.mxu1 %v3428_v1  ;;  %1482 = vmatprep.mubr.bf16.mxu0 %v3428_v1  ;;  %v3482_v2 = vld [vmem:[%s4473_s1] sm:$0xf]  ;;  %vm3534_vm4 = vmor %vm62_vm1, %vm63_vm2 }
   0x2   :  { %v323_v3 = vcombine.high %v2951_v0, %v2951_v0  ;;  %v3026_v4 = vld.sshfl [vmem:[%s4472_s0 + $0x14] sm:$0x33 pattern:$0x76325410]  ;;  %v351_v5 = vsel %vm349_vm0, %v2951_v0, 0  ;;  %v66_v6 = vshrl.u32 %v3482_v2, 16 }
   0x3   :  { %v3489_v7 = vcombine.high %v3026_v4, %v3026_v4  ;;  %v3492_v8 = vsel %vm349_vm0, %v3026_v4, 0  ;;  %v2969_v9 = vld.sshfl [vmem:[%s4472_s0] sm:$0x33 pattern:$0x76325410]  ;;  %v69_v10 = vshll.u32 %v3482_v2, 16 }
   0x4   :  { %2952 = vmatprep.subr.msk.bf16.mxu1 %vm349_vm0, %v323_v3  ;;  %v517_v11 = vcombine.high %v2969_v9, %v2969_v9  ;;  %v3045_v12 = vld.sshfl [vmem:[%s4472_s0 + $0x10] sm:$0x33 pattern:$0x76325410]  ;;  %v30_v13 = vld [vmem:[%s4473_s1 + $0x4] sm:$0x1] }
   0x5   :  { %3027 = vmatprep.subr.msk.bf16.mxu0 %vm349_vm0, %v3489_v7  ;;  %357 = vmatpush1.bf16.msra.mxu1 %v351_v5  ;;  %v1661_v14 = vcombine.high %v3045_v12, %v3045_v12  ;;  %v3510_v15 = vld [vmem:[%s4473_s1 + $0x8] sm:$0xf]  ;;  %v32_v16 = vld [vmem:[%s4473_s1 + $0xc] sm:$0x1]  ;;  %v68_v17 = vrot.slane %v66_v6, 4  ;;  %v71_v18 = vrot.slane %v69_v10, 5 }
   0x6   :  { %1451 = vmatpush1.bf16.msra.mxu0 %v3492_v8  ;;  %2970 = vmatprep.subr.msk.bf16.mxu1 %vm349_vm0, %v517_v11  ;;  %v75_v19 = vshll.u32 %v30_v13, 16  ;;  %v80_v20 = vshrl.u32 %v3510_v15, 16  ;;  %v83_v21 = vshll.u32 %v3510_v15, 16  ;;  %v89_v22 = vshll.u32 %v32_v16, 16  ;;  %v903_v23 = vld [vmem:[%s4474_s3] sm:$0xf] }
   0x7   :  { %3046 = vmatprep.subr.msk.bf16.mxu0 %vm349_vm0, %v1661_v14  ;;  %v72_v24 = vor.u32 %v71_v18, %v68_v17  ;;  %vm324_vm3 = vcmask 31744   ;;  %v543_v25 = vsel %vm349_vm0, %v2969_v9, 0  ;;  %v904_v26 = vld [vmem:[%s4474_s3 + $0x4] sm:$0x1]  ;;  %v905_v27 = vld [vmem:[%s4474_s3 + $0x8] sm:$0xf]  ;;  %v2961_v28 = vcombine.low %v3482_v2, %v3510_v15 }
   0x8   :  { %v77_v30 = vrot.slane %v75_v19, 5  ;;  %v82_v31 = vrot.slane %v80_v20, 4  ;;  %v85_v32 = vrot.slane %v83_v21, 5  ;;  %v91_v33 = vrot.slane %v89_v22, 5  ;;  %v906_v34 = vld [vmem:[%s4474_s3 + $0xc] sm:$0x1] }
   0x9   :  { %v73_v35 = vrot.slane %v72_v24, 4  ;;  %v1162_v36 = vshrl.u32 %v903_v23, 16  ;;  %v1165_v37 = vshll.u32 %v903_v23, 16  ;;  %v1171_v38 = vshll.u32 %v904_v26, 16  ;;  %v3544_v39 = vld [vmem:[%s4473_s1 + $0x10] sm:$0xf] }
   0xa   :  { %v86_v40 = vor.u32 %v85_v32, %v82_v31  ;;  %v1176_v41 = vshrl.u32 %v905_v27, 16  ;;  %v1179_v42 = vshll.u32 %v905_v27, 16  ;;  %v1185_v43 = vshll.u32 %v906_v34, 16  ;;  %v34_v44 = vld [vmem:[%s4473_s1 + $0x14] sm:$0x1] }
   0xb   :  { %v78_v45 = vsel %vm3534_vm4, %v73_v35, %v77_v30  ;;  %v1164_v46 = vrot.slane %v1162_v36, 4  ;;  %v1167_v47 = vrot.slane %v1165_v37, 5  ;;  %v1173_v48 = vrot.slane %v1171_v38, 5  ;;  %v3554_v49 = vld [vmem:[%s4473_s1 + $0x18] sm:$0xf] }
   0xc   :  { %v87_v50 = vrot.slane %v86_v40, 4  ;;  %v1178_v51 = vrot.slane %v1176_v41, 4  ;;  %v1181_v52 = vrot.slane %v1179_v42, 5  ;;  %v1187_v53 = vrot.slane %v1185_v43, 5  ;;  %v36_v60 = vld [vmem:[%s4473_s1 + $0x1c] sm:$0x1] }
   0xd   :  { %v1168_v54 = vor.u32 %v1167_v47, %v1164_v46  ;;  %v1687_v55 = vsel %vm349_vm0, %v3045_v12, 0  ;;  %v94_v56 = vshrl.u32 %v3544_v39, 16  ;;  %v97_v57 = vshll.u32 %v3544_v39, 16  ;;  %v907_v63 = vld [vmem:[%s4474_s3 + $0x10] sm:$0xf] }
   0xe   :  { %v92_v58 = vsel %vm3534_vm4, %v87_v50, %v91_v33  ;;  %v1182_v59 = vor.u32 %v1181_v52, %v1178_v51  ;;  %v103_v61 = vshll.u32 %v34_v44, 16  ;;  %v108_v62 = vshrl.u32 %v3554_v49, 16  ;;  %v908_v6 = vld [vmem:[%s4474_s3 + $0x14] sm:$0x1]  ;;  %v909_v17 = vld [vmem:[%s4474_s3 + $0x18] sm:$0xf] }
   0xf   :  { %v2943_v0 = vcombine.low %v78_v45, %v92_v58  ;;  %v1169_v3 = vrot.slane %v1168_v54, 4  ;;  %v96_v4 = vrot.slane %v94_v56, 4  ;;  %v99_v5 = vrot.slane %v97_v57, 5  ;;  %v910_v18 = vld [vmem:[%s4474_s3 + $0x1c] sm:$0x1] }
  0x10   :  { %v1183_v9 = vrot.slane %v1182_v59, 4  ;;  %v105_v10 = vrot.slane %v103_v61, 5  ;;  %v110_v11 = vrot.slane %v108_v62, 4  ;;  %v111_v12 = vshll.u32 %v3554_v49, 16  ;;  %v3587_v24 = vld [vmem:[%s4473_s1 + $0x20] sm:$0xf] }
  0x11   :  { %2953 = vmatmul.mubr.msk.bf16.vlgmr.msra.gmra.mrb[0].mxu1 %vm324_vm3, %v2943_v0  ;;  %v1174_v13 = vsel %vm3534_vm4, %v1169_v3, %v1173_v48  ;;  %v100_v14 = vor.u32 %v99_v5, %v96_v4  ;;  %v117_v16 = vshll.u32 %v36_v60, 16  ;;  %v1190_v19 = vshrl.u32 %v907_v63, 16  ;;  %v38_v35 = vld [vmem:[%s4473_s1 + $0x24] sm:$0x1]  ;;  %v3598_v40 = vld [vmem:[%s4473_s1 + $0x28] sm:$0xf] }
  0x12   :  { %549 = vmatpush1.bf16.msra.mxu1 %v543_v25  ;;  %v1188_v20 = vsel %vm3534_vm4, %v1183_v9, %v1187_v53  ;;  %398 = vmatprep.mubr.bf16.mxu1 %v3428_v1  ;;  %v113_v21 = vrot.slane %v111_v12, 5  ;;  %v1193_v22 = vshll.u32 %v907_v63, 16  ;;  %v1199_v23 = vshll.u32 %v908_v6, 16  ;;  %v40_v48 = vld [vmem:[%s4473_s1 + $0x2c] sm:$0x1] }
  0x13   :  { %v3018_v26 = vcombine.low %v1174_v13, %v1188_v20  ;;  %v101_v27 = vrot.slane %v100_v14, 4  ;;  %v119_v30 = vrot.slane %v117_v16, 5  ;;  %v1192_v31 = vrot.slane %v1190_v19, 4  ;;  %v911_v56 = vld [vmem:[%s4474_s3 + $0x20] sm:$0xf] }
  0x14   :  { %v114_v32 = vor.u32 %v113_v21, %v110_v11  ;;  %v1195_v33 = vrot.slane %v1193_v22, 5  ;;  %v1201_v25 = vrot.slane %v1199_v23, 5  ;;  %v1204_v34 = vshrl.u32 %v909_v17, 16  ;;  %v912_v61 = vld [vmem:[%s4474_s3 + $0x24] sm:$0x1] }
  0x15   :  { %3028 = vmatmul.mubr.msk.bf16.vlgmr.msra.gmra.mrb[0].mxu0 %vm324_vm3, %v3018_v26  ;;  %v106_v36 = vsel %vm3534_vm4, %v101_v27, %v105_v10  ;;  %v1207_v37 = vshll.u32 %v909_v17, 16  ;;  %v1213_v38 = vshll.u32 %v910_v18, 16  ;;  %v122_v41 = vshrl.u32 %v3587_v24, 16  ;;  %v913_v62 = vld [vmem:[%s4474_s3 + $0x28] sm:$0xf] }
  0x16   :  { %1693 = vmatpush1.bf16.msra.mxu0 %v1687_v55  ;;  %1492 = vmatprep.mubr.bf16.mxu0 %v3428_v1  ;;  %v115_v42 = vrot.slane %v114_v32, 4  ;;  %v1196_v43 = vor.u32 %v1195_v33, %v1192_v31  ;;  %v1206_v44 = vrot.slane %v1204_v34, 4  ;;  %v125_v45 = vshll.u32 %v3587_v24, 16  ;;  %v914_v9 = vld [vmem:[%s4474_s3 + $0x2c] sm:$0x1] }
  0x17   :  { %v1209_v46 = vrot.slane %v1207_v37, 5  ;;  %v1215_v47 = vrot.slane %v1213_v38, 5  ;;  %v124_v50 = vrot.slane %v122_v41, 4  ;;  %v131_v51 = vshll.u32 %v38_v35, 16  ;;  %v3629_v17 = vld [vmem:[%s4473_s1 + $0x30] sm:$0xf] }
  0x18   :  { %v120_v52 = vsel %vm3534_vm4, %v115_v42, %v119_v30  ;;  %v1197_v53 = vrot.slane %v1196_v43, 4  ;;  %v127_v54 = vrot.slane %v125_v45, 5  ;;  %v136_v55 = vshrl.u32 %v3598_v40, 16  ;;  %v42_v22 = vld [vmem:[%s4473_s1 + $0x34] sm:$0x1] }
  0x19   :  { %v2944_v57 = vcombine.low %v106_v36, %v120_v52  ;;  %v1210_v58 = vor.u32 %v1209_v46, %v1206_v44  ;;  %v133_v59 = vrot.slane %v131_v51, 5  ;;  %v139_v60 = vshll.u32 %v3598_v40, 16  ;;  %v3639_v23 = vld [vmem:[%s4473_s1 + $0x38] sm:$0xf]  ;;  %v44_v35 = vld [vmem:[%s4473_s1 + $0x3c] sm:$0x1] }
  0x1a   :  { %v1202_v63 = vsel %vm3534_vm4, %v1197_v53, %v1201_v25  ;;  %v128_v0 = vor.u32 %v127_v54, %v124_v50  ;;  %v138_v3 = vrot.slane %v136_v55, 4  ;;  %v145_v4 = vshll.u32 %v40_v48, 16  ;;  %v915_v36 = vld [vmem:[%s4474_s3 + $0x30] sm:$0xf]  ;;  %v916_v43 = vld [vmem:[%s4474_s3 + $0x34] sm:$0x1] }
  0x1b   :  { %2954 = vmatmul.mubr.msk.bf16.gmra.mrb[4].mxu1 %vm324_vm3, %v2944_v57  ;;  %v1211_v5 = vrot.slane %v1210_v58, 4  ;;  %v141_v6 = vrot.slane %v139_v60, 5  ;;  %v1218_v10 = vshrl.u32 %v911_v56, 16  ;;  %v1221_v11 = vshll.u32 %v911_v56, 16  ;;  %v917_v44 = vld [vmem:[%s4474_s3 + $0x38] sm:$0xf] }
  0x1c   :  { %408 = vmatprep.mubr.bf16.mxu1 %v3428_v1  ;;  %v129_v12 = vrot.slane %v128_v0, 4  ;;  %v147_v13 = vrot.slane %v145_v4, 5  ;;  %v1227_v14 = vshll.u32 %v912_v61, 16  ;;  %v1232_v16 = vshrl.u32 %v913_v62, 16  ;;  %v918_v60 = vld [vmem:[%s4474_s3 + $0x3c] sm:$0x1] }
  0x1d   :  { %v1216_v18 = vsel %vm3534_vm4, %v1211_v5, %v1215_v47  ;;  %v142_v19 = vor.u32 %v141_v6, %v138_v3  ;;  %v1220_v20 = vrot.slane %v1218_v10, 4  ;;  %v1223_v21 = vrot.slane %v1221_v11, 5  ;;  %v3678_v6 = vld [vmem:[%s4473_s1 + $0x40] sm:$0xf]  ;;  %v3383_v15 = vld [vmem:[%s4475_s4 + $0x70] ss:$8 sps:$4 sm:$0xff]  }
  0x1e   :  { %v3019_v26 = vcombine.low %v1202_v63, %v1216_v18  ;;  %v134_v27 = vsel %vm3534_vm4, %v129_v12, %v133_v59  ;;  %v1229_v30 = vrot.slane %v1227_v14, 5  ;;  %v1234_v31 = vrot.slane %v1232_v16, 4  ;;  %v3672_v63 = vld.sshfl [vmem:[%s4472_s0 + $0x18] sm:$0x33 pattern:$0x76325410] }
  0x1f   :  { %v143_v32 = vrot.slane %v142_v19, 4  ;;  %v1224_v33 = vor.u32 %v1223_v21, %v1220_v20  ;;  %v1235_v25 = vshll.u32 %v913_v62, 16  ;;  %v1241_v34 = vshll.u32 %v914_v9, 16  ;;  %v3381_v2 = vld [vmem:[%s4475_s4 + $0x60] ss:$8 sps:$4 sm:$0xff]  }
  0x20   :  { %3029 = vmatmul.mubr.msk.bf16.gmra.mrb[4].mxu0 %vm324_vm3, %v3019_v26  ;;  %v150_v37 = vshrl.u32 %v3629_v17, 16  ;;  %v153_v38 = vshll.u32 %v3629_v17, 16  ;;  %v159_v41 = vshll.u32 %v42_v22, 16  ;;  %v164_v42 = vshrl.u32 %v3639_v23, 16 }
  0x21   :  { %1502 = vmatprep.mubr.bf16.mxu0 %v3428_v1  ;;  %v148_v45 = vsel %vm3534_vm4, %v143_v32, %v147_v13  ;;  %v1225_v46 = vrot.slane %v1224_v33, 4  ;;  %v1237_v47 = vrot.slane %v1235_v25, 5  ;;  %v1243_v48 = vrot.slane %v1241_v34, 5  ;;  %v46_v13 = vld [vmem:[%s4473_s1 + $0x44] sm:$0x1] }
  0x22   :  { %v2945_v50 = vcombine.low %v134_v27, %v148_v45  ;;  %v152_v51 = vrot.slane %v150_v37, 4  ;;  %v155_v52 = vrot.slane %v153_v38, 5  ;;  %v161_v53 = vrot.slane %v159_v41, 5  ;;  %v3690_v27 = vld [vmem:[%s4473_s1 + $0x48] sm:$0xf] }
  0x23   :  { %v1230_v54 = vsel %vm3534_vm4, %v1225_v46, %v1229_v30  ;;  %v1238_v55 = vor.u32 %v1237_v47, %v1234_v31  ;;  %v166_v56 = vrot.slane %v164_v42, 4  ;;  %v167_v57 = vshll.u32 %v3639_v23, 16 }
  0x24   :  { %2955 = vmatmul.mubr.msk.bf16.gmra.mrb[8].mxu1 %vm324_vm3, %v2945_v50  ;;  %v156_v58 = vor.u32 %v155_v52, %v152_v51  ;;  %v173_v59 = vshll.u32 %v44_v35, 16  ;;  %v1246_v61 = vshrl.u32 %v915_v36, 16  ;;  %v1249_v62 = vshll.u32 %v915_v36, 16  ;;  %v48_v35 = vld [vmem:[%s4473_s1 + $0x4c] sm:$0x1] }
  0x25   :  { %v1239_v0 = vrot.slane %v1238_v55, 4  ;;  %418 = vmatprep.mubr.bf16.mxu1 %v3428_v1  ;;  %v169_v3 = vrot.slane %v167_v57, 5  ;;  %v1255_v4 = vshll.u32 %v916_v43, 16  ;;  %v1260_v5 = vshrl.u32 %v917_v44, 16  ;;  %v3708_v43 = vld [vmem:[%s4473_s1 + $0x50] sm:$0xf] }
  0x26   :  { %v157_v9 = vrot.slane %v156_v58, 4  ;;  %v175_v10 = vrot.slane %v173_v59, 5  ;;  %v1248_v11 = vrot.slane %v1246_v61, 4  ;;  %v1251_v12 = vrot.slane %v1249_v62, 5 }
  0x27   :  { %v1244_v14 = vsel %vm3534_vm4, %v1239_v0, %v1243_v48  ;;  %v170_v16 = vor.u32 %v169_v3, %v166_v56  ;;  %v1257_v18 = vrot.slane %v1255_v4, 5  ;;  %v1262_v19 = vrot.slane %v1260_v5, 4 }
  0x28   :  { %v3020_v20 = vcombine.low %v1230_v54, %v1244_v14  ;;  %v162_v21 = vsel %vm3534_vm4, %v157_v9, %v161_v53  ;;  %v1252_v22 = vor.u32 %v1251_v12, %v1248_v11  ;;  %v1263_v26 = vshll.u32 %v917_v44, 16  ;;  %v50_v44 = vld [vmem:[%s4473_s1 + $0x54] sm:$0x1]  ;;  %v3719_v54 = vld [vmem:[%s4473_s1 + $0x58] sm:$0xf] }
  0x29   :  { %v171_v30 = vrot.slane %v170_v16, 4  ;;  %v1269_v31 = vshll.u32 %v918_v60, 16  ;;  %v1919_v32 = vcombine.high %v3672_v63, %v3672_v63  ;;  %v178_v33 = vshrl.u32 %v3678_v6, 16  ;;  %v52_v60 = vld [vmem:[%s4473_s1 + $0x5c] sm:$0x1] }
  0x2a   :  { %3030 = vmatmul.mubr.msk.bf16.gmra.mrb[8].mxu0 %vm324_vm3, %v3020_v20  ;;  %v1253_v25 = vrot.slane %v1252_v22, 4  ;;  %v1265_v34 = vrot.slane %v1263_v26, 5  ;;  %v181_v36 = vshll.u32 %v3678_v6, 16  ;;  %v187_v37 = vshll.u32 %v46_v13, 16  ;;  %v3734_v9 = vld [vmem:[%s4473_s1 + $0x60] sm:$0xf] }
  0x2b   :  { %1512 = vmatprep.mubr.bf16.mxu0 %v3428_v1  ;;  %v176_v38 = vsel %vm3534_vm4, %v171_v30, %v175_v10  ;;  %3065 = vmatprep.subr.msk.bf16.mxu0 %vm349_vm0, %v1919_v32  ;;  %v180_v41 = vrot.slane %v178_v33, 4  ;;  %v192_v42 = vshrl.u32 %v3690_v27, 16  ;;  %v1271_v47 = vrot.slane %v1269_v31, 5  ;;  %v54_v14 = vld [vmem:[%s4473_s1 + $0x64] sm:$0x1] }
  0x2c   :  { %v2946_v45 = vcombine.low %v162_v21, %v176_v38  ;;  %v1266_v46 = vor.u32 %v1265_v34, %v1262_v19  ;;  %v183_v48 = vrot.slane %v181_v36, 5  ;;  %v1258_v50 = vsel %vm3534_vm4, %v1253_v25, %v1257_v18  ;;  %v3742_v16 = vld [vmem:[%s4473_s1 + $0x68] sm:$0xf]  ;;  %v56_v22 = vld [vmem:[%s4473_s1 + $0x6c] sm:$0x1] }
  0x2d   :  { %v194_v51 = vrot.slane %v192_v42, 4  ;;  %v195_v52 = vshll.u32 %v3690_v27, 16  ;;  %v201_v53 = vshll.u32 %v48_v35, 16  ;;  %v189_v57 = vrot.slane %v187_v37, 5  ;;  %v3756_v33 = vld [vmem:[%s4473_s1 + $0x70] sm:$0xf] }
  0x2e   :  { %2956 = vmatmul.mubr.msk.bf16.gmra.mrb[12].mxu1 %vm324_vm3, %v2946_v45  ;;  %v1267_v55 = vrot.slane %v1266_v46, 4  ;;  %v184_v56 = vor.u32 %v183_v48, %v180_v41  ;;  %v206_v58 = vshrl.u32 %v3708_v43, 16  ;;  %v209_v61 = vshll.u32 %v3708_v43, 16  ;;  %v3768_v48 = vld [vmem:[%s4473_s1 + $0x78] sm:$0xf] }
  0x2f   :  { %428 = vmatprep.mubr.bf16.mxu1 %v3428_v1  ;;  %v197_v59 = vrot.slane %v195_v52, 5  ;;  %v215_v62 = vshll.u32 %v50_v44, 16  ;;  %v220_v5 = vshrl.u32 %v3719_v54, 16  ;;  %v203_v12 = vrot.slane %v201_v53, 5  ;;  %v3372_v44 = vld [vmem:[%s4475_s4] ss:$8 sps:$4 sm:$0xff]  }
  0x30   :  { %v1272_v0 = vsel %vm3534_vm4, %v1267_v55, %v1271_v47  ;;  %v185_v3 = vrot.slane %v184_v56, 4  ;;  %v208_v4 = vrot.slane %v206_v58, 4  ;;  %v211_v13 = vrot.slane %v209_v61, 5 }
  0x31   :  { %v3021_v10 = vcombine.low %v1258_v50, %v1272_v0  ;;  %v198_v11 = vor.u32 %v197_v59, %v194_v51  ;;  %v222_v19 = vrot.slane %v220_v5, 4  ;;  %v223_v20 = vshll.u32 %v3719_v54, 16 }
  0x32   :  { %v190_v18 = vsel %vm3534_vm4, %v185_v3, %v189_v57  ;;  %v229_v21 = vshll.u32 %v52_v60, 16  ;;  %v212_v30 = vor.u32 %v211_v13, %v208_v4  ;;  %v234_v31 = vshrl.u32 %v3734_v9, 16 }
  0x33   :  { %3031 = vmatmul.mubr.msk.bf16.gmra.mrb[12].mxu0 %vm324_vm3, %v3021_v10  ;;  %v199_v26 = vrot.slane %v198_v11, 4  ;;  %v237_v32 = vshll.u32 %v3734_v9, 16  ;;  %v217_v25 = vrot.slane %v215_v62, 5  ;;  %v225_v34 = vrot.slane %v223_v20, 5 }
  0x34   :  { %1724 = vmatprep.mubr.bf16.mxu0 %v3428_v1  ;;  %v248_v35 = vshrl.u32 %v3742_v16, 16  ;;  %v213_v37 = vrot.slane %v212_v30, 4  ;;  %v236_v38 = vrot.slane %v234_v31, 4  ;;  %v231_v46 = vrot.slane %v229_v21, 5 }
  0x35   :  { %v204_v36 = vsel %vm3534_vm4, %v199_v26, %v203_v12  ;;  %v239_v41 = vrot.slane %v237_v32, 5  ;;  %v226_v45 = vor.u32 %v225_v34, %v222_v19  ;;  %v243_v47 = vshll.u32 %v54_v14, 16  ;;  %v2988_v62 = vld.sshfl [vmem:[%s4472_s0 + $0x4] sm:$0x33 pattern:$0x76325410] }
  0x36   :  { %v2947_v42 = vcombine.low %v190_v18, %v204_v36  ;;  %v250_v51 = vrot.slane %v248_v35, 4  ;;  %v251_v52 = vshll.u32 %v3742_v16, 16  ;;  %v257_v53 = vshll.u32 %v56_v22, 16  ;;  %v58_v19 = vld [vmem:[%s4473_s1 + $0x74] sm:$0x1] }
  0x37   :  { %v240_v50 = vor.u32 %v239_v41, %v236_v38  ;;  %v1945_v55 = vsel %vm349_vm0, %v3672_v63, 0  ;;  %v227_v56 = vrot.slane %v226_v45, 4  ;;  %v262_v57 = vshrl.u32 %v3756_v33, 16  ;;  %v60_v26 = vld [vmem:[%s4473_s1 + $0x7c] sm:$0x1] }
  0x38   :  { %2957 = vmatmul.mubr.msk.bf16.gmra.mrb[16].mxu1 %vm324_vm3, %v2947_v42  ;;  %v265_v58 = vshll.u32 %v3756_v33, 16  ;;  %v218_v59 = vsel %vm3534_vm4, %v213_v37, %v217_v25  ;;  %v253_v60 = vrot.slane %v251_v52, 5  ;;  %v276_v61 = vshrl.u32 %v3768_v48, 16  ;;  %v3373_v32 = vld [vmem:[%s4475_s4 + $0x10] ss:$8 sps:$4 sm:$0xff]  }
  0x39   :  { %438 = vmatprep.mubr.bf16.mxu1 %v3428_v1  ;;  %v232_v63 = vsel %vm3534_vm4, %v227_v56, %v231_v46  ;;  %v245_v0 = vrot.slane %v243_v47, 5  ;;  %v241_v3 = vrot.slane %v240_v50, 4  ;;  %v259_v5 = vrot.slane %v257_v53, 5  ;;  %v3374_v46 = vld [vmem:[%s4475_s4 + $0x20] ss:$8 sps:$4 sm:$0xff]  }
  0x3a   :  { %v254_v4 = vor.u32 %v253_v60, %v250_v51  ;;  %v264_v10 = vrot.slane %v262_v57, 4  ;;  %v2948_v11 = vcombine.low %v218_v59, %v232_v63  ;;  %v267_v12 = vrot.slane %v265_v58, 5  ;;  %v3375_v53 = vld [vmem:[%s4475_s4 + $0x30] ss:$8 sps:$4 sm:$0xff]   ;;  %v3377_v58 = vld [vmem:[%s4475_s4 + $0x40] ss:$8 sps:$4 sm:$0xff]  }
  0x3b   :  { %3047 = vmatmul.mubr.msk.bf16.vlgmr.msra.gmra.mrb[0].mxu0 %vm324_vm3, %v3372_v44  ;;  %v279_v13 = vshll.u32 %v3768_v48, 16  ;;  %v727_v14 = vcombine.high %v2988_v62, %v2988_v62  ;;  %v278_v20 = vrot.slane %v276_v61, 4  ;;  %v2962_v21 = vcombine.low %v3544_v39, %v3554_v49  ;;  %v3807_v39 = vld.sshfl [vmem:[%s4472_s0 + $0x20] sm:$0x33 pattern:$0x76325410] }
  0x3c   :  { %1951 = vmatpush1.bf16.msra.mxu0 %v1945_v55  ;;  %1734 = vmatprep.mubr.bf16.mxu0 %v3428_v1  ;;  %v255_v18 = vrot.slane %v254_v4, 4  ;;  %v2963_v22 = vcombine.low %v3587_v24, %v3598_v40  ;;  %v2964_v31 = vcombine.low %v3629_v17, %v3639_v23  ;;  %v2965_v49 = vcombine.low %v3678_v6, %v3690_v27  ;;  %v3848_v55 = vld.sshfl [vmem:[%s4472_s0 + $0xc] sm:$0x33 pattern:$0x76325410] }
  0x3d   :  { %v281_v30 = vrot.slane %v279_v13, 5  ;;  %2989 = vmatprep.subr.msk.bf16.mxu1 %vm349_vm0, %v727_v14  ;;  %v246_v24 = vsel %vm3534_vm4, %v241_v3, %v245_v0  ;;  %v271_v40 = vshll.u32 %v58_v19, 16  ;;  %v2353_v17 = vcombine.high %v3807_v39, %v3807_v39  ;;  %v3379_v59 = vld [vmem:[%s4475_s4 + $0x50] ss:$8 sps:$4 sm:$0xff]   ;;  %v3892_v60 = vld [vmem:[%s4477_s5 + $0x8] sm:$0xf] }
  0x3e   :  { %v260_v23 = vsel %vm3534_vm4, %v255_v18, %v259_v5  ;;  %v268_v25 = vor.u32 %v267_v12, %v264_v10  ;;  %v285_v35 = vshll.u32 %v60_v26, 16  ;;  %v2966_v36 = vcombine.low %v3708_v43, %v3719_v54  ;;  %v3897_v61 = vld.sshfl [vmem:[%s4472_s0 + $0x1c] sm:$0x33 pattern:$0x76325410] }
  0x3f   :  { %v282_v34 = vor.u32 %v281_v30, %v278_v20  ;;  %3084 = vmatprep.subr.msk.bf16.mxu0 %vm349_vm0, %v2353_v17  ;;  %v2949_v37 = vcombine.low %v246_v24, %v260_v23  ;;  %v273_v38 = vrot.slane %v271_v40, 5  ;;  %v2967_v45 = vcombine.low %v3734_v9, %v3742_v16  ;;  %v3914_v3 = vld [vmem:[%s4477_s5 + $0x10] sm:$0xf]  ;;  %v3919_v6 = vld [vmem:[%s4477_s5 + $0x18] sm:$0xf] }
  0x40   :  { %2958 = vmatmul.mubr.msk.bf16.gmra.mrb[20].mxu1 %vm324_vm3, %v2948_v11  ;;  %v269_v41 = vrot.slane %v268_v25, 4  ;;  %v287_v44 = vrot.slane %v285_v35, 5  ;;  %v2968_v47 = vcombine.low %v3756_v33, %v3768_v48  ;;  %v753_v56 = vsel %vm349_vm0, %v2988_v62, 0  ;;  %v3934_v4 = vld [vmem:[%s4477_s5 + $0x20] sm:$0xf] }
  0x41   :  { %448 = vmatprep.mubr.bf16.mxu1 %v3428_v1  ;;  %v283_v42 = vrot.slane %v282_v34, 4  ;;  %v985_v57 = vcombine.high %v3848_v55, %v3848_v55  ;;  %v2379_v63 = vsel %vm349_vm0, %v3807_v39, 0  ;;  %v2595_v0 = vcombine.high %v3897_v61, %v3897_v61  ;;  %v3939_v5 = vld [vmem:[%s4477_s5 + $0x28] sm:$0xf]  ;;  %v3953_v54 = vld [vmem:[%s4477_s5 + $0x30] sm:$0xf] }
  0x42   :  { %v274_v50 = vsel %vm3534_vm4, %v269_v41, %v273_v38  ;;  %v3057_v27 = vcombine.low %v3914_v3, %v3919_v6  ;;  %v3058_v43 = vcombine.low %v3934_v4, %v3939_v5  ;;  %v3958_v10 = vld [vmem:[%s4477_s5 + $0x38] sm:$0xf]  ;;  %v3392_v16 = vld [vmem:[%s4476_s2] ss:$8 sps:$4 sm:$0xff]   ;;  %v1011_v48 = vsel %vm349_vm0, %v3848_v55, 0 }
  0x43   :  { %3048 = vmatmul.mubr.msk.bf16.gmra.mrb[4].mxu0 %vm324_vm3, %v3373_v32  ;;  %v288_v51 = vsel %vm3534_vm4, %v283_v42, %v287_v44  ;;  %v3059_v9 = vcombine.low %v3953_v54, %v3958_v10  ;;  %v3975_v11 = vld [vmem:[%s4477_s5 + $0x40] sm:$0xf]  ;;  %v3980_v33 = vld [vmem:[%s4477_s5 + $0x48] sm:$0xf]  ;;  %v3394_v13 = vld [vmem:[%s4476_s2 + $0x10] ss:$8 sps:$4 sm:$0xff]  }
  0x44   :  { %1744 = vmatprep.mubr.bf16.mxu0 %v3428_v1  ;;  %v2950_v52 = vcombine.low %v274_v50, %v288_v51  ;;  %v3060_v12 = vcombine.low %v3975_v11, %v3980_v33  ;;  %v3998_v14 = vld [vmem:[%s4477_s5 + $0x50] sm:$0xf]  ;;  %v4003_v18 = vld [vmem:[%s4477_s5 + $0x58] sm:$0xf]  ;;  %v3396_v26 = vld [vmem:[%s4476_s2 + $0x20] ss:$8 sps:$4 sm:$0xff]  }
  0x45   :  { %v4019_v30 = vld [vmem:[%s4477_s5 + $0x60] sm:$0xf]  ;;  %v1838_v17 = vld [vmem:[%s4477_s5 + $0x4] sm:$0x1]  ;;  %v1840_v23 = vld [vmem:[%s4477_s5 + $0xc] sm:$0x1] }
  0x46   :  { %v2124_v25 = vshrl.u32 %v3914_v3, 16  ;;  %v2127_v34 = vshll.u32 %v3914_v3, 16  ;;  %v2138_v35 = vshrl.u32 %v3919_v6, 16  ;;  %v4048_v38 = vld [vmem:[%s4477_s5 + $0x70] sm:$0xf]  ;;  %v2105_v44 = vshll.u32 %v1838_v17, 16 }
  0x47   :  { %v4053_v41 = vld [vmem:[%s4477_s5 + $0x78] sm:$0xf]  ;;  %v3400_v3 = vld [vmem:[%s4476_s2 + $0x40] ss:$8 sps:$4 sm:$0xff]   ;;  %vm2919_vm5 = vcmask 1040384  }
  0x48   :  { %2959 = vmatmul.mubr.msk.bf16.gmra.mrb[24].mxu1 %vm324_vm3, %v2949_v37  ;;  %v3398_v37 = vld [vmem:[%s4476_s2 + $0x30] ss:$8 sps:$4 sm:$0xff]   ;;  %v2129_v50 = vrot.slane %v2127_v34, 5  ;;  %v2140_v51 = vrot.slane %v2138_v35, 4 }
  0x49   :  { %458 = vmatprep.mubr.bf16.mxu1 %v3428_v1  ;;  %v3401_v17 = vld [vmem:[%s4476_s2 + $0x50] ss:$8 sps:$4 sm:$0xff]  }
  0x4b   :  { %3049 = vmatmul.mubr.msk.bf16.gmra.mrb[8].mxu0 %vm324_vm3, %v3374_v46  ;;  %v2119_v46 = vshll.u32 %v1840_v23, 16 }
  0x4c   :  { %1754 = vmatprep.mubr.bf16.mxu0 %v3428_v1 }
  0x50   :  { %2960 = vmatmul.mubr.msk.bf16.gmra.mrb[28].mxu1 %vm324_vm3, %v2950_v52 }
  0x51   :  { %580 = vmatprep.mubr.bf16.mxu1 %v3428_v1 }
  0x53   :  { %3050 = vmatmul.mubr.msk.bf16.gmra.mrb[12].mxu0 %vm324_vm3, %v3375_v53  ;;  %v3063_v53 = vcombine.low %v4048_v38, %v4053_v41 }
  0x54   :  { %1764 = vmatprep.mubr.bf16.mxu0 %v3428_v1 }
  0x58   :  { %2971 = vmatmul.mubr.msk.bf16.vlgmr.msra.gmra.mrb[0].mxu1 %vm324_vm3, %v2961_v28  ;;  %v1837_v28 = vld [vmem:[%s4477_s5] sm:$0xf] }
  0x59   :  { %759 = vmatpush1.bf16.msra.mxu1 %v753_v56  ;;  %590 = vmatprep.mubr.bf16.mxu1 %v3428_v1  ;;  %v3056_v62 = vcombine.low %v1837_v28, %v3892_v60  ;;  %v2096_v19 = vshrl.u32 %v1837_v28, 16  ;;  %v2099_v20 = vshll.u32 %v1837_v28, 16  ;;  %v2107_v56 = vrot.slane %v2105_v44, 5 }
  0x5a   :  { %3008 = vmatprep.subr.msk.bf16.mxu1 %vm349_vm0, %v985_v57  ;;  %v2155_v28 = vshll.u32 %v3934_v4, 16 }
  0x5b   :  { %3051 = vmatmul.mubr.msk.bf16.gmra.mrb[16].mxu0 %vm324_vm3, %v3377_v58  ;;  %v2098_v39 = vrot.slane %v2096_v19, 4  ;;  %v2121_v58 = vrot.slane %v2119_v46, 5 }
  0x5c   :  { %1774 = vmatprep.mubr.bf16.mxu0 %v3428_v1 }
  0x60   :  { %2972 = vmatmul.mubr.msk.bf16.gmra.mrb[4].mxu1 %vm324_vm3, %v2962_v21  ;;  %v2110_v21 = vshrl.u32 %v3892_v60, 16 }
  0x61   :  { %600 = vmatprep.mubr.bf16.mxu1 %v3428_v1 }
  0x62   :  { %v2112_v24 = vrot.slane %v2110_v21, 4  ;;  %v2621_v21 = vsel %vm349_vm0, %v3897_v61, 0 }
  0x63   :  { %3052 = vmatmul.mubr.msk.bf16.gmra.mrb[20].mxu0 %vm324_vm3, %v3379_v59  ;;  %v1842_v59 = vld [vmem:[%s4477_s5 + $0x14] sm:$0x1] }
  0x64   :  { %1784 = vmatprep.mubr.bf16.mxu0 %v3428_v1 }
  0x68   :  { %2973 = vmatmul.mubr.msk.bf16.gmra.mrb[8].mxu1 %vm324_vm3, %v2963_v22  ;;  %v2113_v22 = vshll.u32 %v3892_v60, 16  ;;  %v2166_v60 = vshrl.u32 %v3939_v5, 16 }
  0x69   :  { %610 = vmatprep.mubr.bf16.mxu1 %v3428_v1 }
  0x6a   :  { %v2115_v40 = vrot.slane %v2113_v22, 5  ;;  %v1846_v22 = vld [vmem:[%s4477_s5 + $0x24] sm:$0x1] }
  0x6b   :  { %3053 = vmatmul.mubr.msk.bf16.gmra.mrb[24].mxu0 %vm324_vm3, %v3381_v2  ;;  %v1844_v2 = vld [vmem:[%s4477_s5 + $0x1c] sm:$0x1] }
  0x6c   :  { %1794 = vmatprep.mubr.bf16.mxu0 %v3428_v1 }
  0x70   :  { %2974 = vmatmul.mubr.msk.bf16.gmra.mrb[12].mxu1 %vm324_vm3, %v2964_v31  ;;  %v4024_v31 = vld [vmem:[%s4477_s5 + $0x68] sm:$0xf] }
  0x71   :  { %620 = vmatprep.mubr.bf16.mxu1 %v3428_v1  ;;  %v3062_v32 = vcombine.low %v4019_v30, %v4024_v31 }
  0x73   :  { %3054 = vmatmul.mubr.msk.bf16.gmra.mrb[28].mxu0 %vm324_vm3, %v3383_v15  ;;  %v2152_v15 = vshrl.u32 %v3934_v4, 16  ;;  %v2133_v4 = vshll.u32 %v1842_v59, 16  ;;  %v3402_v59 = vld [vmem:[%s4476_s2 + $0x60] ss:$8 sps:$4 sm:$0xff]  }
  0x74   :  { %1982 = vmatprep.mubr.bf16.mxu0 %v3428_v1 }
  0x78   :  { %2975 = vmatmul.mubr.msk.bf16.gmra.mrb[16].mxu1 %vm324_vm3, %v2965_v49  ;;  %v2101_v49 = vrot.slane %v2099_v20, 5 }
  0x79   :  { %630 = vmatprep.mubr.bf16.mxu1 %v3428_v1 }
  0x7a   :  { %v2102_v42 = vor.u32 %v2101_v49, %v2098_v39  ;;  %v2183_v39 = vshll.u32 %v3953_v54, 16  ;;  %v2194_v49 = vshrl.u32 %v3958_v10, 16 }
  0x7b   :  { %3066 = vmatmul.mubr.msk.bf16.vlgmr.msra.gmra.mrb[0].mxu0 %vm324_vm3, %v3056_v62  ;;  %v2169_v62 = vshll.u32 %v3939_v5, 16  ;;  %v2157_v5 = vrot.slane %v2155_v28, 5 }
  0x7c   :  { %2385 = vmatpush1.bf16.msra.mxu0 %v2379_v63  ;;  %1992 = vmatprep.mubr.bf16.mxu0 %v3428_v1  ;;  %v2103_v55 = vrot.slane %v2102_v42, 4  ;;  %v2185_v35 = vrot.slane %v2183_v39, 5 }
  0x7d   :  { %3103 = vmatprep.subr.msk.bf16.mxu0 %vm349_vm0, %v2595_v0 }
  0x80   :  { %2976 = vmatmul.mubr.msk.bf16.gmra.mrb[20].mxu1 %vm324_vm3, %v2966_v36  ;;  %v2141_v36 = vshll.u32 %v3919_v6, 16  ;;  %v2108_v6 = vsel %vm3534_vm4, %v2103_v55, %v2107_v56  ;;  %v2222_v55 = vshrl.u32 %v3980_v33, 16  ;;  %v2225_v56 = vshll.u32 %v3980_v33, 16 }
  0x81   :  { %640 = vmatprep.mubr.bf16.mxu1 %v3428_v1 }
  0x82   :  { %v2143_v52 = vrot.slane %v2141_v36, 5  ;;  %v2196_v36 = vrot.slane %v2194_v49, 4 }
  0x83   :  { %3067 = vmatmul.mubr.msk.bf16.gmra.mrb[4].mxu0 %vm324_vm3, %v3057_v27 }
  0x84   :  { %2002 = vmatprep.mubr.bf16.mxu0 %v3428_v1  ;;  %v2144_v0 = vor.u32 %v2143_v52, %v2140_v51  ;;  %v1852_v51 = vld [vmem:[%s4477_s5 + $0x3c] sm:$0x1]  ;;  %v2208_v52 = vshrl.u32 %v3975_v11, 16 }
  0x85   :  { %v2203_v28 = vshll.u32 %v1852_v51, 16 }
  0x86   :  { %v2145_v19 = vrot.slane %v2144_v0, 4 }
  0x88   :  { %2977 = vmatmul.mubr.msk.bf16.gmra.mrb[24].mxu1 %vm324_vm3, %v2967_v45  ;;  %v2116_v45 = vor.u32 %v2115_v40, %v2112_v24  ;;  %v2197_v24 = vshll.u32 %v3958_v10, 16 }
  0x89   :  { %650 = vmatprep.mubr.bf16.mxu1 %v3428_v1 }
  0x8a   :  { %v2117_v57 = vrot.slane %v2116_v45, 4 }
  0x8b   :  { %3068 = vmatmul.mubr.msk.bf16.gmra.mrb[8].mxu0 %vm324_vm3, %v3058_v43  ;;  %v2147_v43 = vshll.u32 %v1844_v2, 16 }
  0x8c   :  { %2012 = vmatprep.mubr.bf16.mxu0 %v3428_v1  ;;  %v2122_v27 = vsel %vm3534_vm4, %v2117_v57, %v2121_v58 }
  0x8d   :  { %v2149_v20 = vrot.slane %v2147_v43, 5  ;;  %v1854_v43 = vld [vmem:[%s4477_s5 + $0x44] sm:$0x1] }
  0x90   :  { %2978 = vmatmul.mubr.msk.bf16.gmra.mrb[28].mxu1 %vm324_vm3, %v2968_v47  ;;  %v2126_v47 = vrot.slane %v2124_v25, 4  ;;  %v2161_v25 = vshll.u32 %v1846_v22, 16 }
  0x91   :  { %790 = vmatprep.mubr.bf16.mxu1 %v3428_v1 }
  0x92   :  { %v2130_v63 = vor.u32 %v2129_v50, %v2126_v47  ;;  %v2163_v45 = vrot.slane %v2161_v25, 5  ;;  %v1850_v50 = vld [vmem:[%s4477_s5 + $0x34] sm:$0x1]  ;;  %v2264_v25 = vshrl.u32 %v4019_v30, 16 }
  0x93   :  { %3069 = vmatmul.mubr.msk.bf16.gmra.mrb[12].mxu0 %vm324_vm3, %v3059_v9  ;;  %v2154_v9 = vrot.slane %v2152_v15, 4  ;;  %v2189_v15 = vshll.u32 %v1850_v50, 16 }
  0x94   :  { %2022 = vmatprep.mubr.bf16.mxu0 %v3428_v1  ;;  %v2266_v50 = vrot.slane %v2264_v25, 4  ;;  %v3426_v25 = vld [vmem:[%s4474_s3 + $0x30] sm:$0xf] }
  0x95   :  { %v2158_v61 = vor.u32 %v2157_v5, %v2154_v9  ;;  %v1856_v9 = vld [vmem:[%s4477_s5 + $0x4c] sm:$0x1]  ;;  %v2236_v5 = vshrl.u32 %v3998_v14, 16 }
  0x96   :  { %v2231_v22 = vshll.u32 %v1856_v9, 16 }
  0x97   :  { %v2159_v44 = vrot.slane %v2158_v61, 4 }
  0x98   :  { %2990 = vmatmul.mubr.msk.bf16.vlgmr.msra.gmra.mrb[0].mxu1 %vm324_vm3, %v3392_v16  ;;  %v2168_v16 = vrot.slane %v2166_v60, 4  ;;  %v2210_v60 = vrot.slane %v2208_v52, 4 }
  0x99   :  { %1017 = vmatpush1.bf16.msra.mxu1 %v1011_v48  ;;  %800 = vmatprep.mubr.bf16.mxu1 %v3428_v1  ;;  %v2171_v48 = vrot.slane %v2169_v62, 5  ;;  %v2164_v2 = vsel %vm3534_vm4, %v2159_v44, %v2163_v45  ;;  %v2224_v62 = vrot.slane %v2222_v55, 4 }
  0x9a   :  { %3113 = vmatprep.subr.msk.bf16.mxu1 %vm349_vm0, %v3489_v7  ;;  %v3061_v7 = vcombine.low %v3998_v14, %v4003_v18 }
  0x9b   :  { %3070 = vmatmul.mubr.msk.bf16.gmra.mrb[16].mxu0 %vm324_vm3, %v3060_v12  ;;  %v3075_v12 = vcombine.low %v2108_v6, %v2122_v27  ;;  %v2172_v40 = vor.u32 %v2171_v48, %v2168_v16  ;;  %v2191_v6 = vrot.slane %v2189_v15, 5  ;;  %v2239_v16 = vshll.u32 %v3998_v14, 16 }
  0x9c   :  { %2032 = vmatprep.mubr.bf16.mxu0 %v3428_v1  ;;  %v2250_v48 = vshrl.u32 %v4003_v18, 16  ;;  %v2292_v15 = vshrl.u32 %v4048_v38, 16 }
  0x9d   :  { %v2173_v46 = vrot.slane %v2172_v40, 4 }
  0xa0   :  { %2991 = vmatmul.mubr.msk.bf16.gmra.mrb[4].mxu1 %vm324_vm3, %v3394_v13  ;;  %v2131_v13 = vrot.slane %v2130_v63, 4  ;;  %v2227_v63 = vrot.slane %v2225_v56, 5 }
  0xa1   :  { %810 = vmatprep.mubr.bf16.mxu1 %v3428_v1 }
  0xa3   :  { %3071 = vmatmul.mubr.msk.bf16.gmra.mrb[20].mxu0 %vm324_vm3, %v3061_v7  ;;  %v2135_v7 = vrot.slane %v2133_v4, 5  ;;  %v2205_v4 = vrot.slane %v2203_v28, 5  ;;  %v2295_v28 = vshll.u32 %v4048_v38, 16 }
  0xa4   :  { %2042 = vmatprep.mubr.bf16.mxu0 %v3428_v1 }
  0xa5   :  { %v2136_v23 = vsel %vm3534_vm4, %v2131_v13, %v2135_v7  ;;  %v2228_v7 = vor.u32 %v2227_v63, %v2224_v62  ;;  %v3423_v62 = vld [vmem:[%s4474_s3 + $0x18] sm:$0xf] }
  0xa7   :  { %v2229_v40 = vrot.slane %v2228_v7, 4 }
  0xa8   :  { %2992 = vmatmul.mubr.msk.bf16.gmra.mrb[8].mxu1 %vm324_vm3, %v3396_v26  ;;  %v1848_v26 = vld [vmem:[%s4477_s5 + $0x2c] sm:$0x1] }
  0xa9   :  { %820 = vmatprep.mubr.bf16.mxu1 %v3428_v1  ;;  %v2175_v34 = vshll.u32 %v1848_v26, 16  ;;  %v2238_v26 = vrot.slane %v2236_v5, 4 }
  0xab   :  { %3072 = vmatmul.mubr.msk.bf16.gmra.mrb[24].mxu0 %vm324_vm3, %v3062_v32  ;;  %v2180_v32 = vshrl.u32 %v3953_v54, 16  ;;  %v2150_v54 = vsel %vm3534_vm4, %v2145_v19, %v2149_v20  ;;  %v2177_v47 = vrot.slane %v2175_v34, 5  ;;  %v3403_v19 = vld [vmem:[%s4476_s2 + $0x70] ss:$8 sps:$4 sm:$0xff]   ;;  %v2267_v34 = vshll.u32 %v4019_v30, 16 }
  0xac   :  { %2052 = vmatprep.mubr.bf16.mxu0 %v3428_v1  ;;  %v3076_v42 = vcombine.low %v2136_v23, %v2150_v54  ;;  %v1858_v23 = vld [vmem:[%s4477_s5 + $0x54] sm:$0x1]  ;;  %v1860_v54 = vld [vmem:[%s4477_s5 + $0x5c] sm:$0x1] }
  0xad   :  { %v2182_v10 = vrot.slane %v2180_v32, 4  ;;  %v2252_v32 = vrot.slane %v2250_v48, 4  ;;  %v2269_v51 = vrot.slane %v2267_v34, 5  ;;  %v3427_v34 = vld [vmem:[%s4474_s3 + $0x38] sm:$0xf] }
  0xaf   :  { %v2186_v57 = vor.u32 %v2185_v35, %v2182_v10  ;;  %v2278_v10 = vshrl.u32 %v4024_v31, 16  ;;  %v2281_v35 = vshll.u32 %v4024_v31, 16 }
  0xb0   :  { %2993 = vmatmul.mubr.msk.bf16.gmra.mrb[12].mxu1 %vm324_vm3, %v3398_v37  ;;  %v2199_v37 = vrot.slane %v2197_v24, 5 }
  0xb1   :  { %830 = vmatprep.mubr.bf16.mxu1 %v3428_v1  ;;  %v2280_v52 = vrot.slane %v2278_v10, 4  ;;  %v3002_v10 = vcombine.low %v3426_v25, %v3427_v34 }
  0xb2   :  { %v2200_v58 = vor.u32 %v2199_v37, %v2196_v36  ;;  %v3420_v36 = vld [vmem:[%s4474_s3] sm:$0xf]  ;;  %v3421_v37 = vld [vmem:[%s4474_s3 + $0x8] sm:$0xf] }
  0xb3   :  { %3073 = vmatmul.mubr.msk.bf16.gmra.mrb[28].mxu0 %vm324_vm3, %v3063_v53  ;;  %v2211_v53 = vshll.u32 %v3975_v11, 16  ;;  %v2178_v11 = vsel %vm3534_vm4, %v2173_v46, %v2177_v47  ;;  %v2245_v46 = vshll.u32 %v1858_v23, 16  ;;  %v2259_v47 = vshll.u32 %v1860_v54, 16 }
  0xb4   :  { %2416 = vmatprep.mubr.bf16.mxu0 %v3428_v1  ;;  %v3077_v0 = vcombine.low %v2164_v2, %v2178_v11  ;;  %v2201_v27 = vrot.slane %v2200_v58, 4  ;;  %v1862_v2 = vld [vmem:[%s4477_s5 + $0x64] sm:$0x1]  ;;  %v1864_v11 = vld [vmem:[%s4477_s5 + $0x6c] sm:$0x1] }
  0xb5   :  { %v2213_v33 = vrot.slane %v2211_v53, 5  ;;  %v2283_v53 = vrot.slane %v2281_v35, 5 }
  0xb6   :  { %v2206_v14 = vsel %vm3534_vm4, %v2201_v27, %v2205_v4  ;;  %v2287_v27 = vshll.u32 %v1864_v11, 16  ;;  %v2294_v4 = vrot.slane %v2292_v15, 4 }
  0xb7   :  { %v2214_v13 = vor.u32 %v2213_v33, %v2210_v60  ;;  %v2306_v60 = vshrl.u32 %v4053_v41, 16  ;;  %v2309_v33 = vshll.u32 %v4053_v41, 16 }
  0xb8   :  { %2994 = vmatmul.mubr.msk.bf16.gmra.mrb[16].mxu1 %vm324_vm3, %v3400_v3  ;;  %v2187_v3 = vrot.slane %v2186_v57, 4  ;;  %v2247_v57 = vrot.slane %v2245_v46, 5  ;;  %v2289_v7 = vrot.slane %v2287_v27, 5  ;;  %v925_v46 = vld [vmem:[%s4474_s3 + $0x58] sm:$0xf] }
  0xb9   :  { %840 = vmatprep.mubr.bf16.mxu1 %v3428_v1  ;;  %v2215_v24 = vrot.slane %v2214_v13, 4  ;;  %v2308_v48 = vrot.slane %v2306_v60, 4  ;;  %v922_v60 = vld [vmem:[%s4474_s3 + $0x4c] sm:$0x1] }
  0xba   :  { %v2192_v20 = vsel %vm3534_vm4, %v2187_v3, %v2191_v6  ;;  %v2273_v3 = vshll.u32 %v1862_v2, 16  ;;  %v2284_v6 = vor.u32 %v2283_v53, %v2280_v52 }
  0xbb   :  { %3085 = vmatmul.mubr.msk.bf16.vlgmr.msra.gmra.mrb[0].mxu0 %vm324_vm3, %v3075_v12  ;;  %v2253_v12 = vshll.u32 %v4003_v18, 16  ;;  %v2241_v18 = vrot.slane %v2239_v16, 5  ;;  %v3078_v49 = vcombine.low %v2192_v20, %v2206_v14  ;;  %v1868_v20 = vld [vmem:[%s4477_s5 + $0x7c] sm:$0x1]  ;;  %v3424_v14 = vld [vmem:[%s4474_s3 + $0x20] sm:$0xf] }
  0xbc   :  { %2627 = vmatpush1.bf16.msra.mxu0 %v2621_v21  ;;  %2426 = vmatprep.mubr.bf16.mxu0 %v3428_v1  ;;  %v2217_v21 = vshll.u32 %v1854_v43, 16  ;;  %v2297_v43 = vrot.slane %v2295_v28, 5  ;;  %v2275_v16 = vrot.slane %v2273_v3, 5  ;;  %v2285_v13 = vrot.slane %v2284_v6, 4  ;;  %v920_v28 = vld [vmem:[%s4474_s3 + $0x44] sm:$0x1] }
  0xbd   :  { %v2255_v39 = vrot.slane %v2253_v12, 5  ;;  %v2242_v44 = vor.u32 %v2241_v18, %v2238_v26  ;;  %v2311_v12 = vrot.slane %v2309_v33, 5  ;;  %v4281_v6 = vld [vmem:[%s4474_s3 + $0x78] sm:$0xf]  ;;  %v1283_v27 = vshll.u32 %v920_v28, 16 }
  0xbe   :  { %v2219_v61 = vrot.slane %v2217_v21, 5  ;;  %v3425_v21 = vld [vmem:[%s4474_s3 + $0x28] sm:$0xf]  ;;  %v2298_v18 = vor.u32 %v2297_v43, %v2294_v4  ;;  %v1297_v4 = vshll.u32 %v922_v60, 16 }
  0xbf   :  { %v2256_v45 = vor.u32 %v2255_v39, %v2252_v32  ;;  %v2243_v56 = vrot.slane %v2242_v44, 4  ;;  %v2290_v32 = vsel %vm3534_vm4, %v2285_v13, %v2289_v7  ;;  %v921_v44 = vld [vmem:[%s4474_s3 + $0x48] sm:$0xf]  ;;  %v926_v13 = vld [vmem:[%s4474_s3 + $0x5c] sm:$0x1] }
  0xc0   :  { %2995 = vmatmul.mubr.msk.bf16.gmra.mrb[20].mxu1 %vm324_vm3, %v3401_v17  ;;  %v2233_v17 = vrot.slane %v2231_v22, 5  ;;  %v2220_v30 = vsel %vm3534_vm4, %v2215_v24, %v2219_v61  ;;  %v3001_v22 = vcombine.low %v3424_v14, %v3425_v21  ;;  %v2315_v24 = vshll.u32 %v1868_v20, 16 }
  0xc1   :  { %850 = vmatprep.mubr.bf16.mxu1 %v3428_v1  ;;  %v2257_v58 = vrot.slane %v2256_v45, 4  ;;  %v2248_v38 = vsel %vm3534_vm4, %v2243_v56, %v2247_v57  ;;  %v1288_v53 = vshrl.u32 %v921_v44, 16  ;;  %v927_v56 = vld [vmem:[%s4474_s3 + $0x60] sm:$0xf]  ;;  %v929_v57 = vld [vmem:[%s4474_s3 + $0x68] sm:$0xf] }
  0xc2   :  { %v2234_v31 = vsel %vm3534_vm4, %v2229_v40, %v2233_v17  ;;  %v2299_v40 = vrot.slane %v2298_v18, 4  ;;  %v2317_v54 = vrot.slane %v2315_v24, 5  ;;  %v1285_v20 = vrot.slane %v1283_v27, 5 }
  0xc3   :  { %3086 = vmatmul.mubr.msk.bf16.gmra.mrb[4].mxu0 %vm324_vm3, %v3076_v42  ;;  %v2999_v42 = vcombine.low %v3420_v36, %v3421_v37  ;;  %v3079_v55 = vcombine.low %v2220_v30, %v2234_v31  ;;  %v3409_v30 = vld [vmem:[%s4478_s6] ss:$8 sps:$4 sm:$0xff]   ;;  %v923_v31 = vld [vmem:[%s4474_s3 + $0x50] sm:$0xf]  ;;  %v1290_v11 = vrot.slane %v1288_v53, 4  ;;  %v1299_v14 = vrot.slane %v1297_v4, 5 }
  0xc4   :  { %2436 = vmatprep.mubr.bf16.mxu0 %v3428_v1  ;;  %v1302_v33 = vshrl.u32 %v923_v31, 16  ;;  %v1330_v21 = vshrl.u32 %v927_v56, 16  ;;  %v1344_v24 = vshrl.u32 %v929_v57, 16 }
  0xc6   :  { %v1304_v43 = vrot.slane %v1302_v33, 4 }
  0xc8   :  { %2996 = vmatmul.mubr.msk.bf16.gmra.mrb[24].mxu1 %vm324_vm3, %v3402_v59  ;;  %v2261_v59 = vrot.slane %v2259_v47, 5  ;;  %v3004_v47 = vcombine.low %v923_v31, %v925_v46 }
  0xc9   :  { %860 = vmatprep.mubr.bf16.mxu1 %v3428_v1 }
  0xca   :  { %v2262_v41 = vsel %vm3534_vm4, %v2257_v58, %v2261_v59  ;;  %v3005_v58 = vcombine.low %v927_v56, %v929_v57 }
  0xcb   :  { %3087 = vmatmul.mubr.msk.bf16.gmra.mrb[8].mxu0 %vm324_vm3, %v3077_v0  ;;  %v2270_v0 = vor.u32 %v2269_v51, %v2266_v50  ;;  %v3080_v9 = vcombine.low %v2248_v38, %v2262_v41  ;;  %v3411_v50 = vld [vmem:[%s4478_s6 + $0x10] ss:$8 sps:$4 sm:$0xff]  }
  0xcc   :  { %2446 = vmatprep.mubr.bf16.mxu0 %v3428_v1  ;;  %v4276_v41 = vld [vmem:[%s4474_s3 + $0x70] sm:$0xf] }
  0xcd   :  { %v2271_v5 = vrot.slane %v2270_v0, 4  ;;  %v3413_v0 = vld [vmem:[%s4478_s6 + $0x20] ss:$8 sps:$4 sm:$0xff]   ;;  %v1358_v53 = vshrl.u32 %v4276_v41, 16 }
  0xcf   :  { %v2276_v26 = vsel %vm3534_vm4, %v2271_v5, %v2275_v16  ;;  %v1360_v28 = vrot.slane %v1358_v53, 4 }
  0xd0   :  { %2997 = vmatmul.mubr.msk.bf16.gmra.mrb[28].mxu1 %vm324_vm3, %v3403_v19  ;;  %v1866_v19 = vld [vmem:[%s4477_s5 + $0x74] sm:$0x1]  ;;  %v3081_v61 = vcombine.low %v2276_v26, %v2290_v32 }
  0xd1   :  { %1048 = vmatprep.mubr.bf16.mxu1 %v3428_v1  ;;  %v2301_v39 = vshll.u32 %v1866_v19, 16 }
  0xd3   :  { %3088 = vmatmul.mubr.msk.bf16.gmra.mrb[12].mxu0 %vm324_vm3, %v3078_v49  ;;  %v2312_v49 = vor.u32 %v2311_v12, %v2308_v48  ;;  %v2303_v17 = vrot.slane %v2301_v39, 5  ;;  %v3006_v48 = vcombine.low %v4276_v41, %v4281_v6  ;;  %v924_v12 = vld [vmem:[%s4474_s3 + $0x54] sm:$0x1]  ;;  %v1325_v39 = vshll.u32 %v926_v13, 16 }
  0xd4   :  { %2456 = vmatprep.mubr.bf16.mxu0 %v3428_v1  ;;  %v1311_v18 = vshll.u32 %v924_v12, 16  ;;  %v3418_v12 = vld [vmem:[%s4478_s6 + $0x60] ss:$8 sps:$4 sm:$0xff]  }
  0xd5   :  { %v2313_v23 = vrot.slane %v2312_v49, 4  ;;  %v2304_v35 = vsel %vm3534_vm4, %v2299_v40, %v2303_v17  ;;  %v1333_v49 = vshll.u32 %v927_v56, 16  ;;  %v1372_v56 = vshrl.u32 %v4281_v6, 16 }
  0xd6   :  { %v1313_v25 = vrot.slane %v1311_v18, 5 }
  0xd7   :  { %v2318_v36 = vsel %vm3534_vm4, %v2313_v23, %v2317_v54  ;;  %v1332_v23 = vrot.slane %v1330_v21, 4  ;;  %v1374_v33 = vrot.slane %v1372_v56, 4 }
  0xd8   :  { %3009 = vmatmul.mubr.msk.bf16.vlgmr.msra.gmra.mrb[0].mxu1 %vm324_vm3, %v2999_v42  ;;  %v3082_v37 = vcombine.low %v2304_v35, %v2318_v36  ;;  %v919_v42 = vld [vmem:[%s4474_s3 + $0x40] sm:$0xf]  ;;  %v1335_v35 = vrot.slane %v1333_v49, 5  ;;  %v1346_v36 = vrot.slane %v1344_v24, 4 }
  0xd9   :  { %3114 = vmatpush1.bf16.msra.mxu1 %v3492_v8  ;;  %1058 = vmatprep.mubr.bf16.mxu1 %v3428_v1  ;;  %v3422_v8 = vld [vmem:[%s4474_s3 + $0x10] sm:$0xf]  ;;  %v3003_v45 = vcombine.low %v919_v42, %v921_v44  ;;  %v1274_v51 = vshrl.u32 %v919_v42, 16  ;;  %v1277_v52 = vshll.u32 %v919_v42, 16 }
  0xda   :  { %v3000_v63 = vcombine.low %v3422_v8, %v3423_v62  ;;  %v1305_v8 = vshll.u32 %v923_v31, 16  ;;  %v1316_v62 = vshrl.u32 %v925_v46, 16 }
  0xdb   :  { %3089 = vmatmul.mubr.msk.bf16.gmra.mrb[16].mxu0 %vm324_vm3, %v3079_v55  ;;  %v1291_v55 = vshll.u32 %v921_v44, 16  ;;  %v1276_v59 = vrot.slane %v1274_v51, 4  ;;  %v1279_v2 = vrot.slane %v1277_v52, 5  ;;  %v928_v44 = vld [vmem:[%s4474_s3 + $0x64] sm:$0x1] }
  0xdc   :  { %2466 = vmatprep.mubr.bf16.mxu0 %v3428_v1  ;;  %v1318_v5 = vrot.slane %v1316_v62, 4  ;;  %v932_v62 = vld [vmem:[%s4474_s3 + $0x74] sm:$0x1] }
  0xdd   :  { %v1293_v15 = vrot.slane %v1291_v55, 5  ;;  %v1280_v3 = vor.u32 %v1279_v2, %v1276_v59  ;;  %v1361_v55 = vshll.u32 %v4276_v41, 16 }
  0xdf   :  { %v1294_v38 = vor.u32 %v1293_v15, %v1290_v11  ;;  %v1281_v7 = vrot.slane %v1280_v3, 4  ;;  %v1363_v60 = vrot.slane %v1361_v55, 5 }
  0xe0   :  { %3010 = vmatmul.mubr.msk.bf16.gmra.mrb[4].mxu1 %vm324_vm3, %v3000_v63  ;;  %v1319_v63 = vshll.u32 %v925_v46, 16 }
  0xe1   :  { %1068 = vmatprep.mubr.bf16.mxu1 %v3428_v1  ;;  %v1295_v19 = vrot.slane %v1294_v38, 4  ;;  %v1286_v40 = vsel %vm3534_vm4, %v1281_v7, %v1285_v20  ;;  %v1364_v41 = vor.u32 %v1363_v60, %v1360_v28  ;;  %v3419_v20 = vld [vmem:[%s4478_s6 + $0x70] ss:$8 sps:$4 sm:$0xff]  }
  0xe2   :  { %v1321_v16 = vrot.slane %v1319_v63, 5  ;;  %v934_v63 = vld [vmem:[%s4474_s3 + $0x7c] sm:$0x1] }
  0xe3   :  { %3090 = vmatmul.mubr.msk.bf16.gmra.mrb[20].mxu0 %vm324_vm3, %v3080_v9  ;;  %v1307_v9 = vrot.slane %v1305_v8, 5  ;;  %v1300_v17 = vsel %vm3534_vm4, %v1295_v19, %v1299_v14  ;;  %v1381_v4 = vshll.u32 %v934_v63, 16 }
  0xe4   :  { %2476 = vmatprep.mubr.bf16.mxu0 %v3428_v1  ;;  %v1322_v32 = vor.u32 %v1321_v16, %v1318_v5  ;;  %v3022_v42 = vcombine.low %v1286_v40, %v1300_v17 }
  0xe5   :  { %v1308_v26 = vor.u32 %v1307_v9, %v1304_v43  ;;  %v1365_v9 = vrot.slane %v1364_v41, 4 }
  0xe6   :  { %v1323_v34 = vrot.slane %v1322_v32, 4 }
  0xe7   :  { %v1309_v54 = vrot.slane %v1308_v26, 4 }
  0xe8   :  { %3011 = vmatmul.mubr.msk.bf16.gmra.mrb[8].mxu1 %vm324_vm3, %v3001_v22  ;;  %v3415_v22 = vld [vmem:[%s4478_s6 + $0x30] ss:$8 sps:$4 sm:$0xff]  }
  0xe9   :  { %1078 = vmatprep.mubr.bf16.mxu1 %v3428_v1  ;;  %v1314_v31 = vsel %vm3534_vm4, %v1309_v54, %v1313_v25 }
  0xeb   :  { %3091 = vmatmul.mubr.msk.bf16.gmra.mrb[24].mxu0 %vm324_vm3, %v3081_v61  ;;  %v1347_v61 = vshll.u32 %v929_v57, 16  ;;  %v1375_v57 = vshll.u32 %v4281_v6, 16  ;;  %v1367_v6 = vshll.u32 %v932_v62, 16 }
  0xec   :  { %2486 = vmatprep.mubr.bf16.mxu0 %v3428_v1 }
  0xed   :  { %v1377_v8 = vrot.slane %v1375_v57, 5  ;;  %v1369_v5 = vrot.slane %v1367_v6, 5 }
  0xef   :  { %v1378_v27 = vor.u32 %v1377_v8, %v1374_v33  ;;  %v1370_v13 = vsel %vm3534_vm4, %v1365_v9, %v1369_v5 }
  0xf0   :  { %3012 = vmatmul.mubr.msk.bf16.gmra.mrb[12].mxu1 %vm324_vm3, %v3002_v10  ;;  %v1327_v10 = vrot.slane %v1325_v39, 5 }
  0xf1   :  { %1088 = vmatprep.mubr.bf16.mxu1 %v3428_v1  ;;  %v1379_v16 = vrot.slane %v1378_v27, 4 }
  0xf2   :  { %v1328_v46 = vsel %vm3534_vm4, %v1323_v34, %v1327_v10 }
  0xf3   :  { %3092 = vmatmul.mubr.msk.bf16.gmra.mrb[28].mxu0 %vm324_vm3, %v3082_v37  ;;  %v1349_v37 = vrot.slane %v1347_v61, 5 }
  0xf4   :  { %2658 = vmatprep.mubr.bf16.mxu0 %v3428_v1 }
  0xf5   :  { %v1350_v51 = vor.u32 %v1349_v37, %v1346_v36 }
  0xf7   :  { %v1351_v11 = vrot.slane %v1350_v51, 4 }
  0xf8   :  { %3013 = vmatmul.mubr.msk.bf16.gmra.mrb[16].mxu1 %vm324_vm3, %v3003_v45  ;;  %v930_v45 = vld [vmem:[%s4474_s3 + $0x6c] sm:$0x1] }
  0xf9   :  { %1098 = vmatprep.mubr.bf16.mxu1 %v3428_v1  ;;  %v1353_v52 = vshll.u32 %v930_v45, 16 }
  0xfb   :  { %3104 = vmatmul.mubr.msk.bf16.vlgmr.msra.gmra.mrb[0].mxu0 %vm324_vm3, %v3409_v30  ;;  %v3416_v30 = vld [vmem:[%s4478_s6 + $0x40] ss:$8 sps:$4 sm:$0xff]   ;;  %v1355_v15 = vrot.slane %v1353_v52, 5 }
  0xfc   :  { %2668 = vmatprep.mubr.bf16.mxu0 %v3428_v1 }
  0xfd   :  { %v1356_v38 = vsel %vm3534_vm4, %v1351_v11, %v1355_v15 }
 0x100   :  { %3014 = vmatmul.mubr.msk.bf16.gmra.mrb[20].mxu1 %vm324_vm3, %v3004_v47  ;;  %v1336_v47 = vor.u32 %v1335_v35, %v1332_v23 }
 0x101   :  { %1108 = vmatprep.mubr.bf16.mxu1 %v3428_v1 }
 0x102   :  { %v1337_v59 = vrot.slane %v1336_v47, 4 }
 0x103   :  { %3105 = vmatmul.mubr.msk.bf16.gmra.mrb[4].mxu0 %vm324_vm3, %v3411_v50  ;;  %v1339_v50 = vshll.u32 %v928_v44, 16 }
 0x104   :  { %2678 = vmatprep.mubr.bf16.mxu0 %v3428_v1 }
 0x105   :  { %v1341_v2 = vrot.slane %v1339_v50, 5 }
 0x107   :  { %v1342_v3 = vsel %vm3534_vm4, %v1337_v59, %v1341_v2 }
 0x108   :  { %3015 = vmatmul.mubr.msk.bf16.gmra.mrb[24].mxu1 %vm324_vm3, %v3005_v58  ;;  %v3023_v58 = vcombine.low %v1314_v31, %v1328_v46  ;;  %v3024_v43 = vcombine.low %v1342_v3, %v1356_v38 }
 0x109   :  { %1118 = vmatprep.mubr.bf16.mxu1 %v3428_v1 }
 0x10b   :  { %3106 = vmatmul.mubr.msk.bf16.gmra.mrb[8].mxu0 %vm324_vm3, %v3413_v0  ;;  %v3417_v0 = vld [vmem:[%s4478_s6 + $0x50] ss:$8 sps:$4 sm:$0xff]  }
 0x10c   :  { %2688 = vmatprep.mubr.bf16.mxu0 %v3428_v1 }
 0x110   :  { %3016 = vmatmul.mubr.msk.bf16.gmra.mrb[28].mxu1 %vm324_vm3, %v3006_v48  ;;  %v1383_v48 = vrot.slane %v1381_v4, 5 }
 0x111   :  { %1522 = vmatprep.mubr.bf16.mxu1 %v3428_v1 }
 0x112   :  { %v1384_v7 = vsel %vm3534_vm4, %v1379_v16, %v1383_v48 }
 0x113   :  { %3107 = vmatmul.mubr.msk.bf16.gmra.mrb[12].mxu0 %vm324_vm3, %v3415_v22  ;;  %v3025_v19 = vcombine.low %v1370_v13, %v1384_v7 }
 0x114   :  { %2698 = vmatprep.mubr.bf16.mxu0 %v3428_v1 }
 0x118   :  { %3032 = vmatmul.mubr.msk.bf16.vlgmr.msra.gmra.mrb[16].mxu1 %vm324_vm3, %v3022_v42 }
 0x119   :  { %1532 = vmatprep.mubr.bf16.mxu1 %v3428_v1 }
 0x11b   :  { %3108 = vmatmul.mubr.msk.bf16.gmra.mrb[16].mxu0 %vm324_vm3, %v3416_v30 }
 0x11c   :  { %2708 = vmatprep.mubr.bf16.mxu0 %v3428_v1 }
 0x120   :  { %3033 = vmatmul.mubr.msk.bf16.gmra.mrb[20].mxu1 %vm324_vm3, %v3023_v58 }
 0x121   :  { %1542 = vmatprep.mubr.bf16.mxu1 %v3428_v1 }
 0x123   :  { %3109 = vmatmul.mubr.msk.bf16.gmra.mrb[20].mxu0 %vm324_vm3, %v3417_v0 }
 0x124   :  { %2718 = vmatprep.mubr.bf16.mxu0 %v3428_v1 }
 0x128   :  { %3034 = vmatmul.mubr.msk.bf16.gmra.mrb[24].mxu1 %vm324_vm3, %v3024_v43 }
 0x129   :  { %1552 = vmatprep.mubr.bf16.mxu1 %v3428_v1 }
 0x12b   :  { %3110 = vmatmul.mubr.msk.bf16.gmra.mrb[24].mxu0 %vm324_vm3, %v3418_v12 }
 0x12c   :  { %2728 = vmatprep.mubr.bf16.mxu0 %v3428_v1 }
 0x130   :  { %3035 = vmatmul.mubr.msk.bf16.gmra.mrb[28].mxu1 %vm324_vm3, %v3025_v19 }
 0x133   :  { %3111 = vmatmul.mubr.msk.bf16.gmra.mrb[28].mxu0 %vm324_vm3, %v3419_v20 }
 0x1ab   :  { %v1050_v14 = vpop.f32.mrb[0].mxu1 }
 0x1ac   :  { %v1052_v21 = vpop.f32.mrb[1].mxu1 }
 0x1ad   :  { %v1054_v22 = vpop.f32.mrb[2].mxu1 }
 0x1ae   :  { %v1056_v26 = vpop.f32.mrb[3].mxu1 }
 0x1b3   :  { %v1060_v18 = vpop.f32.mrb[4].mxu1 }
 0x1b4   :  { %v1062_v29 = vpop.f32.mrb[5].mxu1 }
 0x1b5   :  { %v1064_v32 = vpop.f32.mrb[6].mxu1 }
 0x1b6   :  { %v1066_v39 = vpop.f32.mrb[7].mxu1 }
 0x1bb   :  { %v1070_v49 = vpop.f32.mrb[8].mxu1 }
 0x1bc   :  { %v1072_v24 = vpop.f32.mrb[9].mxu1 }
 0x1bd   :  { %v1074_v1 = vpop.f32.mrb[10].mxu1 }
 0x1be   :  { %v4358_v61 = vpop.f32.mrb[11].mxu1 }
 0x1c3   :  { %v4360_v40 = vpop.f32.mrb[12].mxu1 }
 0x1c4   :  { %v4362_v17 = vpop.f32.mrb[13].mxu1 }
 0x1c5   :  { %v4364_v23 = vpop.f32.mrb[14].mxu1 }
 0x1c6   :  { %v4366_v54 = vpop.f32.mrb[15].mxu1 }
 0x1ce   :  { %v2660_v25 = vpop.f32.mrb[0].mxu0 }
 0x1cf   :  { %v3115_v34 = vadd.f32 %v2660_v25, %v1050_v14  ;;  %v2662_v10 = vpop.f32.mrb[1].mxu0 }
 0x1d0   :  { %v3116_v35 = vadd.f32 %v2662_v10, %v1052_v21  ;;  %v2664_v36 = vpop.f32.mrb[2].mxu0 }
 0x1d1   :  { %2771 = vst [vmem:[%s4479_s7] sm:$0xff] %v3115_v34  ;;  %v3117_v37 = vadd.f32 %v2664_v36, %v1054_v22  ;;  %v2666_v42 = vpop.f32.mrb[3].mxu0  ;;  %v2845_v45 = vmul.f32 %v3115_v34, %v3115_v34 }
 0x1d2   :  { %2772 = vst [vmem:[%s4479_s7 + $0x8] sm:$0xff] %v3116_v35  ;;  %v3118_v44 = vadd.f32 %v2666_v42, %v1056_v26  ;;  %v2846_v46 = vmul.f32 %v3116_v35, %v3116_v35 }
 0x1d3   :  { %2773 = vst [vmem:[%s4479_s7 + $0x10] sm:$0xff] %v3117_v37  ;;  %v2803_v30 = vadd.f32 %v3117_v37, %v3115_v34  ;;  %v2847_v31 = vmul.f32 %v3117_v37, %v3117_v37 }
 0x1d4   :  { %2774 = vst [vmem:[%s4479_s7 + $0x18] sm:$0xff] %v3118_v44  ;;  %v2824_v47 = vadd.f32 %v3118_v44, %v3116_v35  ;;  %v2848_v50 = vmul.f32 %v3118_v44, %v3118_v44 }
 0x1d5   :  { %v2877_v51 = vadd.f32 %v2847_v31, %v2845_v45 }
 0x1d6   :  { %v2898_v52 = vadd.f32 %v2848_v50, %v2846_v46  ;;  %v2670_v53 = vpop.f32.mrb[4].mxu0 }
 0x1d7   :  { %v3119_v55 = vadd.f32 %v2670_v53, %v1060_v18  ;;  %v2672_v56 = vpop.f32.mrb[5].mxu0 }
 0x1d8   :  { %v3120_v57 = vadd.f32 %v2672_v56, %v1062_v29  ;;  %v2674_v58 = vpop.f32.mrb[6].mxu0 }
 0x1d9   :  { %2775 = vst [vmem:[%s4479_s7 + $0x20] sm:$0xff] %v3119_v55  ;;  %v2804_v59 = vadd.f32 %v3119_v55, %v2803_v30  ;;  %v2849_v2 = vmul.f32 %v3119_v55, %v3119_v55  ;;  %v3121_v11 = vadd.f32 %v2674_v58, %v1064_v32  ;;  %v2676_v15 = vpop.f32.mrb[7].mxu0 }
 0x1da   :  { %2776 = vst [vmem:[%s4479_s7 + $0x28] sm:$0xff] %v3120_v57  ;;  %v2825_v28 = vadd.f32 %v3120_v57, %v2824_v47  ;;  %v2850_v60 = vmul.f32 %v3120_v57, %v3120_v57  ;;  %v3122_v33 = vadd.f32 %v2676_v15, %v1066_v39 }
 0x1db   :  { %v2878_v8 = vadd.f32 %v2877_v51, %v2849_v2  ;;  %2777 = vst [vmem:[%s4479_s7 + $0x30] sm:$0xff] %v3121_v11  ;;  %v2805_v62 = vadd.f32 %v3121_v11, %v2804_v59  ;;  %v2851_v63 = vmul.f32 %v3121_v11, %v3121_v11 }
 0x1dc   :  { %v2899_v0 = vadd.f32 %v2898_v52, %v2850_v60  ;;  %2778 = vst [vmem:[%s4479_s7 + $0x38] sm:$0xff] %v3122_v33  ;;  %v2826_v3 = vadd.f32 %v3122_v33, %v2825_v28  ;;  %v2852_v38 = vmul.f32 %v3122_v33, %v3122_v33 }
 0x1dd   :  { %v2879_v41 = vadd.f32 %v2878_v8, %v2851_v63 }
 0x1de   :  { %v2900_v6 = vadd.f32 %v2899_v0, %v2852_v38  ;;  %v2680_v27 = vpop.f32.mrb[8].mxu0 }
 0x1df   :  { %v3123_v4 = vadd.f32 %v2680_v27, %v1070_v49  ;;  %v2682_v43 = vpop.f32.mrb[9].mxu0 }
 0x1e0   :  { %v3124_v9 = vadd.f32 %v2682_v43, %v1072_v24  ;;  %v2684_v5 = vpop.f32.mrb[10].mxu0 }
 0x1e1   :  { %2779 = vst [vmem:[%s4479_s7 + $0x40] sm:$0xff] %v3123_v4  ;;  %v2806_v16 = vadd.f32 %v3123_v4, %v2805_v62  ;;  %v2853_v48 = vmul.f32 %v3123_v4, %v3123_v4  ;;  %v3125_v12 = vadd.f32 %v2684_v5, %v1074_v1  ;;  %v2686_v13 = vpop.f32.mrb[11].mxu0 }
 0x1e2   :  { %2780 = vst [vmem:[%s4479_s7 + $0x48] sm:$0xff] %v3124_v9  ;;  %v2827_v7 = vadd.f32 %v3124_v9, %v2826_v3  ;;  %v2854_v19 = vmul.f32 %v3124_v9, %v3124_v9  ;;  %v3126_v20 = vadd.f32 %v2686_v13, %v4358_v61 }
 0x1e3   :  { %v2880_v14 = vadd.f32 %v2879_v41, %v2853_v48  ;;  %2781 = vst [vmem:[%s4479_s7 + $0x50] sm:$0xff] %v3125_v12  ;;  %v2807_v21 = vadd.f32 %v3125_v12, %v2806_v16  ;;  %v2855_v22 = vmul.f32 %v3125_v12, %v3125_v12 }
 0x1e4   :  { %v2901_v26 = vadd.f32 %v2900_v6, %v2854_v19  ;;  %2782 = vst [vmem:[%s4479_s7 + $0x58] sm:$0xff] %v3126_v20  ;;  %v2828_v18 = vadd.f32 %v3126_v20, %v2827_v7  ;;  %v2856_v29 = vmul.f32 %v3126_v20, %v3126_v20 }
 0x1e5   :  { %v2881_v32 = vadd.f32 %v2880_v14, %v2855_v22 }
 0x1e6   :  { %v2902_v39 = vadd.f32 %v2901_v26, %v2856_v29  ;;  %v2690_v49 = vpop.f32.mrb[12].mxu0 }
 0x1e7   :  { %v3127_v24 = vadd.f32 %v2690_v49, %v4360_v40  ;;  %v2692_v1 = vpop.f32.mrb[13].mxu0 }
 0x1e8   :  { %v3128_v61 = vadd.f32 %v2692_v1, %v4362_v17  ;;  %v2694_v25 = vpop.f32.mrb[14].mxu0 }
 0x1e9   :  { %2783 = vst [vmem:[%s4479_s7 + $0x60] sm:$0xff] %v3127_v24  ;;  %v2808_v34 = vadd.f32 %v3127_v24, %v2807_v21  ;;  %v2857_v10 = vmul.f32 %v3127_v24, %v3127_v24  ;;  %v3129_v35 = vadd.f32 %v2694_v25, %v4364_v23  ;;  %v2696_v36 = vpop.f32.mrb[15].mxu0 }
 0x1ea   :  { %2784 = vst [vmem:[%s4479_s7 + $0x68] sm:$0xff] %v3128_v61  ;;  %v2829_v37 = vadd.f32 %v3128_v61, %v2828_v18  ;;  %v2858_v42 = vmul.f32 %v3128_v61, %v3128_v61  ;;  %v3130_v40 = vadd.f32 %v2696_v36, %v4366_v54 }
 0x1eb   :  { %v2882_v44 = vadd.f32 %v2881_v32, %v2857_v10  ;;  %2785 = vst [vmem:[%s4479_s7 + $0x70] sm:$0xff] %v3129_v35  ;;  %v2809_v17 = vadd.f32 %v3129_v35, %v2808_v34  ;;  %v2859_v45 = vmul.f32 %v3129_v35, %v3129_v35  ;;  %v1524_v30 = vpop.f32.mrb[16].mxu1 }
 0x1ec   :  { %v2903_v31 = vadd.f32 %v2902_v39, %v2858_v42  ;;  %2786 = vst [vmem:[%s4479_s7 + $0x78] sm:$0xff] %v3130_v40  ;;  %v2830_v23 = vadd.f32 %v3130_v40, %v2829_v37  ;;  %v2860_v46 = vmul.f32 %v3130_v40, %v3130_v40  ;;  %v1526_v47 = vpop.f32.mrb[17].mxu1 }
 0x1ed   :  { %v2883_v50 = vadd.f32 %v2882_v44, %v2859_v45  ;;  %v1528_v51 = vpop.f32.mrb[18].mxu1 }
 0x1ee   :  { %v2904_v52 = vadd.f32 %v2903_v31, %v2860_v46  ;;  %v2700_v54 = vpop.f32.mrb[16].mxu0  ;;  %v1530_v53 = vpop.f32.mrb[19].mxu1 }
 0x1ef   :  { %v3131_v55 = vadd.f32 %v2700_v54, %v1524_v30  ;;  %v2702_v56 = vpop.f32.mrb[17].mxu0 }
 0x1f0   :  { %v3132_v57 = vadd.f32 %v2702_v56, %v1526_v47  ;;  %v2704_v58 = vpop.f32.mrb[18].mxu0 }
 0x1f1   :  { %2787 = vst [vmem:[%s4479_s7 + $0x80] sm:$0xff] %v3131_v55  ;;  %v2810_v59 = vadd.f32 %v3131_v55, %v2809_v17  ;;  %v2861_v2 = vmul.f32 %v3131_v55, %v3131_v55  ;;  %v3133_v11 = vadd.f32 %v2704_v58, %v1528_v51  ;;  %v2706_v15 = vpop.f32.mrb[19].mxu0 }
 0x1f2   :  { %2788 = vst [vmem:[%s4479_s7 + $0x88] sm:$0xff] %v3132_v57  ;;  %v2831_v28 = vadd.f32 %v3132_v57, %v2830_v23  ;;  %v2862_v60 = vmul.f32 %v3132_v57, %v3132_v57  ;;  %v3134_v33 = vadd.f32 %v2706_v15, %v1530_v53 }
 0x1f3   :  { %v2884_v8 = vadd.f32 %v2883_v50, %v2861_v2  ;;  %2789 = vst [vmem:[%s4479_s7 + $0x90] sm:$0xff] %v3133_v11  ;;  %v2811_v62 = vadd.f32 %v3133_v11, %v2810_v59  ;;  %v2863_v63 = vmul.f32 %v3133_v11, %v3133_v11  ;;  %v1534_v0 = vpop.f32.mrb[20].mxu1 }
 0x1f4   :  { %v2905_v3 = vadd.f32 %v2904_v52, %v2862_v60  ;;  %2790 = vst [vmem:[%s4479_s7 + $0x98] sm:$0xff] %v3134_v33  ;;  %v2832_v38 = vadd.f32 %v3134_v33, %v2831_v28  ;;  %v2864_v41 = vmul.f32 %v3134_v33, %v3134_v33  ;;  %v1536_v6 = vpop.f32.mrb[21].mxu1 }
 0x1f5   :  { %v2885_v27 = vadd.f32 %v2884_v8, %v2863_v63  ;;  %v1538_v4 = vpop.f32.mrb[22].mxu1 }
 0x1f6   :  { %v2906_v43 = vadd.f32 %v2905_v3, %v2864_v41  ;;  %v2710_v9 = vpop.f32.mrb[20].mxu0  ;;  %v1540_v5 = vpop.f32.mrb[23].mxu1 }
 0x1f7   :  { %v3135_v16 = vadd.f32 %v2710_v9, %v1534_v0  ;;  %v2712_v48 = vpop.f32.mrb[21].mxu0 }
 0x1f8   :  { %v3136_v12 = vadd.f32 %v2712_v48, %v1536_v6  ;;  %v2714_v13 = vpop.f32.mrb[22].mxu0 }
 0x1f9   :  { %2791 = vst [vmem:[%s4479_s7 + $0xa0] sm:$0xff] %v3135_v16  ;;  %v2812_v7 = vadd.f32 %v3135_v16, %v2811_v62  ;;  %v2865_v19 = vmul.f32 %v3135_v16, %v3135_v16  ;;  %v3137_v20 = vadd.f32 %v2714_v13, %v1538_v4  ;;  %v2716_v14 = vpop.f32.mrb[23].mxu0 }
 0x1fa   :  { %2792 = vst [vmem:[%s4479_s7 + $0xa8] sm:$0xff] %v3136_v12  ;;  %v2833_v21 = vadd.f32 %v3136_v12, %v2832_v38  ;;  %v2866_v22 = vmul.f32 %v3136_v12, %v3136_v12  ;;  %v3138_v26 = vadd.f32 %v2716_v14, %v1540_v5 }
 0x1fb   :  { %v2886_v18 = vadd.f32 %v2885_v27, %v2865_v19  ;;  %2793 = vst [vmem:[%s4479_s7 + $0xb0] sm:$0xff] %v3137_v20  ;;  %v2813_v29 = vadd.f32 %v3137_v20, %v2812_v7  ;;  %v2867_v32 = vmul.f32 %v3137_v20, %v3137_v20  ;;  %v1544_v39 = vpop.f32.mrb[24].mxu1 }
 0x1fc   :  { %v2907_v49 = vadd.f32 %v2906_v43, %v2866_v22  ;;  %2794 = vst [vmem:[%s4479_s7 + $0xb8] sm:$0xff] %v3138_v26  ;;  %v2834_v24 = vadd.f32 %v3138_v26, %v2833_v21  ;;  %v2868_v1 = vmul.f32 %v3138_v26, %v3138_v26  ;;  %v1546_v61 = vpop.f32.mrb[25].mxu1 }
 0x1fd   :  { %v2887_v25 = vadd.f32 %v2886_v18, %v2867_v32  ;;  %v1548_v34 = vpop.f32.mrb[26].mxu1 }
 0x1fe   :  { %v2908_v10 = vadd.f32 %v2907_v49, %v2868_v1  ;;  %v2720_v35 = vpop.f32.mrb[24].mxu0  ;;  %v1550_v36 = vpop.f32.mrb[27].mxu1 }
 0x1ff   :  { %v3139_v37 = vadd.f32 %v2720_v35, %v1544_v39  ;;  %v2722_v42 = vpop.f32.mrb[25].mxu0 }
 0x200   :  { %v3140_v40 = vadd.f32 %v2722_v42, %v1546_v61  ;;  %v2724_v44 = vpop.f32.mrb[26].mxu0 }
 0x201   :  { %2795 = vst [vmem:[%s4479_s7 + $0xc0] sm:$0xff] %v3139_v37  ;;  %v2814_v17 = vadd.f32 %v3139_v37, %v2813_v29  ;;  %v2869_v45 = vmul.f32 %v3139_v37, %v3139_v37  ;;  %v3141_v30 = vadd.f32 %v2724_v44, %v1548_v34  ;;  %v2726_v31 = vpop.f32.mrb[27].mxu0 }
 0x202   :  { %2796 = vst [vmem:[%s4479_s7 + $0xc8] sm:$0xff] %v3140_v40  ;;  %v2835_v23 = vadd.f32 %v3140_v40, %v2834_v24  ;;  %v2870_v46 = vmul.f32 %v3140_v40, %v3140_v40  ;;  %v3142_v47 = vadd.f32 %v2726_v31, %v1550_v36 }
 0x203   :  { %v2888_v50 = vadd.f32 %v2887_v25, %v2869_v45  ;;  %2797 = vst [vmem:[%s4479_s7 + $0xd0] sm:$0xff] %v3141_v30  ;;  %v2815_v51 = vadd.f32 %v3141_v30, %v2814_v17  ;;  %v2871_v52 = vmul.f32 %v3141_v30, %v3141_v30  ;;  %v1554_v54 = vpop.f32.mrb[28].mxu1 }
 0x204   :  { %v2909_v53 = vadd.f32 %v2908_v10, %v2870_v46  ;;  %2798 = vst [vmem:[%s4479_s7 + $0xd8] sm:$0xff] %v3142_v47  ;;  %v2836_v55 = vadd.f32 %v3142_v47, %v2835_v23  ;;  %v2872_v56 = vmul.f32 %v3142_v47, %v3142_v47  ;;  %v1556_v57 = vpop.f32.mrb[29].mxu1 }
 0x205   :  { %v2889_v58 = vadd.f32 %v2888_v50, %v2871_v52  ;;  %v1558_v59 = vpop.f32.mrb[30].mxu1 }
 0x206   :  { %v2910_v2 = vadd.f32 %v2909_v53, %v2872_v56  ;;  %v2730_v11 = vpop.f32.mrb[28].mxu0  ;;  %v1560_v15 = vpop.f32.mrb[31].mxu1 }
 0x207   :  { %v3143_v28 = vadd.f32 %v2730_v11, %v1554_v54  ;;  %v2732_v60 = vpop.f32.mrb[29].mxu0 }
 0x208   :  { %v3144_v33 = vadd.f32 %v2732_v60, %v1556_v57  ;;  %v2734_v8 = vpop.f32.mrb[30].mxu0 }
 0x209   :  { %2799 = vst [vmem:[%s4479_s7 + $0xe0] sm:$0xff] %v3143_v28  ;;  %v2816_v62 = vadd.f32 %v3143_v28, %v2815_v51  ;;  %v2873_v63 = vmul.f32 %v3143_v28, %v3143_v28  ;;  %v3145_v0 = vadd.f32 %v2734_v8, %v1558_v59  ;;  %v2736_v3 = vpop.f32.mrb[31].mxu0 }
 0x20a   :  { %2800 = vst [vmem:[%s4479_s7 + $0xe8] sm:$0xff] %v3144_v33  ;;  %v2837_v38 = vadd.f32 %v3144_v33, %v2836_v55  ;;  %v2874_v41 = vmul.f32 %v3144_v33, %v3144_v33  ;;  %v3146_v6 = vadd.f32 %v2736_v3, %v1560_v15 }
 0x20b   :  { %v2890_v27 = vadd.f32 %v2889_v58, %v2873_v63  ;;  %2801 = vst [vmem:[%s4479_s7 + $0xf0] sm:$0xff] %v3145_v0  ;;  %v2817_v4 = vadd.f32 %v3145_v0, %v2816_v62  ;;  %v2875_v43 = vmul.f32 %v3145_v0, %v3145_v0 }
 0x20c   :  { %v2911_v9 = vadd.f32 %v2910_v2, %v2874_v41  ;;  %2802 = vst [vmem:[%s4479_s7 + $0xf8] sm:$0xff] %v3146_v6  ;;  %v2838_v5 = vadd.f32 %v3146_v6, %v2837_v38  ;;  %v2876_v16 = vmul.f32 %v3146_v6, %v3146_v6 }
 0x20d   :  { %v2818_v48 = vrot.slane %v2817_v4, 4  ;;  %v2891_v12 = vadd.f32 %v2890_v27, %v2875_v43 }
 0x20e   :  { %v2839_v13 = vrot.slane %v2838_v5, 4  ;;  %v2912_v7 = vadd.f32 %v2911_v9, %v2876_v16 }
 0x20f   :  { %v2819_v19 = vadd.f32 %v2818_v48, %v2817_v4  ;;  %v2892_v20 = vrot.slane %v2891_v12, 4 }
 0x210   :  { %v2840_v14 = vadd.f32 %v2839_v13, %v2838_v5  ;;  %v2913_v21 = vrot.slane %v2912_v7, 4 }
 0x211   :  { %v2820_v22 = vrot.slane %v2819_v19, 2  ;;  %v2893_v26 = vadd.f32 %v2892_v20, %v2891_v12 }
 0x212   :  { %v2841_v18 = vrot.slane %v2840_v14, 2  ;;  %v2914_v29 = vadd.f32 %v2913_v21, %v2912_v7 }
 0x213   :  { %v2821_v32 = vadd.f32 %v2820_v22, %v2819_v19  ;;  %v2894_v39 = vrot.slane %v2893_v26, 2 }
 0x214   :  { %v2842_v49 = vadd.f32 %v2841_v18, %v2840_v14  ;;  %v2915_v24 = vrot.slane %v2914_v29, 2 }
 0x215   :  { %v2822_v1 = vrot.slane %v2821_v32, 1  ;;  %v2895_v61 = vadd.f32 %v2894_v39, %v2893_v26 }
 0x216   :  { %v2843_v25 = vrot.slane %v2842_v49, 1  ;;  %v2916_v34 = vadd.f32 %v2915_v24, %v2914_v29 }
 0x217   :  { %v2896_v10 = vrot.slane %v2895_v61, 1  ;;  %v2823_v36 = vadd.f32 %v2822_v1, %v2821_v32 }
 0x218   :  { %v2917_v35 = vrot.slane %v2916_v34, 1  ;;  %v2844_v42 = vadd.f32 %v2843_v25, %v2842_v49 }
 0x219   :  { %v2897_v37 = vadd.f32 %v2896_v10, %v2895_v61 }
 0x21a   :  { %v2918_v40 = vadd.f32 %v2917_v35, %v2916_v34 }
 0x21b   :  { %v2920_v44 = vsel %vm2919_vm5, %v2823_v36, %v2897_v37 }
 0x21c   :  { %v2921_v17 = vsel %vm2919_vm5, %v2844_v42, %v2918_v40 }
 0x21d   :  { %v2924_v45 = vcombine.low %v2920_v44, %v2921_v17 }
 0x21f   :  { %3112 = vst.sshfl [vmem:[%s4480_s8] sm:$0x33 pattern:$0x76325410] %v2924_v45 }

// kernel: basic_block_forward.6
= control target key start
LH: loop header
LB: loop body
LE: loop exit
PB: predicated region body
PF: predicated region fallthrough
CT: control target
= control target key end

     0   :  { %vm68_vm0 = vsmask.f32 3328  ;;  %vm69_vm1 = vsmask.f32 7440  ;;  %vm698_vm3 = vcmask 1042432   ;;  %vm699_vm4 = vcmask 1046532   ;;  %s5542_s0 = inlined_call_operand.vmem [shape: bf16[9,128,128], index: 0, kind: input, shape index: {}]   ;;  %s5543_s1 = inlined_call_operand.vmem [shape: bf16[16,10,128], index: 1, kind: input, shape index: {}]   ;;  %s5544_s2 = inlined_call_operand.vmem [shape: bf16[16,10,128], index: 2, kind: input, shape index: {}]   ;;  %s5545_s3 = inlined_call_operand.vmem [shape: bf16[16,10,128], index: 3, kind: input, shape index: {}]   ;;  %s5546_s4 = inlined_call_operand.vmem [shape: f32[128,128], index: 4, kind: output, shape index: {0}]   ;;  %s5547_s5 = inlined_call_operand.vmem [shape: f32[1,2,128], index: 5, kind: output, shape index: {1}]  }
   0x1   :  { %v3920_v0 = vld [vmem:[%s5542_s0 + $0x40] sm:$0xff]   ;;  %v3922_v2 = vld [vmem:[%s5542_s0 + $0x48] sm:$0xff]   ;;  %v3924_v4 = vld [vmem:[%s5542_s0 + $0x50] sm:$0xff]   ;;  %vm3013_vm6 = vcmask 1040384  }
   0x2   :  { %v3921_v1 = vld [vmem:[%s5542_s0 + $0x100] sm:$0xff]   ;;  %3488 = vmatprep.subr.bf16.mxu1 %v3920_v0  ;;  %v3923_v3 = vld [vmem:[%s5542_s0 + $0x108] sm:$0xff]   ;;  %v3925_v5 = vld [vmem:[%s5542_s0 + $0x110] sm:$0xff]  }
   0x3   :  { %3616 = vmatprep.subr.bf16.mxu0 %v3921_v1  ;;  %3489 = vmatpush3.bf16.msra.mxu1 %v3920_v0  ;;  %v3926_v6 = vld [vmem:[%s5542_s0 + $0x58] sm:$0xff]   ;;  %v3928_v8 = vld [vmem:[%s5542_s0 + $0x60] sm:$0xff]   ;;  %v3930_v10 = vld [vmem:[%s5542_s0 + $0x68] sm:$0xff]  }
   0x4   :  { %3617 = vmatpush3.bf16.msra.mxu0 %v3921_v1  ;;  %3490 = vmatprep.subr.bf16.mxu1 %v3922_v2  ;;  %v3927_v7 = vld [vmem:[%s5542_s0 + $0x118] sm:$0xff]   ;;  %v3929_v9 = vld [vmem:[%s5542_s0 + $0x120] sm:$0xff]   ;;  %v3931_v11 = vld [vmem:[%s5542_s0 + $0x128] sm:$0xff]  }
   0x5   :  { %3618 = vmatprep.subr.bf16.mxu0 %v3923_v3  ;;  %v4109_v12 = vld [vmem:[%s5543_s1] sm:$0xf]  ;;  %v21_v13 = vld [vmem:[%s5543_s1 + $0x4] sm:$0x1]  ;;  %v4117_v14 = vld [vmem:[%s5543_s1 + $0x8] sm:$0xf] }
   0x6   :  { %v23_v15 = vld [vmem:[%s5543_s1 + $0xc] sm:$0x1]  ;;  %v72_v16 = vshrl.u32 %v4109_v12, 16  ;;  %v75_v17 = vshll.u32 %v4109_v12, 16  ;;  %v81_v18 = vshll.u32 %v21_v13, 16  ;;  %v86_v19 = vshrl.u32 %v4117_v14, 16  ;;  %vm4157_vm2 = vmor %vm68_vm0, %vm69_vm1 }
   0x7   :  { %3491 = vmatpush3.bf16.msra.mxu1 %v3922_v2  ;;  %v3932_v20 = vld [vmem:[%s5542_s0 + $0x70] sm:$0xff]   ;;  %v89_v21 = vshll.u32 %v4117_v14, 16  ;;  %v95_v22 = vshll.u32 %v23_v15, 16  ;;  %v4132_v23 = vld [vmem:[%s5544_s2] sm:$0xf]  ;;  %v3934_v44 = vld [vmem:[%s5542_s0 + $0x78] sm:$0xff]  }
   0x8   :  { %3619 = vmatpush3.bf16.msra.mxu0 %v3923_v3  ;;  %3492 = vmatprep.subr.bf16.mxu1 %v3924_v4  ;;  %v74_v24 = vrot.slane %v72_v16, 4  ;;  %v77_v25 = vrot.slane %v75_v17, 5  ;;  %v83_v26 = vrot.slane %v81_v18, 5  ;;  %v88_v27 = vrot.slane %v86_v19, 4  ;;  %v4137_v28 = vld [vmem:[%s5544_s2 + $0x4] sm:$0x1]  ;;  %vm4646_vm5 = vmor %vm698_vm3, %vm699_vm4 }
   0x9   :  { %3620 = vmatprep.subr.bf16.mxu0 %v3925_v5  ;;  %v91_v29 = vrot.slane %v89_v21, 5  ;;  %v97_v30 = vrot.slane %v95_v22, 5  ;;  %v4142_v31 = vld [vmem:[%s5544_s2 + $0x8] sm:$0xf]  ;;  %v4147_v32 = vld [vmem:[%s5544_s2 + $0xc] sm:$0x1] }
   0xa   :  { %v3933_v33 = vld [vmem:[%s5542_s0 + $0x130] sm:$0xff]   ;;  %v78_v34 = vor.u32 %v77_v25, %v74_v24  ;;  %v1234_v35 = vshrl.u32 %v4132_v23, 16  ;;  %v1237_v36 = vshll.u32 %v4132_v23, 16  ;;  %v1243_v37 = vshll.u32 %v4137_v28, 16  ;;  %v3935_v49 = vld [vmem:[%s5542_s0 + $0x138] sm:$0xff]   ;;  %v4195_v63 = vld [vmem:[%s5542_s0] sm:$0xff]  }
   0xb   :  { %3493 = vmatpush3.bf16.msra.mxu1 %v3924_v4  ;;  %v92_v39 = vor.u32 %v91_v29, %v88_v27  ;;  %v1248_v40 = vshrl.u32 %v4142_v31, 16  ;;  %v1251_v41 = vshll.u32 %v4142_v31, 16  ;;  %v1257_v42 = vshll.u32 %v4147_v32, 16  ;;  %v4167_v43 = vld [vmem:[%s5543_s1 + $0x10] sm:$0xf] }
   0xc   :  { %3621 = vmatpush3.bf16.msra.mxu0 %v3925_v5  ;;  %3494 = vmatprep.subr.bf16.mxu1 %v3926_v6  ;;  %v79_v45 = vrot.slane %v78_v34, 4  ;;  %v1236_v46 = vrot.slane %v1234_v35, 4  ;;  %v1239_v47 = vrot.slane %v1237_v36, 5  ;;  %v25_v48 = vld [vmem:[%s5543_s1 + $0x14] sm:$0x1]  ;;  %v1245_v56 = vrot.slane %v1243_v37, 5 }
   0xd   :  { %3622 = vmatprep.subr.bf16.mxu0 %v3927_v7  ;;  %v93_v50 = vrot.slane %v92_v39, 4  ;;  %v1250_v51 = vrot.slane %v1248_v40, 4  ;;  %v1253_v52 = vrot.slane %v1251_v41, 5  ;;  %v4181_v53 = vld [vmem:[%s5543_s1 + $0x18] sm:$0xf]  ;;  %v1259_v57 = vrot.slane %v1257_v42, 5 }
   0xe   :  { %v84_v54 = vsel %vm4157_vm2, %v79_v45, %v83_v26  ;;  %v1240_v55 = vor.u32 %v1239_v47, %v1236_v46  ;;  %v27_v60 = vld [vmem:[%s5543_s1 + $0x1c] sm:$0x1]  ;;  %v100_v61 = vshrl.u32 %v4167_v43, 16  ;;  %v103_v62 = vshll.u32 %v4167_v43, 16  ;;  %v4200_v0 = vld [vmem:[%s5544_s2 + $0x10] sm:$0xf] }
   0xf   :  { %3495 = vmatpush3.bf16.msra.mxu1 %v3926_v6  ;;  %v98_v58 = vsel %vm4157_vm2, %v93_v50, %v97_v30  ;;  %v1254_v59 = vor.u32 %v1253_v52, %v1250_v51  ;;  %v109_v3 = vshll.u32 %v25_v48, 16  ;;  %v114_v4 = vshrl.u32 %v4181_v53, 16  ;;  %v4206_v5 = vld [vmem:[%s5544_s2 + $0x14] sm:$0x1]  ;;  %v4211_v6 = vld [vmem:[%s5542_s0 + $0x140] sm:$0xff]  }
  0x10   :  { %3623 = vmatpush3.bf16.msra.mxu0 %v3927_v7  ;;  %3496 = vmatprep.subr.bf16.mxu1 %v3928_v8  ;;  %v3040_v1 = vcombine.low %v84_v54, %v98_v58  ;;  %v1241_v2 = vrot.slane %v1240_v55, 4  ;;  %v123_v16 = vshll.u32 %v27_v60, 16  ;;  %v4224_v17 = vld [vmem:[%s5544_s2 + $0x1c] sm:$0x1]  ;;  %v1262_v27 = vshrl.u32 %v4200_v0, 16  ;;  %v3938_v60 = vld [vmem:[%s5542_s0 + $0x8] sm:$0xff]  }
  0x11   :  { %3624 = vmatprep.subr.bf16.mxu0 %v3929_v9  ;;  %v1255_v7 = vrot.slane %v1254_v59, 4  ;;  %v116_v15 = vrot.slane %v114_v4, 4  ;;  %v111_v21 = vrot.slane %v109_v3, 5  ;;  %v1271_v34 = vshll.u32 %v4206_v5, 16  ;;  %v4245_v45 = vld [vmem:[%s5543_s1 + $0x20] sm:$0xf] }
  0x12   :  { %3504 = vmatprep.mubr.bf16.mxu1 %v3040_v1  ;;  %v1246_v13 = vsel %vm4157_vm2, %v1241_v2, %v1245_v56  ;;  %v125_v26 = vrot.slane %v123_v16, 5  ;;  %v1264_v35 = vrot.slane %v1262_v27, 4  ;;  %v1285_v39 = vshll.u32 %v4224_v17, 16  ;;  %v29_v50 = vld [vmem:[%s5543_s1 + $0x24] sm:$0x1] }
  0x13   :  { %3497 = vmatpush3.bf16.msra.mxu1 %v3928_v8  ;;  %v102_v8 = vrot.slane %v100_v61, 4  ;;  %v1260_v19 = vsel %vm4157_vm2, %v1255_v7, %v1259_v57  ;;  %v1273_v46 = vrot.slane %v1271_v34, 5  ;;  %v4256_v55 = vld [vmem:[%s5543_s1 + $0x28] sm:$0xf]  ;;  %v31_v56 = vld [vmem:[%s5543_s1 + $0x2c] sm:$0x1] }
  0x14   :  { %3625 = vmatpush3.bf16.msra.mxu0 %v3929_v9  ;;  %3498 = vmatprep.subr.bf16.mxu1 %v3930_v10  ;;  %v105_v9 = vrot.slane %v103_v62, 5  ;;  %v3168_v24 = vcombine.low %v1246_v13, %v1260_v19  ;;  %v128_v57 = vshrl.u32 %v4245_v45, 16  ;;  %v131_v61 = vshll.u32 %v4245_v45, 16  ;;  %v4269_v1 = vld [vmem:[%s5544_s2 + $0x20] sm:$0xf]  ;;  %v3939_v19 = vld [vmem:[%s5542_s0 + $0x148] sm:$0xff]  }
  0x15   :  { %3626 = vmatprep.subr.bf16.mxu0 %v3931_v11  ;;  %v137_v62 = vshll.u32 %v29_v50, 16  ;;  %v142_v4 = vshrl.u32 %v4256_v55, 16  ;;  %v145_v7 = vshll.u32 %v4256_v55, 16  ;;  %v151_v13 = vshll.u32 %v31_v56, 16  ;;  %v4304_v34 = vld [vmem:[%s5543_s1 + $0x30] sm:$0xf] }
  0x16   :  { %3632 = vmatprep.mubr.bf16.mxu0 %v3168_v24  ;;  %v130_v3 = vrot.slane %v128_v57, 4  ;;  %v1290_v24 = vshrl.u32 %v4269_v1, 16  ;;  %v3941_v56 = vld [vmem:[%s5542_s0 + $0x150] sm:$0xff]  }
  0x17   :  { %3499 = vmatpush3.bf16.msra.mxu1 %v3930_v10  ;;  %v117_v10 = vshll.u32 %v4181_v53, 16 }
  0x18   :  { %3627 = vmatpush3.bf16.msra.mxu0 %v3931_v11  ;;  %3500 = vmatprep.subr.bf16.mxu1 %v3932_v20  ;;  %v4217_v11 = vld [vmem:[%s5544_s2 + $0x18] sm:$0xf] }
  0x19   :  { %3628 = vmatprep.subr.bf16.mxu0 %v3933_v33  ;;  %v119_v22 = vrot.slane %v117_v10, 5  ;;  %v1276_v36 = vshrl.u32 %v4217_v11, 16  ;;  %v1279_v37 = vshll.u32 %v4217_v11, 16  ;;  %v139_v10 = vrot.slane %v137_v62, 5  ;;  %v4331_v62 = vld [vmem:[%s5544_s2 + $0x30] sm:$0xf] }
  0x1b   :  { %3501 = vmatpush3.bf16.msra.mxu1 %v3932_v20  ;;  %v106_v20 = vor.u32 %v105_v9, %v102_v8  ;;  %v120_v30 = vor.u32 %v119_v22, %v116_v15  ;;  %v1278_v47 = vrot.slane %v1276_v36, 4  ;;  %v1281_v48 = vrot.slane %v1279_v37, 5  ;;  %v4276_v15 = vld [vmem:[%s5544_s2 + $0x24] sm:$0x1]  ;;  %v4287_v22 = vld [vmem:[%s5544_s2 + $0x28] sm:$0xf] }
  0x1c   :  { %3629 = vmatpush3.bf16.msra.mxu0 %v3933_v33  ;;  %3502 = vmatprep.subr.bf16.mxu1 %v3934_v44  ;;  %v1265_v33 = vshll.u32 %v4200_v0, 16  ;;  %v133_v9 = vrot.slane %v131_v61, 5  ;;  %v1292_v37 = vrot.slane %v1290_v24, 4  ;;  %v35_v61 = vld [vmem:[%s5543_s1 + $0x3c] sm:$0x1] }
  0x1d   :  { %3630 = vmatprep.subr.bf16.mxu0 %v3935_v49  ;;  %v107_v29 = vrot.slane %v106_v20, 4  ;;  %v121_v42 = vrot.slane %v120_v30, 4  ;;  %v1282_v59 = vor.u32 %v1281_v48, %v1278_v47  ;;  %v144_v20 = vrot.slane %v142_v4, 4  ;;  %v4298_v30 = vld [vmem:[%s5544_s2 + $0x2c] sm:$0x1] }
  0x1e   :  { %v134_v27 = vor.u32 %v133_v9, %v130_v3  ;;  %v1307_v47 = vshll.u32 %v4287_v22, 16  ;;  %v1313_v50 = vshll.u32 %v4298_v30, 16  ;;  %v159_v4 = vshll.u32 %v4304_v34, 16 }
  0x1f   :  { %3503 = vmatpush3.bf16.msra.mxu1 %v3934_v44  ;;  %v112_v41 = vsel %vm4157_vm2, %v107_v29, %v111_v21  ;;  %v1267_v44 = vrot.slane %v1265_v33, 5  ;;  %v126_v51 = vsel %vm4157_vm2, %v121_v42, %v125_v26  ;;  %v1283_v8 = vrot.slane %v1282_v59, 4  ;;  %v3940_v26 = vld [vmem:[%s5542_s0 + $0x10] sm:$0xff]  }
  0x20   :  { %3631 = vmatpush3.bf16.msra.mxu0 %v3935_v49  ;;  %3520 = vmatprep.subr.bf16.mxu1 %v4195_v63  ;;  %v1287_v49 = vrot.slane %v1285_v39, 5  ;;  %v3041_v58 = vcombine.low %v112_v41, %v126_v51  ;;  %v147_v21 = vrot.slane %v145_v7, 5  ;;  %v153_v29 = vrot.slane %v151_v13, 5  ;;  %v33_v41 = vld [vmem:[%s5543_s1 + $0x34] sm:$0x1] }
  0x21   :  { %3648 = vmatprep.subr.bf16.mxu0 %v4211_v6  ;;  %v1268_v52 = vor.u32 %v1267_v44, %v1264_v35  ;;  %v1293_v33 = vshll.u32 %v4269_v1, 16  ;;  %v1299_v39 = vshll.u32 %v4276_v15, 16  ;;  %v135_v42 = vrot.slane %v134_v27, 4  ;;  %v4316_v51 = vld [vmem:[%s5543_s1 + $0x38] sm:$0xf] }
  0x22   :  { %3505 = vmatmul.mubr.bf16.vlgmr.msra.gmra.mrb[0].mxu1 %v3041_v58  ;;  %v148_v36 = vor.u32 %v147_v21, %v144_v20  ;;  %v4339_v7 = vld [vmem:[%s5544_s2 + $0x34] sm:$0x1]  ;;  %v4347_v20 = vld [vmem:[%s5544_s2 + $0x38] sm:$0xf]  ;;  %v161_v21 = vrot.slane %v159_v4, 5  ;;  %v170_v24 = vshrl.u32 %v4316_v51, 16 }
  0x23   :  { %v1269_v2 = vrot.slane %v1268_v52, 4  ;;  %3521 = vmatpush3.bf16.msra.mxu1 %v4195_v63  ;;  %v1288_v63 = vsel %vm4157_vm2, %v1283_v8, %v1287_v49  ;;  %v1295_v44 = vrot.slane %v1293_v33, 5  ;;  %v1301_v49 = vrot.slane %v1299_v39, 5  ;;  %v3942_v8 = vld [vmem:[%s5542_s0 + $0x18] sm:$0xff]   ;;  %v3944_v39 = vld [vmem:[%s5542_s0 + $0x20] sm:$0xff]  }
  0x24   :  { %3522 = vmatprep.subr.bf16.mxu1 %v3938_v60  ;;  %v149_v48 = vrot.slane %v148_v36, 4  ;;  %v156_v52 = vshrl.u32 %v4304_v34, 16  ;;  %v140_v57 = vsel %vm4157_vm2, %v135_v42, %v139_v10  ;;  %v179_v27 = vshll.u32 %v35_v61, 16  ;;  %v4381_v61 = vld [vmem:[%s5543_s1 + $0x44] sm:$0x1] }
  0x25   :  { %v1274_v16 = vsel %vm4157_vm2, %v1269_v2, %v1273_v46  ;;  %v1304_v46 = vshrl.u32 %v4287_v22, 16  ;;  %v1296_v58 = vor.u32 %v1295_v44, %v1292_v37  ;;  %v1315_v2 = vrot.slane %v1313_v50, 5  ;;  %v3946_v50 = vld [vmem:[%s5542_s0 + $0x28] sm:$0xff]   ;;  %5587 = vst [vmem:[#allocation2_spill] sm:$0xff] %v4381_v61 }
  0x26   :  { %v3169_v35 = vcombine.low %v1274_v16, %v1288_v63  ;;  %v158_v3 = vrot.slane %v156_v52, 4  ;;  %v165_v16 = vshll.u32 %v33_v41, 16  ;;  %v173_v63 = vshll.u32 %v4316_v51, 16 }
  0x27   :  { %3523 = vmatpush3.bf16.msra.mxu1 %v3938_v60  ;;  %v1306_v59 = vrot.slane %v1304_v46, 4  ;;  %v1309_v60 = vrot.slane %v1307_v47, 5  ;;  %v1297_v10 = vrot.slane %v1296_v58, 4  ;;  %v1318_v37 = vshrl.u32 %v4331_v62, 16 }
  0x28   :  { %3633 = vmatmul.mubr.bf16.vlgmr.msra.gmra.mrb[0].mxu0 %v3169_v35  ;;  %3524 = vmatprep.subr.bf16.mxu1 %v3940_v26  ;;  %v167_v36 = vrot.slane %v165_v16, 5  ;;  %v162_v41 = vor.u32 %v161_v21, %v158_v3  ;;  %v172_v42 = vrot.slane %v170_v24, 4  ;;  %v175_v44 = vrot.slane %v173_v63, 5  ;;  %v3945_v21 = vld [vmem:[%s5542_s0 + $0x160] sm:$0xff]  }
  0x29   :  { %3649 = vmatpush3.bf16.msra.mxu0 %v4211_v6  ;;  %v154_v6 = vsel %vm4157_vm2, %v149_v48, %v153_v29  ;;  %v1310_v13 = vor.u32 %v1309_v60, %v1306_v59  ;;  %v4354_v29 = vld [vmem:[%s5544_s2 + $0x3c] sm:$0x1]  ;;  %v1302_v33 = vsel %vm4157_vm2, %v1297_v10, %v1301_v49  ;;  %v181_v46 = vrot.slane %v179_v27, 5  ;;  %v4376_v60 = vld [vmem:[%s5543_s1 + $0x40] sm:$0xf] }
  0x2a   :  { %3650 = vmatprep.subr.bf16.mxu0 %v3939_v19  ;;  %v3042_v9 = vcombine.low %v140_v57, %v154_v6  ;;  %v1320_v47 = vrot.slane %v1318_v37, 4  ;;  %v1321_v48 = vshll.u32 %v4331_v62, 16  ;;  %v1327_v49 = vshll.u32 %v4339_v7, 16  ;;  %v4399_v27 = vld [vmem:[%s5543_s1 + $0x4c] sm:$0x1] }
  0x2b   :  { %3525 = vmatpush3.bf16.msra.mxu1 %v3940_v26  ;;  %v1311_v35 = vrot.slane %v1310_v13, 4  ;;  %v163_v57 = vrot.slane %v162_v41, 4  ;;  %v176_v58 = vor.u32 %v175_v44, %v172_v42  ;;  %v1332_v59 = vshrl.u32 %v4347_v20, 16  ;;  %5588 = vst [vmem:[#allocation3_spill] sm:$0xff] %v4399_v27  ;;  %v4409_v42 = vld [vmem:[%s5544_s2 + $0x40] sm:$0xf] }
  0x2c   :  { %3508 = vmatprep.mubr.bf16.mxu1 %v3042_v9  ;;  %3526 = vmatprep.subr.bf16.mxu1 %v3942_v8  ;;  %v1323_v6 = vrot.slane %v1321_v48, 5  ;;  %v1335_v3 = vshll.u32 %v4347_v20, 16  ;;  %v1341_v4 = vshll.u32 %v4354_v29, 16  ;;  %v184_v16 = vshrl.u32 %v4376_v60, 16 }
  0x2d   :  { %3651 = vmatpush3.bf16.msra.mxu0 %v3939_v19  ;;  %v3943_v19 = vld [vmem:[%s5542_s0 + $0x158] sm:$0xff]   ;;  %v1316_v26 = vsel %vm4157_vm2, %v1311_v35, %v1315_v2  ;;  %v1329_v2 = vrot.slane %v1327_v49, 5  ;;  %v168_v9 = vsel %vm4157_vm2, %v163_v57, %v167_v36  ;;  %v177_v10 = vrot.slane %v176_v58, 4  ;;  %v3947_v49 = vld [vmem:[%s5542_s0 + $0x168] sm:$0xff]  }
  0x2e   :  { %3652 = vmatprep.subr.bf16.mxu0 %v3941_v56  ;;  %v3170_v52 = vcombine.low %v1302_v33, %v1316_v26  ;;  %v1334_v13 = vrot.slane %v1332_v59, 4  ;;  %v1337_v24 = vrot.slane %v1335_v3, 5  ;;  %v1343_v63 = vrot.slane %v1341_v4, 5  ;;  %v4427_v59 = vld [vmem:[%s5544_s2 + $0x48] sm:$0xf] }
  0x2f   :  { %3527 = vmatpush3.bf16.msra.mxu1 %v3942_v8  ;;  %v4388_v8 = vld [vmem:[%s5543_s1 + $0x48] sm:$0xf]  ;;  %v187_v33 = vshll.u32 %v4376_v60, 16  ;;  %v182_v35 = vsel %vm4157_vm2, %v177_v10, %v181_v46  ;;  %v186_v36 = vrot.slane %v184_v16, 4  ;;  %v193_v37 = vshll.u32 %v4381_v61, 16 }
  0x30   :  { %3528 = vmatprep.subr.bf16.mxu1 %v3944_v39  ;;  %3636 = vmatprep.mubr.bf16.mxu0 %v3170_v52  ;;  %v198_v41 = vshrl.u32 %v4388_v8, 16  ;;  %v3043_v44 = vcombine.low %v168_v9, %v182_v35  ;;  %v4414_v46 = vld [vmem:[%s5544_s2 + $0x44] sm:$0x1]  ;;  %v3948_v52 = vld [vmem:[%s5542_s0 + $0x30] sm:$0xff]   ;;  %v201_v58 = vshll.u32 %v4388_v8, 16  ;;  %v1346_v10 = vshrl.u32 %v4409_v42, 16 }
  0x31   :  { %3653 = vmatpush3.bf16.msra.mxu0 %v3941_v56  ;;  %v1324_v56 = vor.u32 %v1323_v6, %v1320_v47  ;;  %v1338_v47 = vor.u32 %v1337_v24, %v1334_v13  ;;  %v189_v48 = vrot.slane %v187_v33, 5  ;;  %v4434_v9 = vld [vmem:[%s5544_s2 + $0x4c] sm:$0x1]  ;;  %v4440_v13 = vld [vmem:[%s5543_s1 + $0x50] sm:$0xf]  ;;  %v1349_v24 = vshll.u32 %v4409_v42, 16 }
  0x32   :  { %3654 = vmatprep.subr.bf16.mxu0 %v3943_v19  ;;  %v200_v57 = vrot.slane %v198_v41, 4  ;;  %3509 = vmatmul.mubr.bf16.gmra.mrb[4].mxu1 %v3043_v44  ;;  %5589 = vst [vmem:[#allocation4_spill] sm:$0xff] %v4440_v13  ;;  %v203_v16 = vrot.slane %v201_v58, 5  ;;  %v4447_v33 = vld [vmem:[%s5543_s1 + $0x54] sm:$0x1]  ;;  %v1348_v41 = vrot.slane %v1346_v10, 4 }
  0x33   :  { %3529 = vmatpush3.bf16.msra.mxu1 %v3944_v39  ;;  %v1325_v26 = vrot.slane %v1324_v56, 4  ;;  %v195_v39 = vrot.slane %v193_v37, 5  ;;  %v1339_v3 = vrot.slane %v1338_v47, 4  ;;  %v190_v4 = vor.u32 %v189_v48, %v186_v36  ;;  %5590 = vst [vmem:[#allocation5_spill] sm:$0xff] %v4447_v33  ;;  %v3949_v35 = vld [vmem:[%s5542_s0 + $0x170] sm:$0xff]  }
  0x34   :  { %3530 = vmatprep.subr.bf16.mxu1 %v3946_v50  ;;  %v1360_v44 = vshrl.u32 %v4427_v59, 16  ;;  %v204_v48 = vor.u32 %v203_v16, %v200_v57  ;;  %v4470_v57 = vld [vmem:[%s5543_s1 + $0x5c] sm:$0x1]  ;;  %v212_v16 = vshrl.u32 %v4440_v13, 16 }
  0x35   :  { %3655 = vmatpush3.bf16.msra.mxu0 %v3943_v19  ;;  %v207_v19 = vshll.u32 %v4399_v27, 16  ;;  %v1330_v6 = vsel %vm4157_vm2, %v1325_v26, %v1329_v2  ;;  %v1355_v2 = vshll.u32 %v4414_v46, 16  ;;  %v1344_v36 = vsel %vm4157_vm2, %v1339_v3, %v1343_v63  ;;  %v3950_v26 = vld [vmem:[%s5542_s0 + $0x38] sm:$0xff]   ;;  %5592 = vst [vmem:[#allocation7_spill] sm:$0xff] %v4470_v57 }
  0x36   :  { %3656 = vmatprep.subr.bf16.mxu0 %v3945_v21  ;;  %v191_v37 = vrot.slane %v190_v4, 4  ;;  %v3171_v47 = vcombine.low %v1330_v6, %v1344_v36  ;;  %v1362_v3 = vrot.slane %v1360_v44, 4  ;;  %v1369_v4 = vshll.u32 %v4434_v9, 16  ;;  %v3951_v36 = vld [vmem:[%s5542_s0 + $0x178] sm:$0xff]  }
  0x37   :  { %v209_v56 = vrot.slane %v207_v19, 5  ;;  %3531 = vmatpush3.bf16.msra.mxu1 %v3946_v50  ;;  %v1351_v50 = vrot.slane %v1349_v24, 5  ;;  %v1357_v58 = vrot.slane %v1355_v2, 5  ;;  %v4461_v19 = vld [vmem:[%s5543_s1 + $0x58] sm:$0xf]  ;;  %v205_v6 = vrot.slane %v204_v48, 4 }
  0x38   :  { %3532 = vmatprep.subr.bf16.mxu1 %v3948_v52  ;;  %5591 = vst [vmem:[#allocation6_spill] sm:$0xff] %v4461_v19  ;;  %v196_v63 = vsel %vm4157_vm2, %v191_v37, %v195_v39  ;;  %3637 = vmatmul.mubr.bf16.gmra.mrb[4].mxu0 %v3171_v47  ;;  %v215_v24 = vshll.u32 %v4440_v13, 16  ;;  %v4477_v39 = vld [vmem:[%s5544_s2 + $0x50] sm:$0xf]  ;;  %v4482_v2 = vld [vmem:[%s5544_s2 + $0x54] sm:$0x1] }
  0x39   :  { %3657 = vmatpush3.bf16.msra.mxu0 %v3945_v21  ;;  %v1363_v21 = vshll.u32 %v4427_v59, 16  ;;  %v1352_v10 = vor.u32 %v1351_v50, %v1348_v41  ;;  %v1371_v41 = vrot.slane %v1369_v4, 5  ;;  %v221_v44 = vshll.u32 %v4447_v33, 16  ;;  %v4492_v48 = vld [vmem:[%s5544_s2 + $0x58] sm:$0xf] }
  0x3a   :  { %3658 = vmatprep.subr.bf16.mxu0 %v3947_v49  ;;  %v226_v47 = vshrl.u32 %v4461_v19, 16  ;;  %5593 = vst [vmem:[#allocation8_spill] sm:$0xff] %v4492_v48  ;;  %v214_v18 = vrot.slane %v212_v16, 4  ;;  %v217_v54 = vrot.slane %v215_v24, 5  ;;  %v229_v33 = vshll.u32 %v4461_v19, 16 }
  0x3b   :  { %3533 = vmatpush3.bf16.msra.mxu1 %v3948_v52  ;;  %v1365_v37 = vrot.slane %v1363_v21, 5  ;;  %v210_v52 = vsel %vm4157_vm2, %v205_v6, %v209_v56  ;;  %v1353_v50 = vrot.slane %v1352_v10, 4  ;;  %v4499_v21 = vld [vmem:[%s5542_s0 + $0x80] sm:$0xff]   ;;  %v223_v25 = vrot.slane %v221_v44, 5  ;;  %v4508_v6 = vld [vmem:[%s5544_s2 + $0x5c] sm:$0x1] }
  0x3c   :  { %3534 = vmatprep.subr.bf16.mxu1 %v3950_v26  ;;  %v3044_v4 = vcombine.low %v196_v63, %v210_v52  ;;  %v228_v27 = vrot.slane %v226_v47, 4  ;;  %v218_v61 = vor.u32 %v217_v54, %v214_v18  ;;  %v235_v56 = vshll.u32 %v4470_v57, 16  ;;  %5594 = vst [vmem:[#allocation9_spill] sm:$0xff] %v4508_v6  ;;  %v4513_v63 = vld [vmem:[%s5542_s0 + $0x180] sm:$0xff]  }
  0x3d   :  { %3659 = vmatpush3.bf16.msra.mxu0 %v3947_v49  ;;  %v1366_v40 = vor.u32 %v1365_v37, %v1362_v3  ;;  %v1358_v49 = vsel %vm4157_vm2, %v1353_v50, %v1357_v58  ;;  %v1374_v58 = vshrl.u32 %v4477_v39, 16  ;;  %v1377_v18 = vshll.u32 %v4477_v39, 16 }
  0x3e   :  { %3660 = vmatprep.subr.bf16.mxu0 %v3949_v35  ;;  %3512 = vmatprep.mubr.bf16.mxu1 %v3044_v4  ;;  %v1383_v54 = vshll.u32 %v4482_v2, 16  ;;  %v219_v10 = vrot.slane %v218_v61, 4  ;;  %v231_v16 = vrot.slane %v229_v33, 5  ;;  %v237_v24 = vrot.slane %v235_v56, 5  ;;  %v4530_v61 = vld [vmem:[%s5543_s1 + $0x64] sm:$0x1] }
  0x3f   :  { %3535 = vmatpush3.bf16.msra.mxu1 %v3950_v26  ;;  %v1367_v3 = vrot.slane %v1366_v40, 4  ;;  %v1388_v37 = vshrl.u32 %v4492_v48, 16  ;;  %v4522_v26 = vld [vmem:[%s5543_s1 + $0x60] sm:$0xf]  ;;  %v1376_v44 = vrot.slane %v1374_v58, 4  ;;  %v1379_v47 = vrot.slane %v1377_v18, 5 }
  0x40   :  { %5595 = vst [vmem:[#allocation10_spill] sm:$0xff] %v4522_v26  ;;  %3552 = vmatprep.subr.bf16.mxu1 %v4499_v21  ;;  %v1385_v52 = vrot.slane %v1383_v54, 5  ;;  %5596 = vst [vmem:[#allocation11_spill] sm:$0xff] %v4530_v61  ;;  %v232_v50 = vor.u32 %v231_v16, %v228_v27  ;;  %v4537_v56 = vld [vmem:[%s5543_s1 + $0x68] sm:$0xf]  ;;  %v1397_v58 = vshll.u32 %v4508_v6, 16 }
  0x41   :  { %3661 = vmatpush3.bf16.msra.mxu0 %v3949_v35  ;;  %v1372_v40 = vsel %vm4157_vm2, %v1367_v3, %v1371_v41  ;;  %v224_v35 = vsel %vm4157_vm2, %v219_v10, %v223_v25  ;;  %v1390_v4 = vrot.slane %v1388_v37, 4  ;;  %5597 = vst [vmem:[#allocation12_spill] sm:$0xff] %v4537_v56  ;;  %v1380_v41 = vor.u32 %v1379_v47, %v1376_v44  ;;  %v4544_v18 = vld [vmem:[%s5543_s1 + $0x6c] sm:$0x1]  ;;  %v4553_v16 = vld [vmem:[%s5544_s2 + $0x60] sm:$0xf] }
  0x42   :  { %3662 = vmatprep.subr.bf16.mxu0 %v3951_v36  ;;  %v3172_v33 = vcombine.low %v1358_v49, %v1372_v40  ;;  %v1391_v3 = vshll.u32 %v4492_v48, 16  ;;  %5598 = vst [vmem:[#allocation13_spill] sm:$0xff] %v4544_v18  ;;  %v240_v49 = vshrl.u32 %v4522_v26, 16  ;;  %v233_v25 = vrot.slane %v232_v50, 4  ;;  %5599 = vst [vmem:[#allocation14_spill] sm:$0xff] %v4553_v16 }
  0x43   :  { %v243_v27 = vshll.u32 %v4522_v26, 16  ;;  %v249_v54 = vshll.u32 %v4530_v61, 16  ;;  %v254_v10 = vshrl.u32 %v4537_v56, 16  ;;  %v1381_v37 = vrot.slane %v1380_v41, 4  ;;  %v4566_v26 = vld [vmem:[%s5544_s2 + $0x68] sm:$0xf] }
  0x44   :  { %3640 = vmatprep.mubr.bf16.mxu0 %v3172_v33  ;;  %v1393_v40 = vrot.slane %v1391_v3, 5  ;;  %v1399_v44 = vrot.slane %v1397_v58, 5  ;;  %v242_v47 = vrot.slane %v240_v49, 4  ;;  %v238_v33 = vsel %vm4157_vm2, %v233_v25, %v237_v24  ;;  %5601 = vst [vmem:[#allocation16_spill] sm:$0xff] %v4566_v26  ;;  %v4575_v24 = vld [vmem:[%s5544_s2 + $0x6c] sm:$0x1] }
  0x45   :  { %3663 = vmatpush3.bf16.msra.mxu0 %v3951_v36  ;;  %v4559_v36 = vld [vmem:[%s5544_s2 + $0x64] sm:$0x1]  ;;  %v245_v50 = vrot.slane %v243_v27, 5  ;;  %v251_v61 = vrot.slane %v249_v54, 5  ;;  %v256_v57 = vrot.slane %v254_v10, 4  ;;  %v3045_v41 = vcombine.low %v224_v35, %v238_v33  ;;  %5602 = vst [vmem:[#allocation17_spill] sm:$0xff] %v4575_v24 }
  0x46   :  { %3680 = vmatprep.subr.bf16.mxu0 %v4513_v63  ;;  %5600 = vst [vmem:[#allocation15_spill] sm:$0xff] %v4559_v36  ;;  %v1386_v3 = vsel %vm4157_vm2, %v1381_v37, %v1385_v52  ;;  %v1394_v58 = vor.u32 %v1393_v40, %v1390_v4  ;;  %v257_v49 = vshll.u32 %v4537_v56, 16  ;;  %v263_v19 = vshll.u32 %v4544_v18, 16  ;;  %v4584_v10 = vld [vmem:[%s5543_s1 + $0x70] sm:$0xf] }
  0x47   :  { %v246_v13 = vor.u32 %v245_v50, %v242_v47  ;;  %v1402_v25 = vshrl.u32 %v4553_v16, 16  ;;  %v1405_v27 = vshll.u32 %v4553_v16, 16  ;;  %3513 = vmatmul.mubr.bf16.gmra.mrb[8].mxu1 %v3045_v41  ;;  %v1411_v52 = vshll.u32 %v4559_v36, 16  ;;  %5603 = vst [vmem:[#allocation18_spill] sm:$0xff] %v4584_v10  ;;  %v4591_v18 = vld [vmem:[%s5543_s1 + $0x78] sm:$0xf] }
  0x48   :  { %v1395_v35 = vrot.slane %v1394_v58, 4  ;;  %v259_v54 = vrot.slane %v257_v49, 5  ;;  %v1416_v4 = vshrl.u32 %v4566_v26, 16  ;;  %v265_v40 = vrot.slane %v263_v19, 5 }
  0x49   :  { %v247_v37 = vrot.slane %v246_v13, 4  ;;  %v1404_v47 = vrot.slane %v1402_v25, 4  ;;  %v1407_v33 = vrot.slane %v1405_v27, 5  ;;  %v1413_v58 = vrot.slane %v1411_v52, 5  ;;  %v4599_v27 = vld [vmem:[%s5543_s1 + $0x74] sm:$0x1] }
  0x4a   :  { %v1400_v50 = vsel %vm4157_vm2, %v1395_v35, %v1399_v44  ;;  %v260_v41 = vor.u32 %v259_v54, %v256_v57  ;;  %v1418_v49 = vrot.slane %v1416_v4, 4  ;;  %v1419_v25 = vshll.u32 %v4566_v26, 16  ;;  %5604 = vst [vmem:[#allocation19_spill] sm:$0xff] %v4599_v27  ;;  %v4604_v57 = vld [vmem:[%s5543_s1 + $0x7c] sm:$0x1] }
  0x4b   :  { %v3173_v56 = vcombine.low %v1386_v3, %v1400_v50  ;;  %v252_v13 = vsel %vm4157_vm2, %v247_v37, %v251_v61  ;;  %v1408_v19 = vor.u32 %v1407_v33, %v1404_v47  ;;  %5605 = vst [vmem:[#allocation20_spill] sm:$0xff] %v4604_v57  ;;  %v1425_v35 = vshll.u32 %v4575_v24, 16  ;;  %v4612_v54 = vld [vmem:[%s5544_s2 + $0x70] sm:$0xf]  ;;  %v4617_v52 = vld [vmem:[%s5544_s2 + $0x74] sm:$0x1] }
  0x4c   :  { %v261_v44 = vrot.slane %v260_v41, 4  ;;  %v268_v3 = vshrl.u32 %v4584_v10, 16  ;;  %v271_v61 = vshll.u32 %v4584_v10, 16  ;;  %v1697_v4 = vrot.slane %v4224_v17, 5  ;;  %v4624_v50 = vld [vmem:[%s5544_s2 + $0x78] sm:$0xf] }
  0x4d   :  { %3641 = vmatmul.mubr.bf16.gmra.mrb[8].mxu0 %v3173_v56  ;;  %v1409_v37 = vrot.slane %v1408_v19, 4  ;;  %v1421_v47 = vrot.slane %v1419_v25, 5  ;;  %v282_v33 = vshrl.u32 %v4591_v18, 16  ;;  %v277_v26 = vshll.u32 %v4599_v27, 16 }
  0x4e   :  { %v266_v41 = vsel %vm4157_vm2, %v261_v44, %v265_v40  ;;  %v270_v10 = vrot.slane %v268_v3, 4  ;;  %v273_v24 = vrot.slane %v271_v61, 5  ;;  %v1427_v19 = vrot.slane %v1425_v35, 5  ;;  %v4636_v40 = vld [vmem:[%s5544_s2 + $0x7c] sm:$0x1] }
  0x4f   :  { %v3046_v36 = vcombine.low %v252_v13, %v266_v41  ;;  %v1414_v17 = vsel %vm4157_vm2, %v1409_v37, %v1413_v58  ;;  %v1422_v56 = vor.u32 %v1421_v47, %v1418_v49  ;;  %v284_v16 = vrot.slane %v282_v33, 4 }
  0x50   :  { %v274_v25 = vor.u32 %v273_v24, %v270_v10  ;;  %v285_v6 = vshll.u32 %v4591_v18, 16  ;;  %v291_v48 = vshll.u32 %v4604_v57, 16  ;;  %v1430_v13 = vshrl.u32 %v4612_v54, 16 }
  0x51   :  { %3516 = vmatprep.mubr.bf16.mxu1 %v3046_v36  ;;  %v1423_v44 = vrot.slane %v1422_v56, 4  ;;  %v1433_v3 = vshll.u32 %v4612_v54, 16  ;;  %v1439_v58 = vshll.u32 %v4617_v52, 16  ;;  %v279_v24 = vrot.slane %v277_v26, 5 }
  0x52   :  { %v275_v49 = vrot.slane %v274_v25, 4  ;;  %v287_v10 = vrot.slane %v285_v6, 5  ;;  %v1444_v35 = vshrl.u32 %v4624_v50, 16  ;;  %v293_v37 = vrot.slane %v291_v48, 5 }
  0x53   :  { %v1428_v61 = vsel %vm4157_vm2, %v1423_v44, %v1427_v19  ;;  %v1432_v47 = vrot.slane %v1430_v13, 4  ;;  %v1435_v33 = vrot.slane %v1433_v3, 5  ;;  %v1441_v56 = vrot.slane %v1439_v58, 5 }
  0x54   :  { %v3174_v41 = vcombine.low %v1414_v17, %v1428_v61  ;;  %v288_v36 = vor.u32 %v287_v10, %v284_v16  ;;  %v1446_v57 = vrot.slane %v1444_v35, 4  ;;  %v1447_v6 = vshll.u32 %v4624_v50, 16 }
  0x55   :  { %v1436_v26 = vor.u32 %v1435_v33, %v1432_v47  ;;  %v1453_v25 = vshll.u32 %v4636_v40, 16  ;;  %v3184_v19 = vrot.slane %v4132_v23, 9  ;;  %v280_v48 = vsel %vm4157_vm2, %v275_v49, %v279_v24 }
  0x56   :  { %3644 = vmatprep.mubr.bf16.mxu0 %v3174_v41  ;;  %v289_v16 = vrot.slane %v288_v36, 4  ;;  %v3185_v17 = vrot.slane %v4142_v31, 9  ;;  %v3186_v44 = vrot.slane %v4200_v0, 9  ;;  %v1449_v3 = vrot.slane %v1447_v6, 5 }
  0x57   :  { %v1437_v13 = vrot.slane %v1436_v26, 4  ;;  %v1455_v58 = vrot.slane %v1453_v25, 5  ;;  %v5608_v10 = vrot.slane %v4137_v28, 5  ;;  %v5609_v61 = vrot.slane %v4147_v32, 5 }
  0x58   :  { %v294_v23 = vsel %vm4157_vm2, %v289_v16, %v293_v37  ;;  %v5610_v31 = vrot.slane %v4206_v5, 5  ;;  %v3187_v24 = vrot.slane %v4217_v11, 9  ;;  %v1450_v28 = vor.u32 %v1449_v3, %v1446_v57 }
  0x59   :  { %v1686_v35 = vsel %vm4646_vm5, %v3184_v19, %v5608_v10  ;;  %v1690_v49 = vsel %vm4646_vm5, %v3185_v17, %v5609_v61  ;;  %v3047_v47 = vcombine.low %v280_v48, %v294_v23  ;;  %v1442_v32 = vsel %vm4157_vm2, %v1437_v13, %v1441_v56  ;;  %v3957_v13 = vld [vmem:[%s5542_s0 + $0x188] sm:$0xff]   ;;  %v4021_v61 = vld [vmem:[%s5543_s1 + $0x1c] sm:$0x1] }
  0x5a   :  { %v1694_v0 = vsel %vm4646_vm5, %v3186_v44, %v5610_v31  ;;  %v3216_v33 = vcombine.low %v1686_v35, %v1690_v49  ;;  %v1698_v41 = vsel %vm4646_vm5, %v3187_v24, %v1697_v4  ;;  %v1451_v37 = vrot.slane %v1450_v28, 4 }
  0x5b   :  { %3517 = vmatmul.mubr.bf16.gmra.mrb[12].mxu1 %v3047_v47  ;;  %v3217_v36 = vcombine.low %v1694_v0, %v1698_v41  ;;  %v5611_v5 = vcombine.low %v4109_v12, %v4117_v14  ;;  %v3188_v26 = vrot.slane %v4269_v1, 9  ;;  %v1701_v11 = vrot.slane %v4276_v15, 5  ;;  %v3956_v14 = vld [vmem:[%s5542_s0 + $0x88] sm:$0xff]   ;;  %v4016_v1 = vld [vmem:[%s5543_s1 + $0x4] sm:$0x1] }
  0x5c   :  { %v1456_v57 = vsel %vm4157_vm2, %v1451_v37, %v1455_v58  ;;  %v3189_v6 = vrot.slane %v4287_v22, 9  ;;  %v1705_v4 = vrot.slane %v4298_v30, 5  ;;  %v3057_v56 = vcombine.low %v4167_v43, %v4181_v53  ;;  %v4017_v22 = vld [vmem:[%s5543_s1 + $0xc] sm:$0x1]  ;;  %v4020_v58 = vld [vmem:[%s5543_s1 + $0x14] sm:$0x1] }
  0x5d   :  { %3536 = vmatprep.mubr.bf16.mxu1 %v5611_v5  ;;  %v3175_v25 = vcombine.low %v1442_v32, %v1456_v57  ;;  %v3058_v12 = vcombine.low %v4245_v45, %v4256_v55  ;;  %v703_v15 = vrot.slane %v4016_v1, 5  ;;  %v707_v30 = vrot.slane %v4017_v22, 5  ;;  %v4022_v47 = vld [vmem:[%s5543_s1 + $0x10] sm:$0xf]  ;;  %v4023_v32 = vld [vmem:[%s5543_s1 + $0x18] sm:$0xf] }
  0x5e   :  { %v1702_v43 = vsel %vm4646_vm5, %v3188_v26, %v1701_v11  ;;  %v1706_v53 = vsel %vm4646_vm5, %v3189_v6, %v1705_v4  ;;  %v3190_v45 = vrot.slane %v4331_v62, 9  ;;  %v1709_v55 = vrot.slane %v4339_v7, 5  ;;  %v3960_v62 = vld [vmem:[%s5542_s0 + $0x90] sm:$0xff]   ;;  %v5613_v4 = vld [vmem:[#allocation9_spill] sm:$0xff]  ;;  %v3966_v1 = vld [vmem:[%s5542_s0 + $0xa0] sm:$0xff]  }
  0x5f   :  { %3645 = vmatmul.mubr.bf16.gmra.mrb[12].mxu0 %v3175_v25  ;;  %v3191_v19 = vrot.slane %v4347_v20, 9  ;;  %v1713_v48 = vrot.slane %v4354_v29, 5  ;;  %v3218_v16 = vcombine.low %v1702_v43, %v1706_v53  ;;  %v3192_v17 = vrot.slane %v4409_v42, 9  ;;  %v4018_v29 = vld [vmem:[%s5543_s1] sm:$0xf]  ;;  %v5612_v57 = vld [vmem:[#allocation8_spill] sm:$0xff] }
  0x60   :  { %3664 = vmatprep.mubr.bf16.mxu0 %v3216_v33  ;;  %v1717_v44 = vrot.slane %v4414_v46, 5  ;;  %v3193_v7 = vrot.slane %v4427_v59, 9  ;;  %v1721_v20 = vrot.slane %v4434_v9, 5  ;;  %v4019_v46 = vld [vmem:[%s5543_s1 + $0x8] sm:$0xf]  ;;  %v711_v10 = vrot.slane %v4020_v58, 5 }
  0x61   :  { %v3073_v3 = vrot.slane %v4019_v46, 9  ;;  %v3059_v35 = vcombine.low %v4304_v34, %v4316_v51  ;;  %v1710_v9 = vsel %vm4646_vm5, %v3190_v45, %v1709_v55  ;;  %v3060_v23 = vcombine.low %v4376_v60, %v4388_v8  ;;  %v3962_v51 = vld [vmem:[%s5542_s0 + $0x98] sm:$0xff]   ;;  %v3961_v33 = vld [vmem:[%s5542_s0 + $0x190] sm:$0xff]   ;;  %v5615_v22 = vld [vmem:[#allocation15_spill] sm:$0xff] }
  0x62   :  { %v715_v49 = vrot.slane %v4021_v61, 5  ;;  %v1714_v31 = vsel %vm4646_vm5, %v3191_v19, %v1713_v48  ;;  %v3074_v28 = vrot.slane %v4022_v47, 9  ;;  %v1722_v41 = vsel %vm4646_vm5, %v3193_v7, %v1721_v20  ;;  %v5616_v53 = vld [vmem:[#allocation16_spill] sm:$0xff]  ;;  %v5617_v55 = vld [vmem:[#allocation17_spill] sm:$0xff]  ;;  %v5618_v48 = vld [vmem:[#allocation6_spill] sm:$0xff] }
  0x63   :  { %3537 = vmatmul.mubr.bf16.vlgmr.msra.gmra.mrb[0].mxu1 %v3057_v56  ;;  %v4743_v34 = vsel %vm4646_vm5, %v3073_v3, %v707_v30  ;;  %v3075_v37 = vrot.slane %v4023_v32, 9  ;;  %v3194_v5 = vrot.slane %v4477_v39, 9  ;;  %v1725_v11 = vrot.slane %v4482_v2, 5  ;;  %v5614_v2 = vld [vmem:[#allocation14_spill] sm:$0xff]  ;;  %v3969_v47 = vld [vmem:[%s5542_s0 + $0x1a8] sm:$0xff]  }
  0x64   :  { %3553 = vmatpush3.bf16.msra.mxu1 %v4499_v21  ;;  %3540 = vmatprep.mubr.bf16.mxu1 %v3058_v12  ;;  %v3072_v21 = vrot.slane %v4018_v29, 9  ;;  %v4767_v26 = vsel %vm4646_vm5, %v3074_v28, %v711_v10  ;;  %v3195_v6 = vrot.slane %v5612_v57, 9  ;;  %v1729_v25 = vrot.slane %v5613_v4, 5  ;;  %v3963_v12 = vld [vmem:[%s5542_s0 + $0x198] sm:$0xff]   ;;  %v5621_v7 = vld [vmem:[#allocation10_spill] sm:$0xff]  ;;  %v3972_v28 = vld [vmem:[%s5542_s0 + $0xb0] sm:$0xff]  }
  0x65   :  { %3554 = vmatprep.subr.bf16.mxu1 %v3956_v14  ;;  %v4774_v56 = vsel %vm4646_vm5, %v3075_v37, %v715_v49  ;;  %v1733_v30 = vrot.slane %v5615_v22, 5  ;;  %v3197_v45 = vrot.slane %v5616_v53, 9  ;;  %v1737_v19 = vrot.slane %v5617_v55, 5  ;;  %v5623_v37 = vld [vmem:[#allocation18_spill] sm:$0xff]  ;;  %v4026_v55 = vld [vmem:[%s5543_s1 + $0x28] sm:$0xf] }
  0x66   :  { %v4739_v0 = vsel %vm4646_vm5, %v3072_v21, %v703_v15  ;;  %v3196_v15 = vrot.slane %v5614_v2, 9  ;;  %v3105_v43 = vcombine.low %v4767_v26, %v4774_v56  ;;  %v1726_v29 = vsel %vm4646_vm5, %v3194_v5, %v1725_v11  ;;  %v5624_v11 = vld [vmem:[#allocation7_spill] sm:$0xff] }
  0x67   :  { %3665 = vmatmul.mubr.bf16.vlgmr.msra.gmra.mrb[0].mxu0 %v3217_v36  ;;  %v3104_v24 = vcombine.low %v4739_v0, %v4743_v34  ;;  %v3219_v36 = vcombine.low %v1710_v9, %v1714_v31  ;;  %v1730_v21 = vsel %vm4646_vm5, %v3195_v6, %v1729_v25  ;;  %v3198_v46 = vrot.slane %v4612_v54, 9  ;;  %v4024_v25 = vld [vmem:[%s5543_s1 + $0x20] sm:$0xf]  ;;  %v4029_v0 = vld [vmem:[%s5543_s1 + $0x34] sm:$0x1] }
  0x68   :  { %3555 = vmatpush3.bf16.msra.mxu1 %v3956_v14  ;;  %3681 = vmatpush3.bf16.msra.mxu0 %v4513_v63  ;;  %v1718_v63 = vsel %vm4646_vm5, %v3192_v17, %v1717_v44  ;;  %v3967_v44 = vld [vmem:[%s5542_s0 + $0x1a0] sm:$0xff]   ;;  %v1741_v3 = vrot.slane %v4617_v52, 5  ;;  %v1734_v58 = vsel %vm4646_vm5, %v3196_v15, %v1733_v30  ;;  %v1738_v10 = vsel %vm4646_vm5, %v3197_v45, %v1737_v19  ;;  %v3973_v30 = vld [vmem:[%s5542_s0 + $0x1b0] sm:$0xff]   ;;  %v3974_v45 = vld [vmem:[%s5542_s0 + $0xb8] sm:$0xff]  }
  0x69   :  { %3668 = vmatprep.mubr.bf16.mxu0 %v3218_v16  ;;  %3682 = vmatprep.subr.bf16.mxu0 %v3957_v13  ;;  %v3220_v14 = vcombine.low %v1718_v63, %v1722_v41  ;;  %v5619_v16 = vld [vmem:[#allocation4_spill] sm:$0xff]  ;;  %v1745_v9 = vrot.slane %v4636_v40, 5  ;;  %v4813_v52 = vld [vmem:[%s5545_s3] sm:$0xf]  ;;  %v3222_v40 = vcombine.low %v1734_v58, %v1738_v10  ;;  %v5622_v41 = vld [vmem:[#allocation5_spill] sm:$0xff]  ;;  %v3083_v5 = vrot.slane %v5618_v48, 9 }
  0x6a   :  { %3556 = vmatprep.subr.bf16.mxu1 %v3960_v62  ;;  %v3061_v17 = vcombine.low %v5619_v16, %v5618_v48  ;;  %v3082_v61 = vrot.slane %v5619_v16, 9  ;;  %v743_v32 = vrot.slane %v5622_v41, 5  ;;  %v747_v6 = vrot.slane %v5624_v11, 5  ;;  %v4027_v48 = vld [vmem:[%s5543_s1 + $0x2c] sm:$0x1]  ;;  %v5626_v58 = vld [vmem:[#allocation13_spill] sm:$0xff] }
  0x6b   :  { %3541 = vmatmul.mubr.bf16.gmra.mrb[4].mxu1 %v3059_v35  ;;  %v3199_v35 = vrot.slane %v4624_v50, 9  ;;  %v3077_v19 = vrot.slane %v4026_v55, 9  ;;  %v723_v16 = vrot.slane %v4027_v48, 5  ;;  %v755_v10 = vrot.slane %v5626_v58, 5  ;;  %v4931_v11 = vld [vmem:[%s5545_s3 + $0x18] sm:$0xf] }
  0x6c   :  { %3557 = vmatpush3.bf16.msra.mxu1 %v3960_v62  ;;  %3544 = vmatprep.mubr.bf16.mxu1 %v3060_v23  ;;  %v5620_v62 = vld [vmem:[#allocation12_spill] sm:$0xff]  ;;  %v3221_v23 = vcombine.low %v1726_v29, %v1730_v21  ;;  %v4854_v15 = vsel %vm4646_vm5, %v3082_v61, %v743_v32  ;;  %v3084_v29 = vrot.slane %v5621_v7, 9  ;;  %v5625_v21 = vld [vmem:[#allocation11_spill] sm:$0xff]  ;;  %v727_v34 = vrot.slane %v4029_v0, 5  ;;  %5628 = vst [vmem:[#allocation8_spill] sm:$0xff] %v4931_v11 }
  0x6d   :  { %3683 = vmatpush3.bf16.msra.mxu0 %v3957_v13  ;;  %3558 = vmatprep.subr.bf16.mxu1 %v3962_v51  ;;  %v3968_v13 = vld [vmem:[%s5542_s0 + $0xa8] sm:$0xff]   ;;  %v3062_v20 = vcombine.low %v5621_v7, %v5620_v62  ;;  %v4837_v63 = vsel %vm4646_vm5, %v3199_v35, %v1745_v9  ;;  %v4028_v9 = vld [vmem:[%s5543_s1 + $0x30] sm:$0xf]  ;;  %v3086_v7 = vrot.slane %v5623_v37, 9  ;;  %v2258_v0 = vshrl.u32 %v4931_v11, 16 }
  0x6e   :  { %3684 = vmatprep.subr.bf16.mxu0 %v3961_v33  ;;  %v5627_v61 = vld [vmem:[#allocation19_spill] sm:$0xff]  ;;  %v5630_v55 = vld [vmem:[#allocation20_spill] sm:$0xff]  ;;  %v5082_v31 = vld [vmem:[%s5544_s2] sm:$0xf]  ;;  %v5660_v38 = vcombine.low %v4612_v54, %v4624_v50 }
  0x6f   :  { %3669 = vmatmul.mubr.bf16.gmra.mrb[4].mxu0 %v3219_v36  ;;  %v3063_v36 = vcombine.low %v5623_v37, %v4591_v18 }
  0x70   :  { %3559 = vmatpush3.bf16.msra.mxu1 %v3962_v51  ;;  %3672 = vmatprep.mubr.bf16.mxu0 %v3220_v14  ;;  %v4823_v51 = vld [vmem:[%s5545_s3 + $0x8] sm:$0xf]  ;;  %v4025_v14 = vld [vmem:[%s5543_s1 + $0x24] sm:$0x1] }
  0x71   :  { %3685 = vmatpush3.bf16.msra.mxu0 %v3961_v33  ;;  %3560 = vmatprep.subr.bf16.mxu1 %v3966_v1  ;;  %v4833_v33 = vsel %vm4646_vm5, %v3198_v46, %v1741_v3  ;;  %v3248_v4 = vcombine.low %v4813_v52, %v4823_v51  ;;  %v751_v46 = vrot.slane %v5625_v21, 5  ;;  %v3085_v3 = vrot.slane %v5620_v62, 9 }
  0x72   :  { %3686 = vmatprep.subr.bf16.mxu0 %v3963_v12  ;;  %v3223_v22 = vcombine.low %v4833_v33, %v4837_v63  ;;  %v724_v62 = vsel %vm4646_vm5, %v3077_v19, %v723_v16  ;;  %v3977_v33 = vld [vmem:[%s5542_s0 + $0xc0] sm:$0xff]   ;;  %v4030_v63 = vld [vmem:[%s5543_s1 + $0x38] sm:$0xf]  ;;  %v763_v19 = vrot.slane %v5630_v55, 5  ;;  %v3081_v16 = vrot.slane %v4388_v8, 9 }
  0x73   :  { %3545 = vmatmul.mubr.bf16.gmra.mrb[8].mxu1 %v3061_v17  ;;  %v4872_v17 = vsel %vm4646_vm5, %v3083_v5, %v747_v6  ;;  %v3079_v41 = vrot.slane %v4030_v63, 9  ;;  %v4926_v5 = vld [vmem:[%s5545_s3 + $0x10] sm:$0xf]  ;;  %v3980_v6 = vld [vmem:[%s5542_s0 + $0xc8] sm:$0xff]  }
  0x74   :  { %3561 = vmatpush3.bf16.msra.mxu1 %v3966_v1  ;;  %3548 = vmatprep.mubr.bf16.mxu1 %v3062_v20  ;;  %v719_v1 = vrot.slane %v4025_v14, 5  ;;  %v5629_v14 = vld [vmem:[#allocation2_spill] sm:$0xff]  ;;  %v4959_v8 = vld [vmem:[%s5545_s3 + $0x28] sm:$0xf]  ;;  %v5157_v55 = vld [vmem:[%s5545_s3 + $0x2c] sm:$0x1] }
  0x75   :  { %3687 = vmatpush3.bf16.msra.mxu0 %v3963_v12  ;;  %3562 = vmatprep.subr.bf16.mxu1 %v3968_v13  ;;  %v3076_v12 = vrot.slane %v4024_v25, 9  ;;  %v4031_v25 = vld [vmem:[%s5543_s1 + $0x3c] sm:$0x1]  ;;  %5633 = vst [vmem:[#allocation14_spill] sm:$0xff] %v4959_v8  ;;  %v5072_v20 = vld [vmem:[%s5542_s0 + $0x1e0] sm:$0xff]   ;;  %5638 = vst [vmem:[#allocation4_spill] sm:$0xff] %v5157_v55 }
  0x76   :  { %3688 = vmatprep.subr.bf16.mxu0 %v3967_v44 }
  0x77   :  { %3673 = vmatmul.mubr.bf16.gmra.mrb[8].mxu0 %v3221_v23  ;;  %v720_v35 = vsel %vm4646_vm5, %v3076_v12, %v719_v1  ;;  %v3078_v23 = vrot.slane %v4028_v9, 9  ;;  %v731_v12 = vrot.slane %v4031_v25, 5  ;;  %v735_v1 = vrot.slane %v5629_v14, 5  ;;  %v3983_v9 = vld [vmem:[%s5542_s0 + $0xd0] sm:$0xff]  }
  0x78   :  { %3563 = vmatpush3.bf16.msra.mxu1 %v3968_v13  ;;  %3676 = vmatprep.mubr.bf16.mxu0 %v3222_v40  ;;  %v759_v40 = vrot.slane %v5627_v61, 5  ;;  %v3106_v48 = vcombine.low %v720_v35, %v724_v62  ;;  %v3981_v35 = vld [vmem:[%s5542_s0 + $0x1c8] sm:$0xff]   ;;  %v2247_v62 = vshll.u32 %v4926_v5, 16  ;;  %v2261_v25 = vshll.u32 %v4931_v11, 16 }
  0x79   :  { %3689 = vmatpush3.bf16.msra.mxu0 %v3967_v44  ;;  %3564 = vmatprep.subr.bf16.mxu1 %v3972_v28  ;;  %v3109_v44 = vcombine.low %v4854_v15, %v4872_v17  ;;  %v2286_v14 = vshrl.u32 %v4959_v8, 16  ;;  %v5077_v13 = vld [vmem:[%s5545_s3 + $0x68] sm:$0xf] }
  0x7a   :  { %3690 = vmatprep.subr.bf16.mxu0 %v3969_v47  ;;  %v4920_v37 = vsel %vm4646_vm5, %v3086_v7, %v759_v40  ;;  %v2233_v7 = vshll.u32 %v4823_v51, 16  ;;  %v2244_v40 = vshrl.u32 %v4926_v5, 16 }
  0x7b   :  { %3549 = vmatmul.mubr.bf16.gmra.mrb[12].mxu1 %v3063_v36  ;;  %v3087_v36 = vrot.slane %v4591_v18, 9  ;;  %v3080_v18 = vrot.slane %v4376_v60, 9  ;;  %v3979_v60 = vld [vmem:[%s5542_s0 + $0x1c0] sm:$0xff]  }
  0x7c   :  { %3565 = vmatpush3.bf16.msra.mxu1 %v3972_v28  ;;  %3568 = vmatprep.mubr.bf16.mxu1 %v3104_v24  ;;  %v4901_v24 = vsel %vm4646_vm5, %v3084_v29, %v751_v46  ;;  %v4905_v28 = vsel %vm4646_vm5, %v3085_v3, %v755_v10  ;;  %v5631_v29 = vld [vmem:[#allocation3_spill] sm:$0xff]  ;;  %v732_v3 = vsel %vm4646_vm5, %v3079_v41, %v731_v12  ;;  %v2219_v10 = vshll.u32 %v4813_v52, 16  ;;  %v5005_v41 = vld [vmem:[%s5545_s3 + $0x38] sm:$0xf] }
  0x7d   :  { %3691 = vmatpush3.bf16.msra.mxu0 %v3969_v47  ;;  %3566 = vmatprep.subr.bf16.mxu1 %v3974_v45  ;;  %v3975_v47 = vld [vmem:[%s5542_s0 + $0x1b8] sm:$0xff]   ;;  %v3110_v32 = vcombine.low %v4901_v24, %v4905_v28  ;;  %v739_v21 = vrot.slane %v5631_v29, 5  ;;  %v4946_v46 = vsel %vm4646_vm5, %v3087_v36, %v763_v19  ;;  %v736_v26 = vsel %vm4646_vm5, %v3080_v18, %v735_v1  ;;  %v5010_v36 = vld [vmem:[%s5545_s3 + $0x40] sm:$0xf] }
  0x7e   :  { %3692 = vmatprep.subr.bf16.mxu0 %v3973_v30  ;;  %5635 = vst [vmem:[#allocation16_spill] sm:$0xff] %v5005_v41  ;;  %v2246_v19 = vrot.slane %v2244_v40, 4  ;;  %v2263_v40 = vrot.slane %v2261_v25, 5  ;;  %v2288_v1 = vrot.slane %v2286_v14, 4  ;;  %v3993_v14 = vld [vmem:[%s5542_s0 + $0x1e8] sm:$0xff]  }
  0x7f   :  { %3677 = vmatmul.mubr.bf16.gmra.mrb[12].mxu0 %v3223_v22  ;;  %v4954_v22 = vld [vmem:[%s5545_s3 + $0x20] sm:$0xf]  ;;  %v740_v56 = vsel %vm4646_vm5, %v3081_v16, %v739_v21  ;;  %v5032_v21 = vld [vmem:[%s5545_s3 + $0x4] sm:$0x1] }
  0x80   :  { %3567 = vmatpush3.bf16.msra.mxu1 %v3974_v45  ;;  %3696 = vmatprep.mubr.bf16.mxu0 %v3248_v4  ;;  %5632 = vst [vmem:[#allocation9_spill] sm:$0xff] %v4954_v22  ;;  %v728_v45 = vsel %vm4646_vm5, %v3078_v23, %v727_v34  ;;  %v3250_v58 = vcombine.low %v4954_v22, %v4959_v8  ;;  %v2230_v23 = vshrl.u32 %v4823_v51, 16  ;;  %v4994_v34 = vld [vmem:[%s5545_s3 + $0x30] sm:$0xf]  ;;  %v2272_v12 = vshrl.u32 %v4954_v22, 16 }
  0x81   :  { %3693 = vmatpush3.bf16.msra.mxu0 %v3973_v30  ;;  %3584 = vmatprep.subr.bf16.mxu1 %v3977_v33  ;;  %v3249_v30 = vcombine.low %v4926_v5, %v4931_v11  ;;  %v3107_v61 = vcombine.low %v728_v45, %v732_v3  ;;  %5634 = vst [vmem:[#allocation15_spill] sm:$0xff] %v4994_v34  ;;  %v2275_v18 = vshll.u32 %v4954_v22, 16  ;;  %v2221_v45 = vrot.slane %v2219_v10, 5  ;;  %v5052_v10 = vld [vmem:[%s5545_s3 + $0x50] sm:$0xf] }
  0x82   :  { %3694 = vmatprep.subr.bf16.mxu0 %v3975_v47  ;;  %v3108_v63 = vcombine.low %v736_v26, %v740_v56  ;;  %v3251_v16 = vcombine.low %v4994_v34, %v5005_v41  ;;  %v2232_v3 = vrot.slane %v2230_v23, 4  ;;  %v3987_v56 = vld [vmem:[%s5542_s0 + $0x1d8] sm:$0xff]   ;;  %v5062_v23 = vld [vmem:[%s5542_s0 + $0xe8] sm:$0xff]   ;;  %v2225_v49 = vshll.u32 %v5032_v21, 16  ;;  %v5106_v4 = vld [vmem:[%s5544_s2 + $0x10] sm:$0xf] }
  0x83   :  { %3569 = vmatmul.mubr.bf16.vlgmr.msra.gmra.mrb[0].mxu1 %v3105_v43  ;;  %v2216_v43 = vshrl.u32 %v4813_v52, 16  ;;  %v2274_v15 = vrot.slane %v2272_v12, 4  ;;  %v2277_v17 = vrot.slane %v2275_v18, 5  ;;  %v5639_v12 = vshll.u32 %v4959_v8, 16 }
  0x84   :  { %3585 = vmatpush3.bf16.msra.mxu1 %v3977_v33  ;;  %3572 = vmatprep.mubr.bf16.mxu1 %v3106_v48  ;;  %v3986_v33 = vld [vmem:[%s5542_s0 + $0xd8] sm:$0xff]  }
  0x85   :  { %3695 = vmatpush3.bf16.msra.mxu0 %v3975_v47  ;;  %3586 = vmatprep.subr.bf16.mxu1 %v3980_v6  ;;  %v3985_v47 = vld [vmem:[%s5542_s0 + $0x1d0] sm:$0xff]   ;;  %v5101_v48 = vld [vmem:[%s5545_s3 + $0x1c] sm:$0x1]  ;;  %v2291_v22 = vrot.slane %v5639_v12, 5 }
  0x86   :  { %3712 = vmatprep.subr.bf16.mxu0 %v3979_v60  ;;  %v2267_v8 = vshll.u32 %v5101_v48, 16  ;;  %v2679_v54 = vrot.slane %v5101_v48, 5 }
  0x88   :  { %3697 = vmatmul.mubr.bf16.vlgmr.msra.gmra.mrb[0].mxu0 %v3249_v30  ;;  %3587 = vmatpush3.bf16.msra.mxu1 %v3980_v6  ;;  %v5015_v6 = vld [vmem:[%s5545_s3 + $0x48] sm:$0xf]  ;;  %v2218_v30 = vrot.slane %v2216_v43, 4  ;;  %v3989_v43 = vld [vmem:[%s5542_s0 + $0xe0] sm:$0xff]  }
  0x89   :  { %3713 = vmatpush3.bf16.msra.mxu0 %v3979_v60  ;;  %3700 = vmatprep.mubr.bf16.mxu0 %v3250_v58  ;;  %v3252_v29 = vcombine.low %v5010_v36, %v5015_v6  ;;  %v5037_v60 = vld [vmem:[%s5545_s3 + $0xc] sm:$0x1]  ;;  %v2235_v58 = vrot.slane %v2233_v7, 5  ;;  %v5067_v7 = vld [vmem:[%s5545_s3 + $0x60] sm:$0xf] }
  0x8a   :  { %3714 = vmatprep.subr.bf16.mxu0 %v3981_v35  ;;  %3588 = vmatprep.subr.bf16.mxu1 %v3983_v9  ;;  %v3254_v25 = vcombine.low %v5067_v7, %v5077_v13 }
  0x8b   :  { %3573 = vmatmul.mubr.bf16.gmra.mrb[4].mxu1 %v3107_v61  ;;  %v5096_v61 = vld [vmem:[%s5545_s3 + $0x14] sm:$0x1]  ;;  %v2236_v26 = vor.u32 %v2235_v58, %v2232_v3  ;;  %v5139_v58 = vld [vmem:[%s5545_s3 + $0x70] sm:$0xf] }
  0x8c   :  { %3589 = vmatpush3.bf16.msra.mxu1 %v3983_v9  ;;  %3576 = vmatprep.mubr.bf16.mxu1 %v3108_v63  ;;  %v2239_v63 = vshll.u32 %v5037_v60, 16  ;;  %5636 = vst [vmem:[#allocation17_spill] sm:$0xff] %v5096_v61  ;;  %v2222_v9 = vor.u32 %v2221_v45, %v2218_v30  ;;  %v2260_v30 = vrot.slane %v2258_v0, 4  ;;  %v5125_v45 = vld [vmem:[%s5544_s2 + $0x28] sm:$0xf]  ;;  %v2253_v3 = vshll.u32 %v5096_v61, 16 }
  0x8d   :  { %3715 = vmatpush3.bf16.msra.mxu0 %v3981_v35  ;;  %3590 = vmatprep.subr.bf16.mxu1 %v3986_v33  ;;  %v5057_v35 = vld [vmem:[%s5545_s3 + $0x58] sm:$0xf]  ;;  %v2237_v28 = vrot.slane %v2236_v26, 4 }
  0x8e   :  { %3716 = vmatprep.subr.bf16.mxu0 %v3985_v47  ;;  %v3253_v0 = vcombine.low %v5052_v10, %v5057_v35  ;;  %v2223_v24 = vrot.slane %v2222_v9, 4  ;;  %v2264_v12 = vor.u32 %v2263_v40, %v2260_v30  ;;  %v2292_v40 = vor.u32 %v2291_v22, %v2288_v1  ;;  %v3997_v22 = vld [vmem:[%s5542_s0 + $0x1f0] sm:$0xff]  }
  0x8f   :  { %v2255_v11 = vrot.slane %v2253_v3, 5  ;;  %v2269_v1 = vrot.slane %v2267_v8, 5  ;;  %v5206_v3 = vld [vmem:[%s5545_s3 + $0x34] sm:$0x1]  ;;  %v5644_v8 = vshrl.u32 %v5005_v41, 16 }
  0x90   :  { %3701 = vmatmul.mubr.bf16.gmra.mrb[4].mxu0 %v3251_v16  ;;  %3591 = vmatpush3.bf16.msra.mxu1 %v3986_v33  ;;  %v5087_v16 = vld [vmem:[%s5544_s2 + $0x8] sm:$0xf]  ;;  %v2249_v33 = vrot.slane %v2247_v62, 5  ;;  %v5120_v62 = vld [vmem:[%s5544_s2 + $0x20] sm:$0xf]  ;;  %5642 = vst [vmem:[#allocation12_spill] sm:$0xff] %v5206_v3 }
  0x91   :  { %3717 = vmatpush3.bf16.msra.mxu0 %v3985_v47  ;;  %3704 = vmatprep.mubr.bf16.mxu0 %v3252_v29  ;;  %v5111_v47 = vld [vmem:[%s5544_s2 + $0x18] sm:$0xf]  ;;  %v5144_v29 = vld [vmem:[%s5545_s3 + $0x24] sm:$0x1] }
  0x92   :  { %3718 = vmatprep.subr.bf16.mxu0 %v3987_v56  ;;  %3592 = vmatprep.subr.bf16.mxu1 %v3989_v43  ;;  %5637 = vst [vmem:[#allocation6_spill] sm:$0xff] %v5144_v29  ;;  %v2250_v18 = vor.u32 %v2249_v33, %v2246_v19  ;;  %v2281_v9 = vshll.u32 %v5144_v29, 16  ;;  %v2295_v33 = vshll.u32 %v5157_v55, 16 }
  0x93   :  { %3577 = vmatmul.mubr.bf16.gmra.mrb[8].mxu1 %v3109_v44  ;;  %v2227_v44 = vrot.slane %v2225_v49, 5  ;;  %v5167_v49 = vld [vmem:[%s5545_s3 + $0x78] sm:$0xf] }
  0x94   :  { %3593 = vmatpush3.bf16.msra.mxu1 %v3989_v43  ;;  %3580 = vmatprep.mubr.bf16.mxu1 %v3110_v32  ;;  %v2241_v32 = vrot.slane %v2239_v63, 5  ;;  %v2345_v43 = vshll.u32 %v5015_v6, 16  ;;  %v2278_v63 = vor.u32 %v2277_v17, %v2274_v15  ;;  %v3255_v30 = vcombine.low %v5139_v58, %v5167_v49  ;;  %v3998_v15 = vld [vmem:[%s5542_s0 + $0xf8] sm:$0xff]  }
  0x95   :  { %3719 = vmatpush3.bf16.msra.mxu0 %v3987_v56  ;;  %3594 = vmatprep.subr.bf16.mxu1 %v5062_v23  ;;  %v3995_v56 = vld [vmem:[%s5542_s0 + $0xf0] sm:$0xff]   ;;  %v2251_v61 = vrot.slane %v2250_v18, 4 }
  0x96   :  { %3720 = vmatprep.subr.bf16.mxu0 %v5072_v20  ;;  %v2242_v17 = vsel %vm4157_vm2, %v2237_v28, %v2241_v32  ;;  %v2297_v28 = vrot.slane %v2295_v33, 5  ;;  %v5643_v32 = vshll.u32 %v4994_v34, 16 }
  0x97   :  { %v2256_v26 = vsel %vm4157_vm2, %v2251_v61, %v2255_v11 }
  0x98   :  { %3705 = vmatmul.mubr.bf16.gmra.mrb[8].mxu0 %v3253_v0  ;;  %3595 = vmatpush3.bf16.msra.mxu1 %v5062_v23  ;;  %v2228_v0 = vsel %vm4157_vm2, %v2223_v24, %v2227_v44  ;;  %v2283_v23 = vrot.slane %v2281_v9, 5  ;;  %v5641_v44 = vcombine.low %v4920_v37, %v4946_v46  ;;  %v2279_v24 = vrot.slane %v2278_v63, 4  ;;  %v5218_v46 = vld [vmem:[%s5545_s3 + $0x3c] sm:$0x1] }
  0x99   :  { %3721 = vmatpush3.bf16.msra.mxu0 %v5072_v20  ;;  %3708 = vmatprep.mubr.bf16.mxu0 %v3254_v25  ;;  %v2265_v20 = vrot.slane %v2264_v12, 4  ;;  %v5640_v25 = vshrl.u32 %v4994_v34, 16  ;;  %v2305_v18 = vrot.slane %v5643_v32, 5  ;;  %v2316_v12 = vrot.slane %v5644_v8, 4  ;;  %5646 = vst [vmem:[#allocation10_spill] sm:$0xff] %v5218_v46 }
  0x9a   :  { %3722 = vmatprep.subr.bf16.mxu0 %v3993_v14  ;;  %3596 = vmatprep.subr.bf16.mxu1 %v3995_v56  ;;  %v5645_v9 = vcombine.low %v5082_v31, %v5087_v16  ;;  %v2293_v37 = vrot.slane %v2292_v40, 4  ;;  %v5647_v63 = vshll.u32 %v5005_v41, 16  ;;  %v5649_v32 = vshll.u32 %v5010_v36, 16  ;;  %v3999_v31 = vld [vmem:[%s5542_s0 + $0x1f8] sm:$0xff]   ;;  %v5233_v40 = vld [vmem:[%s5545_s3 + $0x44] sm:$0x1] }
  0x9b   :  { %v2302_v19 = vrot.slane %v5640_v25, 4  ;;  %3581 = vmatmul.mubr.bf16.gmra.mrb[12].mxu1 %v5641_v44  ;;  %v5648_v25 = vshrl.u32 %v5010_v36, 16  ;;  %v3280_v16 = vcombine.low %v2228_v0, %v2242_v17  ;;  %v5244_v0 = vld [vmem:[%s5542_s0 + $0x200] sm:$0xff]   ;;  %v2309_v17 = vshll.u32 %v5206_v3, 16 }
  0x9c   :  { %3597 = vmatpush3.bf16.msra.mxu1 %v3995_v56  ;;  %3600 = vmatprep.mubr.bf16.mxu1 %v5645_v9  ;;  %v2319_v33 = vrot.slane %v5647_v63, 5  ;;  %v2333_v8 = vrot.slane %v5649_v32, 5  ;;  %v2384_v56 = vshrl.u32 %v5067_v7, 16  ;;  %v5650_v9 = vshrl.u32 %v5015_v6, 16 }
  0x9d   :  { %v2330_v44 = vrot.slane %v5648_v25, 4  ;;  %3723 = vmatpush3.bf16.msra.mxu0 %v3993_v14  ;;  %3598 = vmatprep.subr.bf16.mxu1 %v3998_v15  ;;  %v2347_v25 = vrot.slane %v2345_v43, 5  ;;  %v2387_v32 = vshll.u32 %v5067_v7, 16  ;;  %v2398_v14 = vshrl.u32 %v5077_v13, 16 }
  0x9e   :  { %v2344_v63 = vrot.slane %v5650_v9, 4  ;;  %3724 = vmatprep.subr.bf16.mxu0 %v3997_v22  ;;  %v5250_v9 = vld [vmem:[%s5545_s3 + $0x4c] sm:$0x1]  ;;  %v2270_v43 = vsel %vm4157_vm2, %v2265_v20, %v2269_v1  ;;  %v2284_v41 = vsel %vm4157_vm2, %v2279_v24, %v2283_v23  ;;  %v2306_v34 = vor.u32 %v2305_v18, %v2302_v19 }
  0x9f   :  { %v2323_v11 = vshll.u32 %v5218_v46, 16  ;;  %v2298_v61 = vsel %vm4157_vm2, %v2293_v37, %v2297_v28  ;;  %v2320_v3 = vor.u32 %v2319_v33, %v2316_v12  ;;  %v2334_v55 = vor.u32 %v2333_v8, %v2330_v44  ;;  %v5263_v20 = vld [vmem:[%s5542_s0 + $0x208] sm:$0xff]   ;;  %v5276_v37 = vld [vmem:[%s5545_s3 + $0x54] sm:$0x1] }
  0xa0   :  { %3709 = vmatmul.mubr.bf16.gmra.mrb[12].mxu0 %v3255_v30  ;;  %3599 = vmatpush3.bf16.msra.mxu1 %v3998_v15  ;;  %v2337_v29 = vshll.u32 %v5233_v40, 16  ;;  %v2348_v1 = vor.u32 %v2347_v25, %v2344_v63  ;;  %v2351_v19 = vshll.u32 %v5250_v9, 16  ;;  %v5651_v30 = vshrl.u32 %v5052_v10, 16 }
  0xa1   :  { %3725 = vmatpush3.bf16.msra.mxu0 %v3997_v22  ;;  %3728 = vmatprep.mubr.bf16.mxu0 %v3280_v16  ;;  %v5652_v23 = vshll.u32 %v5052_v10, 16  ;;  %v2401_v28 = vshll.u32 %v5077_v13, 16  ;;  %v2412_v18 = vshrl.u32 %v5139_v58, 16  ;;  %v3281_v22 = vcombine.low %v2256_v26, %v2270_v43 }
  0xa2   :  { %v2358_v15 = vrot.slane %v5651_v30, 4  ;;  %3726 = vmatprep.subr.bf16.mxu0 %v3999_v31  ;;  %3776 = vmatprep.subr.bf16.mxu1 %v5244_v0  ;;  %v2311_v12 = vrot.slane %v2309_v17, 5  ;;  %v5653_v33 = vcombine.low %v5106_v4, %v5111_v47  ;;  %v2307_v44 = vrot.slane %v2306_v34, 4  ;;  %v5292_v4 = vld [vmem:[%s5545_s3 + $0x5c] sm:$0x1] }
  0xa3   :  { %v2361_v24 = vrot.slane %v5652_v23, 5  ;;  %v2325_v8 = vrot.slane %v2323_v11, 5  ;;  %v5654_v16 = vshrl.u32 %v5057_v35, 16  ;;  %v5655_v25 = vshll.u32 %v5057_v35, 16 }
  0xa4   :  { %3601 = vmatmul.mubr.bf16.vlgmr.msra.gmra.mrb[0].mxu1 %v5653_v33  ;;  %v5656_v17 = vcombine.low %v5120_v62, %v5125_v45  ;;  %v3282_v43 = vcombine.low %v2284_v41, %v2298_v61  ;;  %v2321_v30 = vrot.slane %v2320_v3, 4  ;;  %v2335_v23 = vrot.slane %v2334_v55, 4  ;;  %v4006_v41 = vld [vmem:[%s5542_s0 + $0x210] sm:$0xff]   ;;  %v4039_v61 = vld [vmem:[%s5544_s2 + $0x38] sm:$0xf] }
  0xa5   :  { %v2372_v63 = vrot.slane %v5654_v16, 4  ;;  %v2375_v26 = vrot.slane %v5655_v25, 5  ;;  %3784 = vmatpush3.bf16.msra.mxu1 %v5244_v0  ;;  %v2339_v46 = vrot.slane %v2337_v29, 5  ;;  %3727 = vmatpush3.bf16.msra.mxu0 %v3999_v31  ;;  %v2349_v34 = vrot.slane %v2348_v1, 4  ;;  %v4038_v31 = vld [vmem:[%s5544_s2 + $0x30] sm:$0xf] }
  0xa6   :  { %3604 = vmatprep.mubr.bf16.mxu1 %v5656_v17  ;;  %3777 = vmatprep.subr.bf16.mxu1 %v5263_v20  ;;  %v2353_v47 = vrot.slane %v2351_v19, 5  ;;  %v2362_v11 = vor.u32 %v2361_v24, %v2358_v15  ;;  %v2365_v33 = vshll.u32 %v5276_v37, 16  ;;  %v2386_v55 = vrot.slane %v2384_v56, 4  ;;  %v5311_v56 = vld [vmem:[%s5545_s3 + $0x64] sm:$0x1] }
  0xa7   :  { %3744 = vmatprep.subr.bf16.mxu0 %v5244_v0  ;;  %v2389_v29 = vrot.slane %v2387_v32, 5  ;;  %v2400_v62 = vrot.slane %v2398_v14, 4  ;;  %v2403_v45 = vrot.slane %v2401_v28, 5  ;;  %v2415_v3 = vshll.u32 %v5139_v58, 16  ;;  %v5316_v32 = vld [vmem:[%s5545_s3 + $0x6c] sm:$0x1] }
  0xa8   :  { %v3139_v1 = vcombine.low %v4038_v31, %v4039_v61  ;;  %v2376_v19 = vor.u32 %v2375_v26, %v2372_v63  ;;  %v2379_v15 = vshll.u32 %v5292_v4, 16  ;;  %v2426_v14 = vshrl.u32 %v5167_v49, 16  ;;  %3729 = vmatmul.mubr.bf16.vlgmr.msra.gmra.mrb[0].mxu0 %v3281_v22  ;;  %v4007_v63 = vld [vmem:[%s5542_s0 + $0x218] sm:$0xff]  }
  0xa9   :  { %v2429_v24 = vshll.u32 %v5167_v49, 16  ;;  %3785 = vmatpush3.bf16.msra.mxu1 %v5263_v20  ;;  %v2312_v28 = vsel %vm4157_vm2, %v2307_v44, %v2311_v12  ;;  %v2326_v16 = vsel %vm4157_vm2, %v2321_v30, %v2325_v8  ;;  %3745 = vmatpush3.bf16.msra.mxu0 %v5244_v0  ;;  %v2340_v25 = vsel %vm4157_vm2, %v2335_v23, %v2339_v46 }
  0xaa   :  { %3732 = vmatprep.mubr.bf16.mxu0 %v3282_v43  ;;  %v2354_v22 = vsel %vm4157_vm2, %v2349_v34, %v2353_v47  ;;  %v2363_v26 = vrot.slane %v2362_v11, 4  ;;  %v2367_v17 = vrot.slane %v2365_v33, 5  ;;  %3746 = vmatprep.subr.bf16.mxu0 %v5263_v20  ;;  %v2390_v12 = vor.u32 %v2389_v29, %v2386_v55  ;;  %v5342_v34 = vld [vmem:[%s5545_s3 + $0x74] sm:$0x1] }
  0xab   :  { %3778 = vmatprep.subr.bf16.mxu1 %v4006_v41  ;;  %v2393_v44 = vshll.u32 %v5311_v56, 16  ;;  %v2404_v0 = vor.u32 %v2403_v45, %v2400_v62  ;;  %v2407_v8 = vshll.u32 %v5316_v32, 16  ;;  %v2377_v43 = vrot.slane %v2376_v19, 4 }
  0xac   :  { %3605 = vmatmul.mubr.bf16.gmra.mrb[4].mxu1 %v3139_v1  ;;  %v2381_v30 = vrot.slane %v2379_v15, 5  ;;  %v2414_v31 = vrot.slane %v2412_v18, 4  ;;  %v2417_v61 = vrot.slane %v2415_v3, 5  ;;  %v3283_v46 = vcombine.low %v2312_v28, %v2326_v16  ;;  %v5348_v18 = vld [vmem:[%s5545_s3 + $0x7c] sm:$0x1] }
  0xad   :  { %3786 = vmatpush3.bf16.msra.mxu1 %v4006_v41  ;;  %v5657_v23 = vcombine.low %v4409_v42, %v4427_v59  ;;  %v2428_v47 = vrot.slane %v2426_v14, 4  ;;  %v2431_v11 = vrot.slane %v2429_v24, 5  ;;  %3747 = vmatpush3.bf16.msra.mxu0 %v5263_v20  ;;  %v3284_v33 = vcombine.low %v2340_v25, %v2354_v22  ;;  %v4010_v42 = vld [vmem:[%s5542_s0 + $0x220] sm:$0xff]   ;;  %v4011_v14 = vld [vmem:[%s5542_s0 + $0x228] sm:$0xff]  }
  0xae   :  { %3779 = vmatprep.subr.bf16.mxu1 %v4007_v63  ;;  %3748 = vmatprep.subr.bf16.mxu0 %v4006_v41  ;;  %v2391_v59 = vrot.slane %v2390_v12, 4  ;;  %v2395_v55 = vrot.slane %v2393_v44, 5  ;;  %v2405_v29 = vrot.slane %v2404_v0, 4  ;;  %v2409_v62 = vrot.slane %v2407_v8, 5 }
  0xaf   :  { %3608 = vmatprep.mubr.bf16.mxu1 %v5657_v23  ;;  %v2368_v45 = vsel %vm4157_vm2, %v2363_v26, %v2367_v17  ;;  %v2382_v20 = vsel %vm4157_vm2, %v2377_v43, %v2381_v30  ;;  %v2418_v3 = vor.u32 %v2417_v61, %v2414_v31  ;;  %v2421_v1 = vshll.u32 %v5342_v34, 16 }
  0xb0   :  { %3733 = vmatmul.mubr.bf16.gmra.mrb[4].mxu0 %v3283_v46  ;;  %v2432_v19 = vor.u32 %v2431_v11, %v2428_v47  ;;  %v2435_v15 = vshll.u32 %v5348_v18, 16  ;;  %v3304_v24 = vrot.slane %v5010_v36, 9  ;;  %v2699_v28 = vrot.slane %v5233_v40, 5 }
  0xb1   :  { %3787 = vmatpush3.bf16.msra.mxu1 %v4007_v63  ;;  %3749 = vmatpush3.bf16.msra.mxu0 %v4006_v41  ;;  %v3305_v16 = vrot.slane %v5015_v6, 9  ;;  %v2703_v25 = vrot.slane %v5250_v9, 5  ;;  %v3285_v22 = vcombine.low %v2368_v45, %v2382_v20  ;;  %v2396_v26 = vsel %vm4157_vm2, %v2391_v59, %v2395_v55  ;;  %v5663_v55 = vld [vmem:[#allocation9_spill] sm:$0xff]  ;;  %v5665_v20 = vld [vmem:[#allocation14_spill] sm:$0xff] }
  0xb2   :  { %3736 = vmatprep.mubr.bf16.mxu0 %v3284_v33  ;;  %3750 = vmatprep.subr.bf16.mxu0 %v4007_v63  ;;  %v2410_v41 = vsel %vm4157_vm2, %v2405_v29, %v2409_v62  ;;  %v5658_v17 = vcombine.low %v4477_v39, %v5612_v57  ;;  %v2419_v36 = vrot.slane %v2418_v3, 4  ;;  %v2423_v12 = vrot.slane %v2421_v1, 5  ;;  %v5664_v62 = vld [vmem:[#allocation6_spill] sm:$0xff]  ;;  %v5666_v1 = vld [vmem:[#allocation4_spill] sm:$0xff] }
  0xb3   :  { %3780 = vmatprep.subr.bf16.mxu1 %v4010_v42  ;;  %v3296_v40 = vrot.slane %v4813_v52, 9  ;;  %v2667_v6 = vrot.slane %v5032_v21, 5  ;;  %v5659_v9 = vcombine.low %v5614_v2, %v5616_v53  ;;  %v2433_v44 = vrot.slane %v2432_v19, 4  ;;  %v4014_v2 = vld [vmem:[%s5542_s0 + $0x230] sm:$0xff]  }
  0xb4   :  { %3609 = vmatmul.mubr.bf16.gmra.mrb[8].mxu1 %v5658_v17  ;;  %v2437_v0 = vrot.slane %v2435_v15, 5  ;;  %v3297_v8 = vrot.slane %v4823_v51, 9  ;;  %v2671_v43 = vrot.slane %v5037_v60, 5  ;;  %v3286_v39 = vcombine.low %v2396_v26, %v2410_v41 }
  0xb5   :  { %3788 = vmatpush3.bf16.msra.mxu1 %v4010_v42  ;;  %3612 = vmatprep.mubr.bf16.mxu1 %v5659_v9  ;;  %v2700_v57 = vsel %vm4646_vm5, %v3304_v24, %v2699_v28  ;;  %v2704_v52 = vsel %vm4646_vm5, %v3305_v16, %v2703_v25  ;;  %v3306_v21 = vrot.slane %v5052_v10, 9  ;;  %v3307_v53 = vrot.slane %v5057_v35, 9  ;;  %v4015_v35 = vld [vmem:[%s5542_s0 + $0x238] sm:$0xff]  }
  0xb6   :  { %3751 = vmatpush3.bf16.msra.mxu0 %v4007_v63  ;;  %3781 = vmatprep.subr.bf16.mxu1 %v4011_v14  ;;  %v2707_v51 = vrot.slane %v5276_v37, 5  ;;  %v2424_v60 = vsel %vm4157_vm2, %v2419_v36, %v2423_v12  ;;  %v2668_v63 = vsel %vm4646_vm5, %v3296_v40, %v2667_v6  ;;  %v2711_v30 = vrot.slane %v5292_v4, 5  ;;  %v5668_v12 = vld [vmem:[#allocation12_spill] sm:$0xff] }
  0xb7   :  { %3752 = vmatprep.subr.bf16.mxu0 %v4010_v42  ;;  %v2438_v10 = vsel %vm4157_vm2, %v2433_v44, %v2437_v0  ;;  %v2672_v31 = vsel %vm4646_vm5, %v3297_v8, %v2671_v43  ;;  %v3332_v61 = vcombine.low %v2700_v57, %v2704_v52  ;;  %v3308_v37 = vrot.slane %v5067_v7, 9  ;;  %v5669_v6 = vld [vmem:[#allocation16_spill] sm:$0xff]  ;;  %v5670_v44 = vld [vmem:[#allocation10_spill] sm:$0xff] }
  0xb8   :  { %3737 = vmatmul.mubr.bf16.gmra.mrb[8].mxu0 %v3285_v22  ;;  %v2715_v46 = vrot.slane %v5311_v56, 5  ;;  %v3309_v4 = vrot.slane %v5077_v13, 9  ;;  %v2719_v23 = vrot.slane %v5316_v32, 5  ;;  %v3328_v47 = vcombine.low %v2668_v63, %v2672_v31  ;;  %v5662_v32 = vld [vmem:[#allocation8_spill] sm:$0xff] }
  0xb9   :  { %3789 = vmatpush3.bf16.msra.mxu1 %v4011_v14  ;;  %3740 = vmatprep.mubr.bf16.mxu0 %v3286_v39  ;;  %v3298_v11 = vrot.slane %v4926_v5, 9  ;;  %v3287_v33 = vcombine.low %v2424_v60, %v2438_v10  ;;  %v2708_v56 = vsel %vm4646_vm5, %v3306_v21, %v2707_v51  ;;  %v2712_v13 = vsel %vm4646_vm5, %v3307_v53, %v2711_v30 }
  0xba   :  { %3753 = vmatpush3.bf16.msra.mxu0 %v4010_v42  ;;  %3782 = vmatprep.subr.bf16.mxu1 %v4014_v2  ;;  %v5661_v42 = vld [vmem:[#allocation17_spill] sm:$0xff]  ;;  %v3299_v59 = vrot.slane %v5662_v32, 9  ;;  %v2716_v50 = vsel %vm4646_vm5, %v3308_v37, %v2715_v46  ;;  %v2720_v5 = vsel %vm4646_vm5, %v3309_v4, %v2719_v23  ;;  %v3300_v29 = vrot.slane %v5663_v55, 9 }
  0xbb   :  { %3754 = vmatprep.subr.bf16.mxu0 %v4011_v14  ;;  %v2675_v7 = vrot.slane %v5661_v42, 5  ;;  %v2683_v45 = vrot.slane %v5664_v62, 5  ;;  %v3301_v3 = vrot.slane %v5665_v20, 9  ;;  %v2687_v19 = vrot.slane %v5666_v1, 5 }
  0xbc   :  { %3613 = vmatmul.mubr.bf16.gmra.mrb[12].mxu1 %v5660_v38  ;;  %v3333_v15 = vcombine.low %v2708_v56, %v2712_v13  ;;  %v3334_v48 = vcombine.low %v2716_v50, %v2720_v5  ;;  %v2723_v24 = vrot.slane %v5342_v34, 5  ;;  %v3311_v28 = vrot.slane %v5167_v49, 9  ;;  %v5667_v49 = vld [vmem:[#allocation15_spill] sm:$0xff] }
  0xbd   :  { %3790 = vmatpush3.bf16.msra.mxu1 %v4014_v2  ;;  %3768 = vmatprep.mubr.bf16.mxu1 %v3332_v61  ;;  %v2727_v16 = vrot.slane %v5348_v18, 5  ;;  %v2676_v25 = vsel %vm4646_vm5, %v3298_v11, %v2675_v7  ;;  %v2680_v22 = vsel %vm4646_vm5, %v3299_v59, %v2679_v54  ;;  %v2688_v26 = vsel %vm4646_vm5, %v3301_v3, %v2687_v19 }
  0xbe   :  { %3755 = vmatpush3.bf16.msra.mxu0 %v4011_v14  ;;  %3783 = vmatprep.subr.bf16.mxu1 %v4015_v35  ;;  %v3310_v14 = vrot.slane %v5139_v58, 9  ;;  %v2684_v58 = vsel %vm4646_vm5, %v3300_v29, %v2683_v45  ;;  %v3329_v34 = vcombine.low %v2676_v25, %v2680_v22  ;;  %v3302_v18 = vrot.slane %v5667_v49, 9 }
  0xbf   :  { %3756 = vmatprep.subr.bf16.mxu0 %v4014_v2  ;;  %v2728_v17 = vsel %vm4646_vm5, %v3311_v28, %v2727_v16  ;;  %v3330_v36 = vcombine.low %v2684_v58, %v2688_v26  ;;  %v2691_v40 = vrot.slane %v5668_v12, 5  ;;  %v3303_v9 = vrot.slane %v5669_v6, 9 }
  0xc0   :  { %3741 = vmatmul.mubr.bf16.gmra.mrb[12].mxu0 %v3287_v33  ;;  %v2724_v41 = vsel %vm4646_vm5, %v3310_v14, %v2723_v24  ;;  %v2695_v0 = vrot.slane %v5670_v44, 5 }
  0xc1   :  { %3791 = vmatpush3.bf16.msra.mxu1 %v4015_v35  ;;  %3760 = vmatprep.mubr.bf16.mxu0 %v3328_v47  ;;  %v3335_v8 = vcombine.low %v2724_v41, %v2728_v17  ;;  %v2692_v43 = vsel %vm4646_vm5, %v3302_v18, %v2691_v40 }
  0xc2   :  { %3757 = vmatpush3.bf16.msra.mxu0 %v4014_v2  ;;  %v2696_v39 = vsel %vm4646_vm5, %v3303_v9, %v2695_v0 }
  0xc3   :  { %3758 = vmatprep.subr.bf16.mxu0 %v4015_v35  ;;  %v3331_v57 = vcombine.low %v2692_v43, %v2696_v39 }
  0xc4   :  { %3769 = vmatmul.mubr.bf16.vlgmr.msra.gmra.mrb[16].mxu1 %v3333_v15 }
  0xc5   :  { %3772 = vmatprep.mubr.bf16.mxu1 %v3334_v48 }
  0xc6   :  { %3759 = vmatpush3.bf16.msra.mxu0 %v4015_v35 }
  0xc9   :  { %3761 = vmatmul.mubr.bf16.vlgmr.msra.gmra.mrb[0].mxu0 %v3329_v34 }
  0xca   :  { %3764 = vmatprep.mubr.bf16.mxu0 %v3330_v36 }
  0xcc   :  { %3773 = vmatmul.mubr.bf16.gmra.mrb[20].mxu1 %v3335_v8 }
  0xd1   :  { %3765 = vmatmul.mubr.bf16.gmra.mrb[4].mxu0 %v3331_v57 }
 0x177   :  { %v3602_v52 = vpop.f32.mrb[0].mxu1 }
 0x178   :  { %v1154_v21 = vpop.f32.mrb[1].mxu1 }
 0x179   :  { %v3603_v2 = vpop.f32.mrb[2].mxu1 }
 0x17a   :  { %v1157_v53 = vpop.f32.mrb[3].mxu1 }
 0x17f   :  { %v5449_v51 = vpop.f32.mrb[4].mxu1 }
 0x180   :  { %v5451_v60 = vpop.f32.mrb[5].mxu1 }
 0x181   :  { %v5453_v63 = vpop.f32.mrb[6].mxu1 }
 0x182   :  { %v5455_v30 = vpop.f32.mrb[7].mxu1 }
 0x187   :  { %v3610_v10 = vpop.f32.mrb[8].mxu1 }
 0x188   :  { %v1186_v31 = vpop.f32.mrb[9].mxu1 }
 0x189   :  { %v3611_v61 = vpop.f32.mrb[10].mxu1 }
 0x18a   :  { %v1189_v27 = vpop.f32.mrb[11].mxu1 }
 0x18b   :  { %v3738_v35 = vpop.f32.mrb[8].mxu0 }
 0x18c   :  { %v3800_v37 = vadd.f32 %v3738_v35, %v3610_v10  ;;  %v2602_v46 = vpop.f32.mrb[9].mxu0 }
 0x18d   :  { %v3802_v4 = vadd.f32 %v2602_v46, %v1186_v31  ;;  %v3739_v23 = vpop.f32.mrb[10].mxu0 }
 0x18e   :  { %v3804_v38 = vadd.f32 %v3739_v23, %v3611_v61  ;;  %v2605_v47 = vpop.f32.mrb[11].mxu0 }
 0x18f   :  { %v3614_v11 = vpop.f32.mrb[12].mxu1  ;;  %v3806_v33 = vadd.f32 %v2605_v47, %v1189_v27 }
 0x190   :  { %v1202_v42 = vpop.f32.mrb[13].mxu1 }
 0x191   :  { %v3615_v7 = vpop.f32.mrb[14].mxu1 }
 0x192   :  { %v1205_v56 = vpop.f32.mrb[15].mxu1 }
 0x193   :  { %v3742_v13 = vpop.f32.mrb[12].mxu0 }
 0x194   :  { %v3808_v32 = vadd.f32 %v3742_v13, %v3614_v11  ;;  %v2618_v59 = vpop.f32.mrb[13].mxu0 }
 0x195   :  { %v3810_v54 = vadd.f32 %v2618_v59, %v1202_v42  ;;  %v3743_v50 = vpop.f32.mrb[14].mxu0 }
 0x196   :  { %v3812_v5 = vadd.f32 %v3743_v50, %v3615_v7  ;;  %v2621_v55 = vpop.f32.mrb[15].mxu0 }
 0x197   :  { %v3770_v29 = vpop.f32.mrb[16].mxu1  ;;  %v3814_v62 = vadd.f32 %v2621_v55, %v1205_v56 }
 0x198   :  { %v5457_v45 = vadd.f32 %v3800_v37, %v3770_v29  ;;  %v2892_v20 = vpop.f32.mrb[17].mxu1 }
 0x199   :  { %v5459_v3 = vadd.f32 %v3802_v4, %v2892_v20  ;;  %v3771_v1 = vpop.f32.mrb[18].mxu1 }
 0x19a   :  { %2949 = vst [vmem:[%s5546_s4 + $0x50] sm:$0xff] %v5457_v45  ;;  %v5465_v19 = vadd.f32 %v3804_v38, %v3771_v1  ;;  %v2895_v15 = vpop.f32.mrb[19].mxu1 }
 0x19b   :  { %2947 = vst [vmem:[%s5546_s4 + $0x40] sm:$0xff] %v5459_v3  ;;  %v5471_v14 = vadd.f32 %v3806_v33, %v2895_v15 }
 0x19c   :  { %v3762_v48 = vpop.f32.mrb[0].mxu0  ;;  %2950 = vst [vmem:[%s5546_s4 + $0x58] sm:$0xff] %v5465_v19  ;;  %v2987_v55 = vmul.f32 %v5465_v19, %v5465_v19 }
 0x19d   :  { %v3792_v24 = vadd.f32 %v3762_v48, %v3602_v52  ;;  %v2860_v28 = vpop.f32.mrb[1].mxu0  ;;  %2948 = vst [vmem:[%s5546_s4 + $0x48] sm:$0xff] %v5471_v14  ;;  %v2985_v13 = vmul.f32 %v5471_v14, %v5471_v14 }
 0x19e   :  { %v3793_v16 = vadd.f32 %v2860_v28, %v1154_v21  ;;  %v3763_v25 = vpop.f32.mrb[2].mxu0 }
 0x19f   :  { %2941 = vst [vmem:[%s5546_s4 + $0x10] sm:$0xff] %v3792_v24  ;;  %v3794_v22 = vadd.f32 %v3763_v25, %v3603_v2  ;;  %v2863_v58 = vpop.f32.mrb[3].mxu0  ;;  %v3774_v26 = vpop.f32.mrb[20].mxu1  ;;  %v2978_v0 = vmul.f32 %v3792_v24, %v3792_v24 }
 0x1a0   :  { %2939 = vst [vmem:[%s5546_s4] sm:$0xff] %v3793_v16  ;;  %v3795_v34 = vadd.f32 %v2863_v58, %v1157_v53  ;;  %v5487_v49 = vadd.f32 %v3808_v32, %v3774_v26  ;;  %v2908_v18 = vpop.f32.mrb[21].mxu1  ;;  %v2976_v36 = vmul.f32 %v3793_v16, %v3793_v16 }
 0x1a1   :  { %2942 = vst [vmem:[%s5546_s4 + $0x18] sm:$0xff] %v3794_v22  ;;  %v3811_v41 = vadd.f32 %v3810_v54, %v2908_v18  ;;  %v3775_v17 = vpop.f32.mrb[22].mxu1  ;;  %v2979_v21 = vmul.f32 %v3794_v22, %v3794_v22  ;;  %v2986_v54 = vmul.f32 %v5457_v45, %v5457_v45 }
 0x1a2   :  { %2940 = vst [vmem:[%s5546_s4 + $0x8] sm:$0xff] %v3795_v34  ;;  %v2955_v12 = vadd.f32 %v3795_v34, %v3793_v16  ;;  %v2977_v40 = vmul.f32 %v3795_v34, %v3795_v34  ;;  %2953 = vst [vmem:[%s5546_s4 + $0x70] sm:$0xff] %v5487_v49  ;;  %v3813_v6 = vadd.f32 %v3812_v5, %v3775_v17  ;;  %v2911_v9 = vpop.f32.mrb[23].mxu1 }
 0x1a3   :  { %2951 = vst [vmem:[%s5546_s4 + $0x60] sm:$0xff] %v3811_v41  ;;  %v3815_v44 = vadd.f32 %v3814_v62, %v2911_v9  ;;  %v2988_v20 = vmul.f32 %v3811_v41, %v3811_v41 }
 0x1a4   :  { %v2956_v8 = vadd.f32 %v3792_v24, %v2955_v12  ;;  %v2992_v43 = vadd.f32 %v2977_v40, %v2976_v36  ;;  %v3766_v39 = vpop.f32.mrb[4].mxu0  ;;  %2954 = vst [vmem:[%s5546_s4 + $0x78] sm:$0xff] %v3813_v6 }
 0x1a5   :  { %v3796_v57 = vadd.f32 %v3766_v39, %v5449_v51  ;;  %v2876_v52 = vpop.f32.mrb[5].mxu0  ;;  %2952 = vst [vmem:[%s5546_s4 + $0x68] sm:$0xff] %v3815_v44  ;;  %v2989_v48 = vmul.f32 %v3815_v44, %v3815_v44 }
 0x1a6   :  { %v2993_v2 = vadd.f32 %v2992_v43, %v2978_v0  ;;  %v3797_v53 = vadd.f32 %v2876_v52, %v5451_v60  ;;  %v2957_v10 = vadd.f32 %v3794_v22, %v2956_v8  ;;  %v3767_v31 = vpop.f32.mrb[6].mxu0 }
 0x1a7   :  { %2945 = vst [vmem:[%s5546_s4 + $0x30] sm:$0xff] %v3796_v57  ;;  %v3798_v61 = vadd.f32 %v3767_v31, %v5453_v63  ;;  %v2879_v27 = vpop.f32.mrb[7].mxu0  ;;  %v2982_v23 = vmul.f32 %v3796_v57, %v3796_v57 }
 0x1a8   :  { %2943 = vst [vmem:[%s5546_s4 + $0x20] sm:$0xff] %v3797_v53  ;;  %v2958_v51 = vadd.f32 %v3797_v53, %v2957_v10  ;;  %v2980_v35 = vmul.f32 %v3797_v53, %v3797_v53  ;;  %v2994_v37 = vadd.f32 %v2993_v2, %v2979_v21  ;;  %v3799_v46 = vadd.f32 %v2879_v27, %v5455_v30 }
 0x1a9   :  { %2946 = vst [vmem:[%s5546_s4 + $0x38] sm:$0xff] %v3798_v61  ;;  %v2983_v11 = vmul.f32 %v3798_v61, %v3798_v61  ;;  %v2984_v30 = vmul.f32 %v5459_v3, %v5459_v3 }
 0x1aa   :  { %v2995_v60 = vadd.f32 %v2994_v37, %v2980_v35  ;;  %2944 = vst [vmem:[%s5546_s4 + $0x28] sm:$0xff] %v3799_v46  ;;  %v2959_v63 = vadd.f32 %v3799_v46, %v2958_v51  ;;  %v2981_v4 = vmul.f32 %v3799_v46, %v3799_v46 }
 0x1ac   :  { %v2960_v38 = vadd.f32 %v3796_v57, %v2959_v63  ;;  %v2996_v47 = vadd.f32 %v2995_v60, %v2981_v4 }
 0x1ae   :  { %v2961_v33 = vadd.f32 %v3798_v61, %v2960_v38  ;;  %v2997_v42 = vadd.f32 %v2996_v47, %v2982_v23 }
 0x1b0   :  { %v2962_v7 = vadd.f32 %v5459_v3, %v2961_v33  ;;  %v2998_v56 = vadd.f32 %v2997_v42, %v2983_v11 }
 0x1b2   :  { %v2999_v32 = vadd.f32 %v2998_v56, %v2984_v30  ;;  %v2963_v59 = vadd.f32 %v5471_v14, %v2962_v7  ;;  %v2990_v14 = vmul.f32 %v5487_v49, %v5487_v49 }
 0x1b4   :  { %v2964_v50 = vadd.f32 %v5457_v45, %v2963_v59  ;;  %v3000_v5 = vadd.f32 %v2999_v32, %v2985_v13  ;;  %v2991_v45 = vmul.f32 %v3813_v6, %v3813_v6 }
 0x1b6   :  { %v2965_v29 = vadd.f32 %v5465_v19, %v2964_v50  ;;  %v3001_v62 = vadd.f32 %v3000_v5, %v2986_v54 }
 0x1b8   :  { %v2966_v3 = vadd.f32 %v3811_v41, %v2965_v29  ;;  %v3002_v1 = vadd.f32 %v3001_v62, %v2987_v55 }
 0x1ba   :  { %v2967_v15 = vadd.f32 %v3815_v44, %v2966_v3  ;;  %v3003_v24 = vadd.f32 %v3002_v1, %v2988_v20 }
 0x1bc   :  { %v2968_v28 = vadd.f32 %v5487_v49, %v2967_v15  ;;  %v3004_v16 = vadd.f32 %v3003_v24, %v2989_v48 }
 0x1be   :  { %v2969_v25 = vadd.f32 %v3813_v6, %v2968_v28  ;;  %v3005_v22 = vadd.f32 %v3004_v16, %v2990_v14 }
 0x1c0   :  { %v2970_v58 = vrot.slane %v2969_v25, 4  ;;  %v3006_v26 = vadd.f32 %v3005_v22, %v2991_v45 }
 0x1c2   :  { %v2971_v34 = vadd.f32 %v2970_v58, %v2969_v25  ;;  %v3007_v19 = vrot.slane %v3006_v26, 4 }
 0x1c4   :  { %v2972_v18 = vrot.slane %v2971_v34, 2  ;;  %v3008_v17 = vadd.f32 %v3007_v19, %v3006_v26 }
 0x1c6   :  { %v2973_v41 = vadd.f32 %v2972_v18, %v2971_v34  ;;  %v3009_v36 = vrot.slane %v3008_v17, 2 }
 0x1c8   :  { %v2974_v12 = vrot.slane %v2973_v41, 1  ;;  %v3010_v40 = vadd.f32 %v3009_v36, %v3008_v17 }
 0x1ca   :  { %v3011_v9 = vrot.slane %v3010_v40, 1  ;;  %v2975_v44 = vadd.f32 %v2974_v12, %v2973_v41 }
 0x1cc   :  { %v3012_v0 = vadd.f32 %v3011_v9, %v3010_v40 }
 0x1ce   :  { %v3014_v8 = vsel %vm3013_vm6, %v2975_v44, %v3012_v0 }
 0x1cf   :  { %3015 = vst [vmem:[%s5547_s5] sm:$0x3] %v3014_v8 }

</bundles_post_ra>
